<compile_context>
chip_gen: v5e
topology: v5e:2x2
jax: 0.10.0
libtpu: 0.0.40
codegen_flags: <defaults>
</compile_context>

<pallas_src>
import functools

import jax
import jax.numpy as jnp
from jax.experimental import pallas as pl
from jax.experimental.pallas import tpu as pltpu

Z_DIM = 2          # real latent dim (as in the PyTorch module)
Z_PAD = 128        # lane-padded latent head width inside the kernel
IN_DIM = 784
OUT_DIM = 784
IN_PAD = 896       # 7 * 128, lane-dense input width
OUT_PAD = 896      # 7 * 128, lane-dense output width
HID = 512


def _round_up(a, m):
    return (a + m - 1) // m * m


def vae_kernel(x_ref, w1_ref, b1_ref, wh_ref, bh_ref, w3_ref, b3_ref,
               w4_ref, b4_ref, eps_ref, recon_ref, mulv_ref):
    # ---- encoder: fc1 + ReLU (bf16 MXU, f32 accumulate) ----
    x = x_ref[...].astype(jnp.bfloat16)                               # (TB, 896)
    h = jnp.dot(x, w1_ref[...], preferred_element_type=jnp.float32)
    h = jnp.maximum(h + b1_ref[...], 0.0)                             # (TB, 512)

    # ---- fused fc_mu || fc_var head: ONE (512 -> 128) matmul ----
    head = jnp.dot(h.astype(jnp.bfloat16), wh_ref[...],
                   preferred_element_type=jnp.float32) + bh_ref[...]  # (TB, 128)
    mulv_ref[...] = head           # lanes 0:2 = mu, lanes 2:4 = log_var

    # ---- reparameterize only the 2 real latent lanes ----
    eps = eps_ref[...]                                                # (TB, 128)
    z0 = eps[:, 0:1] * jnp.exp(0.5 * head[:, Z_DIM:Z_DIM + 1]) + head[:, 0:1]
    z1 = eps[:, 1:2] * jnp.exp(0.5 * head[:, Z_DIM + 1:Z_DIM + 2]) + head[:, 1:2]

    # ---- decoder fc3 as a 2-term VPU broadcast (z_dim == 2, no MXU pass) ----
    h3 = z0 * w3_ref[0:1, :] + z1 * w3_ref[1:2, :] + b3_ref[...]      # (TB, 512)
    h3 = jnp.maximum(h3, 0.0)

    # ---- decoder fc4 + sigmoid ----
    logits = jnp.dot(h3.astype(jnp.bfloat16), w4_ref[...],
                     preferred_element_type=jnp.float32) + b4_ref[...]
    recon_ref[...] = jax.nn.sigmoid(logits)                           # (TB, 896)


def init_params(key):
    """Deterministic params, PyTorch-nn.Linear-like uniform(+-1/sqrt(fan_in)).

    Linear weights are stored transposed vs. PyTorch, i.e. (in, out), so the
    kernel computes y = x @ W + b directly.
    """
    def linear(k, fan_in, fan_out):
        kw, kb = jax.random.split(k)
        bound = 1.0 / jnp.sqrt(fan_in)
        w = jax.random.uniform(kw, (fan_in, fan_out), jnp.float32, -bound, bound)
        b = jax.random.uniform(kb, (fan_out,), jnp.float32, -bound, bound)
        return w, b

    k1, k2, k3, k4, k5 = jax.random.split(key, 5)
    p = {}
    p["w1"], p["b1"] = linear(k1, IN_DIM, HID)       # fc1
    p["wmu"], p["bmu"] = linear(k2, HID, Z_DIM)      # fc_mu
    p["wvar"], p["bvar"] = linear(k3, HID, Z_DIM)    # fc_var
    p["w3"], p["b3"] = linear(k4, Z_DIM, HID)        # fc3
    p["w4"], p["b4"] = linear(k5, HID, OUT_DIM)      # fc4
    return p


def prep_params(p):
    """One-time pad/pack of weights for the kernel. Call once, reuse per step."""
    # fused mu||var head: cols 0:2 = wmu, 2:4 = wvar, rest zero (inert).
    wh = jnp.zeros((HID, Z_PAD), jnp.float32)
    wh = wh.at[:, 0:Z_DIM].set(p["wmu"]).at[:, Z_DIM:2 * Z_DIM].set(p["wvar"])
    bh = jnp.zeros((Z_PAD,), jnp.float32)
    bh = bh.at[0:Z_DIM].set(p["bmu"]).at[Z_DIM:2 * Z_DIM].set(p["bvar"])
    # lane-dense 784 -> 896 padding (zero rows/cols are mathematically inert).
    w1 = jnp.pad(p["w1"], ((0, IN_PAD - IN_DIM), (0, 0)))
    w4 = jnp.pad(p["w4"], ((0, 0), (0, OUT_PAD - OUT_DIM)))
    b4 = jnp.pad(p["b4"], (0, OUT_PAD - OUT_DIM))
    return {
        "w1": w1.astype(jnp.bfloat16),                      # (896, 512)
        "b1": p["b1"].reshape(1, HID).astype(jnp.float32),
        "wh": wh.astype(jnp.bfloat16),                      # (512, 128)
        "bh": bh.reshape(1, Z_PAD).astype(jnp.float32),
        "w3": p["w3"].astype(jnp.float32),                  # (2, 512), VPU only
        "b3": p["b3"].reshape(1, HID).astype(jnp.float32),
        "w4": w4.astype(jnp.bfloat16),                      # (512, 896)
        "b4": b4.reshape(1, OUT_PAD).astype(jnp.float32),
    }


@jax.jit
def vae_forward(x, packed, eps):
    """x: anything flattening to (B, 784). eps: (B, 2) ~ N(0, 1).

    Returns (recon (B, 784) f32, mu (B, 2) f32, log_var (B, 2) f32).
    """
    x_flat = x.reshape(-1, IN_DIM).astype(jnp.float32)
    B = x_flat.shape[0]

    # Batch tile: 256 rows (MXU-friendly on v6e/v7x; small batches use B itself).
    TB = min(256, _round_up(B, 8))
    B_pad = _round_up(B, TB)
    grid = (pl.cdiv(B_pad, TB),)

    x_p = jnp.pad(x_flat, ((0, B_pad - B), (0, IN_PAD - IN_DIM)))
    eps_p = jnp.pad(eps.astype(jnp.float32),
                    ((0, B_pad - B), (0, Z_PAD - Z_DIM)))

    row = lambda i: (i, 0)       # batch-blocked arrays
    const = lambda i: (0, 0)     # weights: resident across grid steps

    recon_p, mulv_p = pl.pallas_call(
        vae_kernel,
        grid=grid,
        out_shape=(
            jax.ShapeDtypeStruct((B_pad, OUT_PAD), jnp.float32),
            jax.ShapeDtypeStruct((B_pad, Z_PAD), jnp.float32),
        ),
        in_specs=[
            pl.BlockSpec((TB, IN_PAD), row),        # x
            pl.BlockSpec((IN_PAD, HID), const),     # w1 (bf16)
            pl.BlockSpec((1, HID), const),          # b1
            pl.BlockSpec((HID, Z_PAD), const),      # fused mu||var weight (bf16)
            pl.BlockSpec((1, Z_PAD), const),        # fused mu||var bias
            pl.BlockSpec((Z_DIM, HID), const),      # w3 (2, 512)
            pl.BlockSpec((1, HID), const),          # b3
            pl.BlockSpec((HID, OUT_PAD), const),    # w4 (bf16)
            pl.BlockSpec((1, OUT_PAD), const),      # b4
            pl.BlockSpec((TB, Z_PAD), row),         # eps
        ],
        out_specs=(
            pl.BlockSpec((TB, OUT_PAD), row),       # recon
            pl.BlockSpec((TB, Z_PAD), row),         # mu||log_var
        ),
        compiler_params=pltpu.CompilerParams(
            dimension_semantics=("parallel",),
            vmem_limit_bytes=32 << 20,
        ),
    )(x_p, packed["w1"], packed["b1"], packed["wh"], packed["bh"],
      packed["w3"], packed["b3"], packed["w4"], packed["b4"], eps_p)

    recon = recon_p[:B, :OUT_DIM]
    mu = mulv_p[:B, 0:Z_DIM]
    log_var = mulv_p[:B, Z_DIM:2 * Z_DIM]
    return recon, mu, log_var


if __name__ == "__main__":
    key = jax.random.PRNGKey(0)
    k_param, k_x, k_eps = jax.random.split(key, 3)

    params = init_params(k_param)
    packed = prep_params(params)            # one-time pad/pack (outside forward)

    # MNIST-like input: batch=8, 1x28x28, values in [0, 1)
    x = jax.random.uniform(k_x, (8, 1, 28, 28), jnp.float32)
    # eps ~ N(0, 1), matching torch.randn_like(std) with shape (B, z_dim)
    eps = jax.random.normal(k_eps, (8, Z_DIM), jnp.float32)

    recon, mu, log_var = vae_forward(x, packed, eps)
    jax.block_until_ready((recon, mu, log_var))

    assert recon.shape == (8, OUT_DIM)
    assert mu.shape == (8, Z_DIM)
    assert log_var.shape == (8, Z_DIM)
    assert bool(jnp.all(jnp.isfinite(recon)))
    assert bool(jnp.all((recon >= 0.0) & (recon <= 1.0)))
    print("KERNEL_OK")
</pallas_src>

<mosaic_0001>
module attributes {stable_mosaic.version = 11 : i64} {
  func.func @vae_kernel(%arg0: i32, %arg1: memref<8x896xf32, #tpu.memory_space<vmem>>, %arg2: memref<896x512xbf16, #tpu.memory_space<vmem>>, %arg3: memref<1x512xf32, #tpu.memory_space<vmem>>, %arg4: memref<512x128xbf16, #tpu.memory_space<vmem>>, %arg5: memref<1x128xf32, #tpu.memory_space<vmem>>, %arg6: memref<2x512xf32, #tpu.memory_space<vmem>>, %arg7: memref<1x512xf32, #tpu.memory_space<vmem>>, %arg8: memref<512x896xbf16, #tpu.memory_space<vmem>>, %arg9: memref<1x896xf32, #tpu.memory_space<vmem>>, %arg10: memref<8x128xf32, #tpu.memory_space<vmem>>, %arg11: memref<8x896xf32, #tpu.memory_space<vmem>>, %arg12: memref<8x128xf32, #tpu.memory_space<vmem>>) attributes {dimension_semantics = [#tpu.dimension_semantics<parallel>], iteration_bounds = array<i64: 1>, scalar_prefetch = 0 : i64, scratch_operands = 0 : i64, tpu.core_type = #tpu.core_type<tc>, window_params = [{transform_indices = @transform_0, window_bounds = array<i64: 8, 896>}, {pipeline_mode = #tpu.pipeline_mode<synchronous>, transform_indices = @transform_1, window_bounds = array<i64: 896, 512>}, {pipeline_mode = #tpu.pipeline_mode<synchronous>, transform_indices = @transform_2, window_bounds = array<i64: 1, 512>}, {pipeline_mode = #tpu.pipeline_mode<synchronous>, transform_indices = @transform_3, window_bounds = array<i64: 512, 128>}, {pipeline_mode = #tpu.pipeline_mode<synchronous>, transform_indices = @transform_4, window_bounds = array<i64: 1, 128>}, {pipeline_mode = #tpu.pipeline_mode<synchronous>, transform_indices = @transform_5, window_bounds = array<i64: 2, 512>}, {pipeline_mode = #tpu.pipeline_mode<synchronous>, transform_indices = @transform_6, window_bounds = array<i64: 1, 512>}, {pipeline_mode = #tpu.pipeline_mode<synchronous>, transform_indices = @transform_7, window_bounds = array<i64: 512, 896>}, {pipeline_mode = #tpu.pipeline_mode<synchronous>, transform_indices = @transform_8, window_bounds = array<i64: 1, 896>}, {transform_indices = @transform_9, window_bounds = array<i64: 8, 128>}, {transform_indices = @transform_10, window_bounds = array<i64: 8, 896>}, {transform_indices = @transform_11, window_bounds = array<i64: 8, 128>}]} {
    %c0 = arith.constant 0 : index
    %c0_0 = arith.constant 0 : index
    %0 = vector.load %arg1[%c0, %c0_0] : memref<8x896xf32, #tpu.memory_space<vmem>>, vector<8x896xf32>
    %1 = arith.truncf %0 : vector<8x896xf32> to vector<8x896xbf16>
    %c0_1 = arith.constant 0 : index
    %c0_2 = arith.constant 0 : index
    %2 = vector.load %arg2[%c0_1, %c0_2] : memref<896x512xbf16, #tpu.memory_space<vmem>>, vector<896x512xbf16>
    %cst = arith.constant dense<0.000000e+00> : vector<8x512xf32>
    %3 = tpu.matmul %1, %2, %cst {dimension_numbers = #tpu.dot_dimension_numbers<[1], [0], [0], [1], [0, 0, 1, 1], [], []>} : vector<8x896xbf16>, vector<896x512xbf16>, vector<8x512xf32> -> vector<8x512xf32>
    %c0_3 = arith.constant 0 : index
    %c0_4 = arith.constant 0 : index
    %4 = vector.load %arg3[%c0_3, %c0_4] : memref<1x512xf32, #tpu.memory_space<vmem>>, vector<1x512xf32>
    %5 = vector.broadcast %4 : vector<1x512xf32> to vector<8x512xf32>
    %6 = arith.addf %3, %5 : vector<8x512xf32>
    %cst_5 = arith.constant 0.000000e+00 : f32
    %7 = vector.broadcast %cst_5 : f32 to vector<8x512xf32>
    %8 = arith.maximumf %6, %7 : vector<8x512xf32>
    %9 = arith.truncf %8 : vector<8x512xf32> to vector<8x512xbf16>
    %c0_6 = arith.constant 0 : index
    %c0_7 = arith.constant 0 : index
    %10 = vector.load %arg4[%c0_6, %c0_7] : memref<512x128xbf16, #tpu.memory_space<vmem>>, vector<512x128xbf16>
    %cst_8 = arith.constant dense<0.000000e+00> : vector<8x128xf32>
    %11 = tpu.matmul %9, %10, %cst_8 {dimension_numbers = #tpu.dot_dimension_numbers<[1], [0], [0], [1], [0, 0, 1, 1], [], []>} : vector<8x512xbf16>, vector<512x128xbf16>, vector<8x128xf32> -> vector<8x128xf32>
    %c0_9 = arith.constant 0 : index
    %c0_10 = arith.constant 0 : index
    %12 = vector.load %arg5[%c0_9, %c0_10] : memref<1x128xf32, #tpu.memory_space<vmem>>, vector<1x128xf32>
    %13 = vector.broadcast %12 : vector<1x128xf32> to vector<8x128xf32>
    %14 = arith.addf %11, %13 : vector<8x128xf32>
    %c0_11 = arith.constant 0 : index
    %c0_12 = arith.constant 0 : index
    %15 = vector.load %arg12[%c0_11, %c0_12] : memref<8x128xf32, #tpu.memory_space<vmem>>, vector<8x128xf32>
    tpu.vector_store %arg12[%c0_11, %c0_12], %14 {strides = array<i32>} : memref<8x128xf32, #tpu.memory_space<vmem>>, vector<8x128xf32>,
    %c0_13 = arith.constant 0 : index
    %c0_14 = arith.constant 0 : index
    %16 = vector.load %arg10[%c0_13, %c0_14] : memref<8x128xf32, #tpu.memory_space<vmem>>, vector<8x128xf32>
    %17 = vector.extract_strided_slice %16 {offsets = [0, 0], sizes = [8, 1], strides = [1, 1]} : vector<8x128xf32> to vector<8x1xf32>
    %18 = vector.extract_strided_slice %14 {offsets = [0, 2], sizes = [8, 1], strides = [1, 1]} : vector<8x128xf32> to vector<8x1xf32>
    %cst_15 = arith.constant 5.000000e-01 : f32
    %19 = vector.broadcast %cst_15 : f32 to vector<8x1xf32>
    %20 = arith.mulf %19, %18 : vector<8x1xf32>
    %21 = math.exp %20 : vector<8x1xf32>
    %22 = arith.mulf %17, %21 : vector<8x1xf32>
    %23 = vector.extract_strided_slice %14 {offsets = [0, 0], sizes = [8, 1], strides = [1, 1]} : vector<8x128xf32> to vector<8x1xf32>
    %24 = arith.addf %22, %23 : vector<8x1xf32>
    %25 = vector.extract_strided_slice %16 {offsets = [0, 1], sizes = [8, 1], strides = [1, 1]} : vector<8x128xf32> to vector<8x1xf32>
    %26 = vector.extract_strided_slice %14 {offsets = [0, 3], sizes = [8, 1], strides = [1, 1]} : vector<8x128xf32> to vector<8x1xf32>
    %cst_16 = arith.constant 5.000000e-01 : f32
    %27 = vector.broadcast %cst_16 : f32 to vector<8x1xf32>
    %28 = arith.mulf %27, %26 : vector<8x1xf32>
    %29 = math.exp %28 : vector<8x1xf32>
    %30 = arith.mulf %25, %29 : vector<8x1xf32>
    %31 = vector.extract_strided_slice %14 {offsets = [0, 1], sizes = [8, 1], strides = [1, 1]} : vector<8x128xf32> to vector<8x1xf32>
    %32 = arith.addf %30, %31 : vector<8x1xf32>
    %c0_17 = arith.constant 0 : index
    %c0_18 = arith.constant 0 : index
    %33 = vector.load %arg6[%c0_17, %c0_18] : memref<2x512xf32, #tpu.memory_space<vmem>>, vector<1x512xf32>
    %34 = vector.broadcast %24 : vector<8x1xf32> to vector<8x512xf32>
    %35 = vector.broadcast %33 : vector<1x512xf32> to vector<8x512xf32>
    %36 = arith.mulf %34, %35 : vector<8x512xf32>
    %c1 = arith.constant 1 : index
    %c0_19 = arith.constant 0 : index
    %37 = vector.load %arg6[%c1, %c0_19] : memref<2x512xf32, #tpu.memory_space<vmem>>, vector<1x512xf32>
    %38 = vector.broadcast %32 : vector<8x1xf32> to vector<8x512xf32>
    %39 = vector.broadcast %37 : vector<1x512xf32> to vector<8x512xf32>
    %40 = arith.mulf %38, %39 : vector<8x512xf32>
    %41 = arith.addf %36, %40 : vector<8x512xf32>
    %c0_20 = arith.constant 0 : index
    %c0_21 = arith.constant 0 : index
    %42 = vector.load %arg7[%c0_20, %c0_21] : memref<1x512xf32, #tpu.memory_space<vmem>>, vector<1x512xf32>
    %43 = vector.broadcast %42 : vector<1x512xf32> to vector<8x512xf32>
    %44 = arith.addf %41, %43 : vector<8x512xf32>
    %cst_22 = arith.constant 0.000000e+00 : f32
    %45 = vector.broadcast %cst_22 : f32 to vector<8x512xf32>
    %46 = arith.maximumf %44, %45 : vector<8x512xf32>
    %47 = arith.truncf %46 : vector<8x512xf32> to vector<8x512xbf16>
    %c0_23 = arith.constant 0 : index
    %c0_24 = arith.constant 0 : index
    %48 = vector.load %arg8[%c0_23, %c0_24] : memref<512x896xbf16, #tpu.memory_space<vmem>>, vector<512x896xbf16>
    %cst_25 = arith.constant dense<0.000000e+00> : vector<8x896xf32>
    %49 = tpu.matmul %47, %48, %cst_25 {dimension_numbers = #tpu.dot_dimension_numbers<[1], [0], [0], [1], [0, 0, 1, 1], [], []>} : vector<8x512xbf16>, vector<512x896xbf16>, vector<8x896xf32> -> vector<8x896xf32>
    %c0_26 = arith.constant 0 : index
    %c0_27 = arith.constant 0 : index
    %50 = vector.load %arg9[%c0_26, %c0_27] : memref<1x896xf32, #tpu.memory_space<vmem>>, vector<1x896xf32>
    %51 = vector.broadcast %50 : vector<1x896xf32> to vector<8x896xf32>
    %52 = arith.addf %49, %51 : vector<8x896xf32>
    %53 = arith.negf %52 : vector<8x896xf32>
    %54 = math.exp %53 : vector<8x896xf32>
    %cst_28 = arith.constant 1.000000e+00 : f32
    %55 = vector.broadcast %cst_28 : f32 to vector<8x896xf32>
    %56 = arith.addf %55, %54 : vector<8x896xf32>
    %57 = arith.divf %55, %56 : vector<8x896xf32>
    %c0_29 = arith.constant 0 : index
    %c0_30 = arith.constant 0 : index
    %58 = vector.load %arg11[%c0_29, %c0_30] : memref<8x896xf32, #tpu.memory_space<vmem>>, vector<8x896xf32>
    tpu.vector_store %arg11[%c0_29, %c0_30], %57 {strides = array<i32>} : memref<8x896xf32, #tpu.memory_space<vmem>>, vector<8x896xf32>,
    return
  }
  func.func @transform_0(%arg0: i32) -> (i32, i32) {
    %c0_i32 = arith.constant 0 : i32
    %c0_i32_0 = arith.constant 0 : i32
    return %arg0, %c0_i32 : i32, i32
  }
  func.func @transform_1(%arg0: i32) -> (i32, i32) {
    %c0_i32 = arith.constant 0 : i32
    %c0_i32_0 = arith.constant 0 : i32
    %c0_i32_1 = arith.constant 0 : i32
    return %c0_i32, %c0_i32_0 : i32, i32
  }
  func.func @transform_2(%arg0: i32) -> (i32, i32) {
    %c0_i32 = arith.constant 0 : i32
    %c0_i32_0 = arith.constant 0 : i32
    %c0_i32_1 = arith.constant 0 : i32
    return %c0_i32, %c0_i32_0 : i32, i32
  }
  func.func @transform_3(%arg0: i32) -> (i32, i32) {
    %c0_i32 = arith.constant 0 : i32
    %c0_i32_0 = arith.constant 0 : i32
    %c0_i32_1 = arith.constant 0 : i32
    return %c0_i32, %c0_i32_0 : i32, i32
  }
  func.func @transform_4(%arg0: i32) -> (i32, i32) {
    %c0_i32 = arith.constant 0 : i32
    %c0_i32_0 = arith.constant 0 : i32
    %c0_i32_1 = arith.constant 0 : i32
    return %c0_i32, %c0_i32_0 : i32, i32
  }
  func.func @transform_5(%arg0: i32) -> (i32, i32) {
    %c0_i32 = arith.constant 0 : i32
    %c0_i32_0 = arith.constant 0 : i32
    %c0_i32_1 = arith.constant 0 : i32
    return %c0_i32, %c0_i32_0 : i32, i32
  }
  func.func @transform_6(%arg0: i32) -> (i32, i32) {
    %c0_i32 = arith.constant 0 : i32
    %c0_i32_0 = arith.constant 0 : i32
    %c0_i32_1 = arith.constant 0 : i32
    return %c0_i32, %c0_i32_0 : i32, i32
  }
  func.func @transform_7(%arg0: i32) -> (i32, i32) {
    %c0_i32 = arith.constant 0 : i32
    %c0_i32_0 = arith.constant 0 : i32
    %c0_i32_1 = arith.constant 0 : i32
    return %c0_i32, %c0_i32_0 : i32, i32
  }
  func.func @transform_8(%arg0: i32) -> (i32, i32) {
    %c0_i32 = arith.constant 0 : i32
    %c0_i32_0 = arith.constant 0 : i32
    %c0_i32_1 = arith.constant 0 : i32
    return %c0_i32, %c0_i32_0 : i32, i32
  }
  func.func @transform_9(%arg0: i32) -> (i32, i32) {
    %c0_i32 = arith.constant 0 : i32
    %c0_i32_0 = arith.constant 0 : i32
    return %arg0, %c0_i32 : i32, i32
  }
  func.func @transform_10(%arg0: i32) -> (i32, i32) {
    %c0_i32 = arith.constant 0 : i32
    %c0_i32_0 = arith.constant 0 : i32
    return %arg0, %c0_i32 : i32, i32
  }
  func.func @transform_11(%arg0: i32) -> (i32, i32) {
    %c0_i32 = arith.constant 0 : i32
    %c0_i32_0 = arith.constant 0 : i32
    return %arg0, %c0_i32 : i32, i32
  }
}

</mosaic_0001>

<bundles_post_ra>
// kernel: vae_forward.1
= control target key start
LH: loop header
LB: loop body
LE: loop exit
PB: predicated region body
PF: predicated region fallthrough
CT: control target
= control target key end

     0   :  { %17 = vsyncpa [#allocation3], 0  ;;  %s7021_s0 = inlined_call_operand.vmem [shape: f32[8,896], index: 0, kind: input, shape index: {}]   ;;  %s7022_s1 = inlined_call_operand.hbm [shape: bf16[896,512], index: 1, kind: input, shape index: {}]   ;;  %s7023_s2 = inlined_call_operand.vmem [shape: f32[1,512], index: 2, kind: input, shape index: {}]   ;;  %s7024_s3 = inlined_call_operand.vmem [shape: bf16[512,128], index: 3, kind: input, shape index: {}]   ;;  %s7025_s4 = inlined_call_operand.vmem [shape: f32[1,128], index: 4, kind: input, shape index: {}]   ;;  %s7026_s5 = inlined_call_operand.vmem [shape: f32[2,512], index: 5, kind: input, shape index: {}]   ;;  %s7027_s6 = inlined_call_operand.vmem [shape: f32[1,512], index: 6, kind: input, shape index: {}]   ;;  %s7028_s7 = inlined_call_operand.hbm [shape: bf16[512,896], index: 7, kind: input, shape index: {}]   ;;  %s7029_s8 = inlined_call_operand.vmem [shape: f32[1,896], index: 8, kind: input, shape index: {}]   ;;  %s7030_s9 = inlined_call_operand.vmem [shape: f32[8,128], index: 9, kind: input, shape index: {}]   ;;  %s7031_s10 = inlined_call_operand.hbm [shape: f32[8,896], index: 10, kind: output, shape index: {0}]   ;;  %s7032_s11 = inlined_call_operand.vmem [shape: f32[8,128], index: 11, kind: output, shape index: {1}]  }
   0x1   :  { %18 = vsyncpa [#allocation6], 0 }
   0x2   :  { %19 = vsyncpa [#allocation4], 0  ;;  %s26_s19 = sshll.u32 %s7022_s1, 4  ;;  %s6677_s20 = smov [#allocation2]   ;;  %s27_s19 = int_to_ptr.hbm [resolvable:$true] %s26_s19 }
   0x3   :  { %s28_s21 = sshll.u32 %s6677_s20, 4  ;;  %s49_s24 = sshll.u32 %s7028_s7, 4  ;;  %s29_s21 = int_to_ptr.vmem [resolvable:$true] %s28_s21  ;;  %s50_s24 = int_to_ptr.hbm [resolvable:$true] %s49_s24 }
   0x4   :  { %s6678_s25 = smov 256   ;;  %s6679_s26 = smov 16  }
   0x5   :  { %34 = dma.hbm_to_vmem [thread:$0]  %s27_s19, 28672, %s29_s21, [#allocation3], %s6678_s25, %s6678_s25, %s6679_s26  }
   0x6   :  { %s6680_s27 = smov [#allocation5]   ;;  %s6681_s29 = smov 448  }
   0x7   :  { %s51_s28 = sshll.u32 %s6680_s27, 4  ;;  %s6682_s30 = smov 28   ;;  %s52_s28 = int_to_ptr.vmem [resolvable:$true] %s51_s28 }
   0x8   :  { %57 = dma.hbm_to_vmem [thread:$0]  %s50_s24, 28672, %s52_s28, [#allocation6], %s6681_s29, %s6681_s29, %s6682_s30  }
   0x9   :  { %6671 = dma.done.wait [#allocation3], 28672  }
   0xa   :  { %6672 = vsyncadd [#allocation3], 4294938624 }
   0xb   :  { %6673 = dma.done.wait [#allocation6], 28672  }
   0xc   :  { %6674 = vsyncadd [#allocation6], 4294938624  ;;  %v4261_v0 = vld [vmem:[#allocation2 + $0xe0] sm:$0xf]  ;;  %v6105_v1 = vld [vmem:[#allocation2 + $0xec] sm:$0xf0] }
   0xd   :  { %v4389_v2 = vld [vmem:[#allocation2 + $0x1e0] sm:$0xf]  ;;  %v4262_v3 = vor.u32 %v6105_v1, %v4261_v0  ;;  %v6137_v4 = vld [vmem:[#allocation2 + $0x1ec] sm:$0xf0]  ;;  %s4132_s1 = sshll.u32 %s7031_s10, 4  ;;  %s4133_s1 = int_to_ptr.hbm [resolvable:$true] %s4132_s1 }
   0xe   :  { %v4517_v5 = vld [vmem:[#allocation2 + $0x2e0] sm:$0xf]  ;;  %v6169_v6 = vld [vmem:[#allocation2 + $0x2ec] sm:$0xf0]  ;;  %v4390_v7 = vor.u32 %v6137_v4, %v4389_v2 }
   0xf   :  { %v4518_v8 = vor.u32 %v6169_v6, %v4517_v5  ;;  %v4645_v9 = vld [vmem:[#allocation2 + $0x3e0] sm:$0xf]  ;;  %v6201_v10 = vld [vmem:[#allocation2 + $0x3ec] sm:$0xf0]  ;;  %1438 = vmatpush.bf16.msra.mxu0 %v4262_v3 }
  0x10   :  { %v4245_v11 = vld [vmem:[#allocation2 + $0xc0] sm:$0xf]  ;;  %v4646_v12 = vor.u32 %v6201_v10, %v4645_v9  ;;  %v6101_v13 = vld [vmem:[#allocation2 + $0xcc] sm:$0xf0]  ;;  %1451 = vmatpush.bf16.msra.mxu1 %v4390_v7 }
  0x11   :  { %v4373_v14 = vld [vmem:[#allocation2 + $0x1c0] sm:$0xf]  ;;  %v6133_v15 = vld [vmem:[#allocation2 + $0x1cc] sm:$0xf0]  ;;  %1464 = vmatpush.bf16.msra.mxu2 %v4518_v8  ;;  %v4246_v16 = vor.u32 %v6101_v13, %v4245_v11 }
  0x12   :  { %v4374_v17 = vor.u32 %v6133_v15, %v4373_v14  ;;  %v4501_v18 = vld [vmem:[#allocation2 + $0x2c0] sm:$0xf]  ;;  %v6165_v19 = vld [vmem:[#allocation2 + $0x2cc] sm:$0xf0]  ;;  %1477 = vmatpush.bf16.msra.mxu3 %v4646_v12 }
  0x13   :  { %v4629_v20 = vld [vmem:[#allocation2 + $0x3c0] sm:$0xf]  ;;  %v4502_v21 = vor.u32 %v6165_v19, %v4501_v18  ;;  %v6197_v22 = vld [vmem:[#allocation2 + $0x3cc] sm:$0xf0]  ;;  %1439 = vmatpush.bf16.msra.mxu0 %v4246_v16 }
  0x14   :  { %v4229_v23 = vld [vmem:[#allocation2 + $0xa0] sm:$0xf]  ;;  %v6097_v24 = vld [vmem:[#allocation2 + $0xac] sm:$0xf0]  ;;  %v4630_v25 = vor.u32 %v6197_v22, %v4629_v20  ;;  %1452 = vmatpush.bf16.msra.mxu1 %v4374_v17 }
  0x15   :  { %v4357_v26 = vld [vmem:[#allocation2 + $0x1a0] sm:$0xf]  ;;  %v6129_v27 = vld [vmem:[#allocation2 + $0x1ac] sm:$0xf0]  ;;  %v4230_v29 = vor.u32 %v6097_v24, %v4229_v23  ;;  %1465 = vmatpush.bf16.msra.mxu2 %v4502_v21 }
  0x16   :  { %v4485_v28 = vld [vmem:[#allocation2 + $0x2a0] sm:$0xf]  ;;  %v6161_v30 = vld [vmem:[#allocation2 + $0x2ac] sm:$0xf0]  ;;  %v4358_v33 = vor.u32 %v6129_v27, %v4357_v26  ;;  %1478 = vmatpush.bf16.msra.mxu3 %v4630_v25 }
  0x17   :  { %v4613_v31 = vld [vmem:[#allocation2 + $0x3a0] sm:$0xf]  ;;  %v6193_v32 = vld [vmem:[#allocation2 + $0x3ac] sm:$0xf0]  ;;  %v4486_v34 = vor.u32 %v6161_v30, %v4485_v28  ;;  %1440 = vmatpush.bf16.msra.mxu0 %v4230_v29 }
  0x18   :  { %v4213_v35 = vld [vmem:[#allocation2 + $0x80] sm:$0xf]  ;;  %v6093_v36 = vld [vmem:[#allocation2 + $0x8c] sm:$0xf0]  ;;  %v4614_v38 = vor.u32 %v6193_v32, %v4613_v31  ;;  %1453 = vmatpush.bf16.msra.mxu1 %v4358_v33 }
  0x19   :  { %v4341_v37 = vld [vmem:[#allocation2 + $0x180] sm:$0xf]  ;;  %v6125_v39 = vld [vmem:[#allocation2 + $0x18c] sm:$0xf0]  ;;  %v4214_v44 = vor.u32 %v6093_v36, %v4213_v35  ;;  %1466 = vmatpush.bf16.msra.mxu2 %v4486_v34 }
  0x1a   :  { %v4469_v40 = vld [vmem:[#allocation2 + $0x280] sm:$0xf]  ;;  %v6157_v41 = vld [vmem:[#allocation2 + $0x28c] sm:$0xf0]  ;;  %v4342_v45 = vor.u32 %v6125_v39, %v4341_v37  ;;  %1479 = vmatpush.bf16.msra.mxu3 %v4614_v38  ;;  %v6103_v37 = vld [vmem:[#allocation2 + $0xe4] sm:$0xf] }
  0x1b   :  { %v4597_v42 = vld [vmem:[#allocation2 + $0x380] sm:$0xf]  ;;  %v6189_v43 = vld [vmem:[#allocation2 + $0x38c] sm:$0xf0]  ;;  %v4470_v46 = vor.u32 %v6157_v41, %v4469_v40  ;;  %1441 = vmatpush.bf16.msra.mxu0 %v4214_v44  ;;  %v4263_v38 = vld [vmem:[#allocation2 + $0xf0] sm:$0xf0] }
  0x1c   :  { %v4197_v47 = vld [vmem:[#allocation2 + $0x60] sm:$0xf]  ;;  %v6089_v48 = vld [vmem:[#allocation2 + $0x6c] sm:$0xf0]  ;;  %v4598_v50 = vor.u32 %v6189_v43, %v4597_v42  ;;  %1454 = vmatpush.bf16.msra.mxu1 %v4342_v45 }
  0x1d   :  { %v4325_v49 = vld [vmem:[#allocation2 + $0x160] sm:$0xf]  ;;  %v6121_v51 = vld [vmem:[#allocation2 + $0x16c] sm:$0xf0]  ;;  %v4198_v56 = vor.u32 %v6089_v48, %v4197_v47  ;;  %1467 = vmatpush.bf16.msra.mxu2 %v4470_v46  ;;  %v4266_v46 = vor.u32 %v6103_v37, %v4263_v38 }
  0x1e   :  { %v4453_v52 = vld [vmem:[#allocation2 + $0x260] sm:$0xf]  ;;  %v6153_v53 = vld [vmem:[#allocation2 + $0x26c] sm:$0xf0]  ;;  %v4326_v57 = vor.u32 %v6121_v51, %v4325_v49  ;;  %1480 = vmatpush.bf16.msra.mxu3 %v4598_v50  ;;  %v6099_v50 = vld [vmem:[#allocation2 + $0xc4] sm:$0xf] }
  0x1f   :  { %v4581_v54 = vld [vmem:[#allocation2 + $0x360] sm:$0xf]  ;;  %v6185_v55 = vld [vmem:[#allocation2 + $0x36c] sm:$0xf0]  ;;  %v4454_v58 = vor.u32 %v6153_v53, %v4453_v52  ;;  %1442 = vmatpush.bf16.msra.mxu0 %v4198_v56  ;;  %v4247_v51 = vld [vmem:[#allocation2 + $0xd0] sm:$0xf0] }
  0x20   :  { %v4181_v59 = vld [vmem:[#allocation2 + $0x40] sm:$0xf]  ;;  %v6085_v60 = vld [vmem:[#allocation2 + $0x4c] sm:$0xf0]  ;;  %v4582_v62 = vor.u32 %v6185_v55, %v4581_v54  ;;  %1455 = vmatpush.bf16.msra.mxu1 %v4326_v57 }
  0x21   :  { %v4309_v61 = vld [vmem:[#allocation2 + $0x140] sm:$0xf]  ;;  %v6117_v63 = vld [vmem:[#allocation2 + $0x14c] sm:$0xf0]  ;;  %v4182_v4 = vor.u32 %v6085_v60, %v4181_v59  ;;  %1468 = vmatpush.bf16.msra.mxu2 %v4454_v58  ;;  %v4250_v59 = vor.u32 %v6099_v50, %v4247_v51 }
  0x22   :  { %v4437_v0 = vld [vmem:[#allocation2 + $0x240] sm:$0xf]  ;;  %v6149_v1 = vld [vmem:[#allocation2 + $0x24c] sm:$0xf0]  ;;  %v4310_v5 = vor.u32 %v6117_v63, %v4309_v61  ;;  %1481 = vmatpush.bf16.msra.mxu3 %v4582_v62  ;;  %v6095_v62 = vld [vmem:[#allocation2 + $0xa4] sm:$0xf] }
  0x23   :  { %v4565_v2 = vld [vmem:[#allocation2 + $0x340] sm:$0xf]  ;;  %v6181_v3 = vld [vmem:[#allocation2 + $0x34c] sm:$0xf0]  ;;  %v4438_v6 = vor.u32 %v6149_v1, %v4437_v0  ;;  %1443 = vmatpush.bf16.msra.mxu0 %v4182_v4  ;;  %v4231_v63 = vld [vmem:[#allocation2 + $0xb0] sm:$0xf0] }
  0x24   :  { %v4165_v7 = vld [vmem:[#allocation2 + $0x20] sm:$0xf]  ;;  %v6081_v8 = vld [vmem:[#allocation2 + $0x2c] sm:$0xf0]  ;;  %v4566_v10 = vor.u32 %v6181_v3, %v4565_v2  ;;  %1456 = vmatpush.bf16.msra.mxu1 %v4310_v5 }
  0x25   :  { %v4293_v9 = vld [vmem:[#allocation2 + $0x120] sm:$0xf]  ;;  %v6113_v11 = vld [vmem:[#allocation2 + $0x12c] sm:$0xf0]  ;;  %v4166_v16 = vor.u32 %v6081_v8, %v4165_v7  ;;  %1469 = vmatpush.bf16.msra.mxu2 %v4438_v6 }
  0x26   :  { %v4421_v12 = vld [vmem:[#allocation2 + $0x220] sm:$0xf]  ;;  %v6145_v13 = vld [vmem:[#allocation2 + $0x22c] sm:$0xf0]  ;;  %v4294_v19 = vor.u32 %v6113_v11, %v4293_v9  ;;  %1482 = vmatpush.bf16.msra.mxu3 %v4566_v10  ;;  %v73_v10 = vld [vmem:[%s7021_s0 + $0x18] sm:$0xff]  ;;  %v4234_v11 = vor.u32 %v6095_v62, %v4231_v63 }
  0x27   :  { %v4549_v14 = vld [vmem:[#allocation2 + $0x320] sm:$0xf]  ;;  %v6177_v15 = vld [vmem:[#allocation2 + $0x32c] sm:$0xf0]  ;;  %v4422_v20 = vor.u32 %v6145_v13, %v4421_v12  ;;  %1444 = vmatpush.bf16.msra.mxu0 %v4166_v16  ;;  %v6091_v16 = vld [vmem:[#allocation2 + $0x84] sm:$0xf] }
  0x28   :  { %v4149_v17 = vld [vmem:[#allocation2] sm:$0xf]  ;;  %v6077_v18 = vld [vmem:[#allocation2 + $0xc] sm:$0xf0]  ;;  %v4550_v24 = vor.u32 %v6177_v15, %v4549_v14  ;;  %1457 = vmatpush.bf16.msra.mxu1 %v4294_v19  ;;  %v6766_v15 = vpack.c.bf16 %v73_v10, %v73_v10  ;;  %v71_v19 = vld [vmem:[%s7021_s0 + $0x8] sm:$0xff] }
  0x29   :  { %v4277_v21 = vld [vmem:[#allocation2 + $0x100] sm:$0xf]  ;;  %v6109_v22 = vld [vmem:[#allocation2 + $0x10c] sm:$0xf0]  ;;  %v4150_v31 = vor.u32 %v6077_v18, %v4149_v17  ;;  %1470 = vmatpush.bf16.msra.mxu2 %v4422_v20  ;;  %v4215_v17 = vld [vmem:[#allocation2 + $0x90] sm:$0xf0] }
  0x2a   :  { %v4405_v23 = vld [vmem:[#allocation2 + $0x200] sm:$0xf]  ;;  %v6141_v25 = vld [vmem:[#allocation2 + $0x20c] sm:$0xf0]  ;;  %v4278_v35 = vor.u32 %v6109_v22, %v4277_v21  ;;  %1483 = vmatpush.bf16.msra.mxu3 %v4550_v24  ;;  %v4519_v10 = vld [vmem:[#allocation2 + $0x2f0] sm:$0xf0] }
  0x2b   :  { %v4533_v26 = vld [vmem:[#allocation2 + $0x300] sm:$0xf]  ;;  %v6173_v27 = vld [vmem:[#allocation2 + $0x30c] sm:$0xf0]  ;;  %v4406_v36 = vor.u32 %v6141_v25, %v4405_v23  ;;  %1445 = vmatpush.bf16.msra.mxu0 %v4150_v31  ;;  %v6774_v25 = vpack.c.bf16 %v71_v19, %v71_v19  ;;  %v4199_v31 = vld [vmem:[#allocation2 + $0x70] sm:$0xf0] }
  0x2c   :  { %v4773_v28 = vld [vmem:[#allocation2 + $0x4e0] sm:$0xf]  ;;  %v6233_v29 = vld [vmem:[#allocation2 + $0x4ec] sm:$0xf0]  ;;  %v4534_v39 = vor.u32 %v6173_v27, %v4533_v26  ;;  %1458 = vmatpush.bf16.msra.mxu1 %v4278_v35  ;;  %v4218_v26 = vor.u32 %v6091_v16, %v4215_v17  ;;  %v6231_v16 = vld [vmem:[#allocation2 + $0x4e4] sm:$0xf] }
  0x2d   :  { %v4901_v30 = vld [vmem:[#allocation2 + $0x5e0] sm:$0xf]  ;;  %v6265_v32 = vld [vmem:[#allocation2 + $0x5ec] sm:$0xf0]  ;;  %v4774_v40 = vor.u32 %v6233_v29, %v4773_v28  ;;  %1471 = vmatpush.bf16.msra.mxu2 %v4406_v36  ;;  %v4775_v17 = vld [vmem:[#allocation2 + $0x4f0] sm:$0xf0] }
  0x2e   :  { %v5029_v33 = vld [vmem:[#allocation2 + $0x6e0] sm:$0xf]  ;;  %v6297_v34 = vld [vmem:[#allocation2 + $0x6ec] sm:$0xf0]  ;;  %v4902_v41 = vor.u32 %v6265_v32, %v4901_v30  ;;  %1484 = vmatpush.bf16.msra.mxu3 %v4534_v39  ;;  %v6087_v30 = vld [vmem:[#allocation2 + $0x64] sm:$0xf] }
  0x2f   :  { %v5030_v42 = vor.u32 %v6297_v34, %v5029_v33  ;;  %v4757_v43 = vld [vmem:[#allocation2 + $0x4c0] sm:$0xf]  ;;  %v6229_v44 = vld [vmem:[#allocation2 + $0x4cc] sm:$0xf0]  ;;  %1490 = vmatpush.bf16.msrb.mxu0 %v4774_v40  ;;  %1459 = vmatmul.bf16.vlgmr.msra.gmra.mxu1 %v6774_v25  ;;  %v4202_v38 = vor.u32 %v6087_v30, %v4199_v31  ;;  %v4503_v30 = vld [vmem:[#allocation2 + $0x2d0] sm:$0xf0] }
  0x30   :  { %v4885_v45 = vld [vmem:[#allocation2 + $0x5c0] sm:$0xf]  ;;  %v6261_v47 = vld [vmem:[#allocation2 + $0x5cc] sm:$0xf0]  ;;  %v4758_v52 = vor.u32 %v6229_v44, %v4757_v43  ;;  %1503 = vmatpush.bf16.msrb.mxu1 %v4902_v41  ;;  %v4183_v43 = vld [vmem:[#allocation2 + $0x50] sm:$0xf0] }
  0x31   :  { %v5013_v48 = vld [vmem:[#allocation2 + $0x6c0] sm:$0xf]  ;;  %v6293_v49 = vld [vmem:[#allocation2 + $0x6cc] sm:$0xf0]  ;;  %1516 = vmatpush.bf16.msrb.mxu2 %v5030_v42  ;;  %v4886_v54 = vor.u32 %v6261_v47, %v4885_v45  ;;  %1485 = vmatmul.bf16.vlgmr.msra.gmra.mxu3 %v6766_v15  ;;  %v6083_v42 = vld [vmem:[#allocation2 + $0x44] sm:$0xf] }
  0x32   :  { %v4741_v53 = vld [vmem:[#allocation2 + $0x4a0] sm:$0xf]  ;;  %v5014_v55 = vor.u32 %v6293_v49, %v5013_v48  ;;  %v6225_v56 = vld [vmem:[#allocation2 + $0x4ac] sm:$0xf0]  ;;  %1529 = vmatpush.bf16.msrb.mxu3 %v4266_v46  ;;  %v4186_v50 = vor.u32 %v6083_v42, %v4183_v43  ;;  %v6195_v31 = vld [vmem:[#allocation2 + $0x3c4] sm:$0xf] }
  0x33   :  { %v4869_v57 = vld [vmem:[#allocation2 + $0x5a0] sm:$0xf]  ;;  %v6257_v58 = vld [vmem:[#allocation2 + $0x5ac] sm:$0xf0]  ;;  %1491 = vmatpush.bf16.msrb.mxu0 %v4758_v52  ;;  %v4742_v0 = vor.u32 %v6225_v56, %v4741_v53  ;;  %v4359_v42 = vld [vmem:[#allocation2 + $0x1b0] sm:$0xf0] }
  0x34   :  { %v4997_v60 = vld [vmem:[#allocation2 + $0x6a0] sm:$0xf]  ;;  %v6289_v61 = vld [vmem:[#allocation2 + $0x6ac] sm:$0xf0]  ;;  %v4870_v1 = vor.u32 %v6257_v58, %v4869_v57  ;;  %1504 = vmatpush.bf16.msrb.mxu1 %v4886_v54  ;;  %v6079_v54 = vld [vmem:[#allocation2 + $0x24] sm:$0xf] }
  0x35   :  { %v4725_v2 = vld [vmem:[#allocation2 + $0x480] sm:$0xf]  ;;  %v72_v3 = vld [vmem:[%s7021_s0 + $0x10] sm:$0xff]  ;;  %1517 = vmatpush.bf16.msrb.mxu2 %v5014_v55  ;;  %v4998_v5 = vor.u32 %v6289_v61, %v4997_v60  ;;  %v6159_v43 = vld [vmem:[#allocation2 + $0x2a4] sm:$0xf] }
  0x36   :  { %v70_v4 = vld [vmem:[%s7021_s0] sm:$0xff]  ;;  %v6221_v6 = vld [vmem:[#allocation2 + $0x48c] sm:$0xf0]  ;;  %v6759_v8 = vpack.c.bf16 %v72_v3, %v72_v3  ;;  %1530 = vmatpush.bf16.msrb.mxu3 %v4250_v59  ;;  %v4167_v55 = vld [vmem:[#allocation2 + $0x30] sm:$0xf0] }
  0x37   :  { %v4853_v7 = vld [vmem:[#allocation2 + $0x580] sm:$0xf]  ;;  %v6761_v9 = vpack.c.bf16 %v70_v4, %v70_v4  ;;  %v6253_v12 = vld [vmem:[#allocation2 + $0x58c] sm:$0xf0]  ;;  %1492 = vmatpush.bf16.msrb.mxu0 %v4742_v0  ;;  %v4726_v18 = vor.u32 %v6221_v6, %v4725_v2  ;;  %v4170_v0 = vor.u32 %v6079_v54, %v4167_v55  ;;  %v6075_v2 = vld [vmem:[#allocation2 + $0x4] sm:$0xf] }
  0x38   :  { %v4981_v13 = vld [vmem:[#allocation2 + $0x680] sm:$0xf]  ;;  %v6285_v14 = vld [vmem:[#allocation2 + $0x68c] sm:$0xf0]  ;;  %1472 = vmatmul.bf16.vlgmr.msra.gmra.mxu2 %v6759_v8  ;;  %1505 = vmatpush.bf16.msrb.mxu1 %v4870_v1  ;;  %v4854_v20 = vor.u32 %v6253_v12, %v4853_v7  ;;  %v4151_v3 = vld [vmem:[#allocation2 + $0x10] sm:$0xf0] }
  0x39   :  { %1446 = vmatmul.bf16.vlgmr.msra.gmra.mxu0 %v6761_v9  ;;  %1518 = vmatpush.bf16.msrb.mxu2 %v4998_v5  ;;  %v4982_v21 = vor.u32 %v6285_v14, %v4981_v13  ;;  %v4709_v22 = vld [vmem:[#allocation2 + $0x460] sm:$0xf]  ;;  %v6217_v23 = vld [vmem:[#allocation2 + $0x46c] sm:$0xf0]  ;;  %v6135_v4 = vld [vmem:[#allocation2 + $0x1e4] sm:$0xf]  ;;  %v4154_v19 = vor.u32 %v6075_v2, %v4151_v3 }
  0x3a   :  { %v4837_v24 = vld [vmem:[#allocation2 + $0x560] sm:$0xf]  ;;  %1531 = vmatpush.bf16.msrb.mxu3 %v4234_v11  ;;  %v6249_v27 = vld [vmem:[#allocation2 + $0x56c] sm:$0xf0]  ;;  %v4710_v32 = vor.u32 %v6217_v23, %v4709_v22  ;;  %v4391_v5 = vld [vmem:[#allocation2 + $0x1f0] sm:$0xf0] }
  0x3b   :  { %v4965_v28 = vld [vmem:[#allocation2 + $0x660] sm:$0xf]  ;;  %v6281_v29 = vld [vmem:[#allocation2 + $0x66c] sm:$0xf0]  ;;  %1493 = vmatpush.bf16.msrb.mxu0 %v4726_v18  ;;  %v4838_v33 = vor.u32 %v6249_v27, %v4837_v24  ;;  %v6167_v6 = vld [vmem:[#allocation2 + $0x2e4] sm:$0xf] }
  0x3c   :  { %1506 = vmatpush.bf16.msrb.mxu1 %v4854_v20  ;;  %v4966_v34 = vor.u32 %v6281_v29, %v4965_v28  ;;  %v4693_v35 = vld [vmem:[#allocation2 + $0x440] sm:$0xf]  ;;  %v6213_v36 = vld [vmem:[#allocation2 + $0x44c] sm:$0xf0]  ;;  %v6199_v11 = vld [vmem:[#allocation2 + $0x3e4] sm:$0xf]  ;;  %v4394_v20 = vor.u32 %v6135_v4, %v4391_v5  ;;  %v4522_v23 = vor.u32 %v6167_v6, %v4519_v10  ;;  %v4778_v29 = vor.u32 %v6231_v16, %v4775_v17 }
  0x3d   :  { %1519 = vmatpush.bf16.msrb.mxu2 %v4982_v21  ;;  %v4821_v37 = vld [vmem:[#allocation2 + $0x540] sm:$0xf]  ;;  %v6245_v39 = vld [vmem:[#allocation2 + $0x54c] sm:$0xf0]  ;;  %v4694_v44 = vor.u32 %v6213_v36, %v4693_v35  ;;  %v4647_v12 = vld [vmem:[#allocation2 + $0x3f0] sm:$0xf0] }
  0x3e   :  { %1532 = vmatpush.bf16.msrb.mxu3 %v4218_v26  ;;  %v4949_v40 = vld [vmem:[#allocation2 + $0x640] sm:$0xf]  ;;  %v6277_v41 = vld [vmem:[#allocation2 + $0x64c] sm:$0xf0]  ;;  %v4822_v45 = vor.u32 %v6245_v39, %v4821_v37  ;;  %v75_v22 = vld [vmem:[%s7021_s0 + $0x28] sm:$0xff]  ;;  %v4650_v24 = vor.u32 %v6199_v11, %v4647_v12 }
  0x3f   :  { %1494 = vmatpush.bf16.msrb.mxu0 %v4710_v32  ;;  %v4950_v46 = vor.u32 %v6277_v41, %v4949_v40  ;;  %v4677_v47 = vld [vmem:[#allocation2 + $0x420] sm:$0xf]  ;;  %v6209_v48 = vld [vmem:[#allocation2 + $0x42c] sm:$0xf0]  ;;  %v6131_v26 = vld [vmem:[#allocation2 + $0x1c4] sm:$0xf]  ;;  %v6790_v37 = vpack.c.bf16 %v75_v22, %v75_v22 }
  0x40   :  { %1507 = vmatpush.bf16.msrb.mxu1 %v4838_v33  ;;  %v4805_v49 = vld [vmem:[#allocation2 + $0x520] sm:$0xf]  ;;  %v6241_v51 = vld [vmem:[#allocation2 + $0x52c] sm:$0xf0]  ;;  %v4678_v56 = vor.u32 %v6209_v48, %v4677_v47  ;;  %v4375_v27 = vld [vmem:[#allocation2 + $0x1d0] sm:$0xf0] }
  0x41   :  { %1520 = vmatpush.bf16.msrb.mxu2 %v4966_v34  ;;  %v4933_v52 = vld [vmem:[#allocation2 + $0x620] sm:$0xf]  ;;  %v6273_v53 = vld [vmem:[#allocation2 + $0x62c] sm:$0xf0]  ;;  %v4806_v59 = vor.u32 %v6241_v51, %v4805_v49  ;;  %v6163_v28 = vld [vmem:[#allocation2 + $0x2c4] sm:$0xf] }
  0x42   :  { %1533 = vmatpush.bf16.msrb.mxu3 %v4202_v38  ;;  %v4661_v57 = vld [vmem:[#allocation2 + $0x400] sm:$0xf]  ;;  %v6205_v58 = vld [vmem:[#allocation2 + $0x40c] sm:$0xf0]  ;;  %v4934_v60 = vor.u32 %v6273_v53, %v4933_v52  ;;  %v4631_v32 = vld [vmem:[#allocation2 + $0x3d0] sm:$0xf0]  ;;  %v4378_v38 = vor.u32 %v6131_v26, %v4375_v27  ;;  %v4506_v39 = vor.u32 %v6163_v28, %v4503_v30 }
  0x43   :  { %1495 = vmatpush.bf16.msrb.mxu0 %v4694_v44  ;;  %v4789_v61 = vld [vmem:[#allocation2 + $0x500] sm:$0xf]  ;;  %v6237_v62 = vld [vmem:[#allocation2 + $0x50c] sm:$0xf0]  ;;  %v4662_v7 = vor.u32 %v6205_v58, %v4661_v57  ;;  %v6227_v34 = vld [vmem:[#allocation2 + $0x4c4] sm:$0xf]  ;;  %v4634_v40 = vor.u32 %v6195_v31, %v4631_v32 }
  0x44   :  { %1508 = vmatpush.bf16.msrb.mxu1 %v4822_v45  ;;  %v4917_v63 = vld [vmem:[#allocation2 + $0x600] sm:$0xf]  ;;  %v6269_v1 = vld [vmem:[#allocation2 + $0x60c] sm:$0xf0]  ;;  %v4790_v13 = vor.u32 %v6237_v62, %v4789_v61  ;;  %v4759_v35 = vld [vmem:[#allocation2 + $0x4d0] sm:$0xf0] }
  0x45   :  { %1521 = vmatpush.bf16.msrb.mxu2 %v4950_v46  ;;  %v4918_v14 = vor.u32 %v6269_v1, %v4917_v63  ;;  %v76_v18 = vld [vmem:[%s7021_s0 + $0x30] sm:$0xff]  ;;  %v74_v21 = vld [vmem:[%s7021_s0 + $0x20] sm:$0xff]  ;;  %v4762_v44 = vor.u32 %v6227_v34, %v4759_v35 }
  0x46   :  { %1534 = vmatpush.bf16.msrb.mxu3 %v4186_v50  ;;  %v6786_v33 = vpack.c.bf16 %v76_v18, %v76_v18  ;;  %v6788_v36 = vpack.c.bf16 %v74_v21, %v74_v21  ;;  %v6127_v41 = vld [vmem:[#allocation2 + $0x1a4] sm:$0xf]  ;;  %v4487_v45 = vld [vmem:[#allocation2 + $0x2b0] sm:$0xf0] }
  0x47   :  { %1496 = vmatpush.bf16.msrb.mxu0 %v4678_v56  ;;  %v6191_v46 = vld [vmem:[#allocation2 + $0x3a4] sm:$0xf]  ;;  %v4615_v47 = vld [vmem:[#allocation2 + $0x3b0] sm:$0xf0]  ;;  %v4362_v50 = vor.u32 %v6127_v41, %v4359_v42  ;;  %v4490_v51 = vor.u32 %v6159_v43, %v4487_v45 }
  0x48   :  { %1509 = vmatpush.bf16.msrb.mxu1 %v4806_v59  ;;  %v6223_v48 = vld [vmem:[#allocation2 + $0x4a4] sm:$0xf]  ;;  %v4743_v49 = vld [vmem:[#allocation2 + $0x4b0] sm:$0xf0]  ;;  %v4618_v52 = vor.u32 %v6191_v46, %v4615_v47 }
  0x49   :  { %1522 = vmatpush.bf16.msrb.mxu2 %v4934_v60  ;;  %v6123_v53 = vld [vmem:[#allocation2 + $0x184] sm:$0xf]  ;;  %v4343_v54 = vld [vmem:[#allocation2 + $0x190] sm:$0xf0]  ;;  %v4746_v56 = vor.u32 %v6223_v48, %v4743_v49 }
  0x4a   :  { %1535 = vmatpush.bf16.msrb.mxu3 %v4170_v0  ;;  %v6155_v55 = vld [vmem:[#allocation2 + $0x284] sm:$0xf]  ;;  %v4471_v57 = vld [vmem:[#allocation2 + $0x290] sm:$0xf0]  ;;  %v4346_v62 = vor.u32 %v6123_v53, %v4343_v54 }
  0x4b   :  { %1497 = vmatpush.bf16.msrb.mxu0 %v4662_v7  ;;  %v6187_v58 = vld [vmem:[#allocation2 + $0x384] sm:$0xf]  ;;  %v4599_v59 = vld [vmem:[#allocation2 + $0x390] sm:$0xf0]  ;;  %v4474_v63 = vor.u32 %v6155_v55, %v4471_v57 }
  0x4c   :  { %1510 = vmatpush.bf16.msrb.mxu1 %v4790_v13  ;;  %v6219_v60 = vld [vmem:[#allocation2 + $0x484] sm:$0xf]  ;;  %v4727_v61 = vld [vmem:[#allocation2 + $0x490] sm:$0xf0]  ;;  %v4602_v0 = vor.u32 %v6187_v58, %v4599_v59  ;;  %v4269_v58 = vld [vmem:[#allocation2 + $0xe8] sm:$0xf] }
  0x4d   :  { %1523 = vmatpush.bf16.msrb.mxu2 %v4918_v14  ;;  %v6119_v1 = vld [vmem:[#allocation2 + $0x164] sm:$0xf]  ;;  %v4327_v2 = vld [vmem:[#allocation2 + $0x170] sm:$0xf0]  ;;  %v4730_v4 = vor.u32 %v6219_v60, %v4727_v61  ;;  %v6106_v59 = vld [vmem:[#allocation2 + $0xf4] sm:$0xf0] }
  0x4e   :  { %1536 = vmatpush.bf16.msrb.mxu3 %v4154_v19  ;;  %1498 = vmatmul.bf16.vlgmr.msrb.gmra.mxu0 %v6788_v36  ;;  %v6151_v3 = vld [vmem:[#allocation2 + $0x264] sm:$0xf]  ;;  %v4455_v5 = vld [vmem:[#allocation2 + $0x270] sm:$0xf0]  ;;  %v4330_v12 = vor.u32 %v6119_v1, %v4327_v2 }
  0x4f   :  { %1542 = vmatpush.bf16.msra.mxu0 %v4394_v20  ;;  %1511 = vmatmul.bf16.vlgmr.msrb.gmra.mxu1 %v6790_v37  ;;  %v6183_v6 = vld [vmem:[#allocation2 + $0x364] sm:$0xf]  ;;  %v4583_v7 = vld [vmem:[#allocation2 + $0x370] sm:$0xf0]  ;;  %v4458_v13 = vor.u32 %v6151_v3, %v4455_v5  ;;  %v4270_v3 = vor.u32 %v6106_v59, %v4269_v58 }
  0x50   :  { %1555 = vmatpush.bf16.msra.mxu1 %v4522_v23  ;;  %1524 = vmatmul.bf16.vlgmr.msrb.gmra.mxu2 %v6786_v33  ;;  %v6215_v10 = vld [vmem:[#allocation2 + $0x464] sm:$0xf]  ;;  %v4711_v11 = vld [vmem:[#allocation2 + $0x470] sm:$0xf0]  ;;  %v4586_v14 = vor.u32 %v6183_v6, %v4583_v7 }
  0x51   :  { %1568 = vmatpush.bf16.msra.mxu2 %v4650_v24  ;;  %1537 = vmatmul.bf16.vlgmr.msrb.gmra.mxu3 %v6761_v9  ;;  %v6115_v16 = vld [vmem:[#allocation2 + $0x144] sm:$0xf]  ;;  %v4311_v17 = vld [vmem:[#allocation2 + $0x150] sm:$0xf0]  ;;  %v4714_v19 = vor.u32 %v6215_v10, %v4711_v11  ;;  %v4253_v11 = vld [vmem:[#allocation2 + $0xc8] sm:$0xf] }
  0x52   :  { %1581 = vmatpush.bf16.msra.mxu3 %v4778_v29  ;;  %v6147_v18 = vld [vmem:[#allocation2 + $0x244] sm:$0xf]  ;;  %v4439_v20 = vld [vmem:[#allocation2 + $0x250] sm:$0xf0]  ;;  %v4314_v26 = vor.u32 %v6115_v16, %v4311_v17 }
  0x53   :  { %1543 = vmatpush.bf16.msra.mxu0 %v4378_v38  ;;  %v6179_v21 = vld [vmem:[#allocation2 + $0x344] sm:$0xf]  ;;  %v4567_v22 = vld [vmem:[#allocation2 + $0x350] sm:$0xf0]  ;;  %v4442_v27 = vor.u32 %v6147_v18, %v4439_v20 }
  0x54   :  { %1556 = vmatpush.bf16.msra.mxu1 %v4506_v39  ;;  %v6211_v23 = vld [vmem:[#allocation2 + $0x444] sm:$0xf]  ;;  %v4695_v24 = vld [vmem:[#allocation2 + $0x450] sm:$0xf0]  ;;  %v4570_v28 = vor.u32 %v6179_v21, %v4567_v22 }
  0x55   :  { %1569 = vmatpush.bf16.msra.mxu2 %v4634_v40  ;;  %v6111_v29 = vld [vmem:[#allocation2 + $0x124] sm:$0xf]  ;;  %v4295_v30 = vld [vmem:[#allocation2 + $0x130] sm:$0xf0]  ;;  %v4698_v32 = vor.u32 %v6211_v23, %v4695_v24  ;;  %v4237_v24 = vld [vmem:[#allocation2 + $0xa8] sm:$0xf] }
  0x56   :  { %1582 = vmatpush.bf16.msra.mxu3 %v4762_v44  ;;  %v6143_v31 = vld [vmem:[#allocation2 + $0x224] sm:$0xf]  ;;  %v4423_v34 = vld [vmem:[#allocation2 + $0x230] sm:$0xf0]  ;;  %v4298_v41 = vor.u32 %v6111_v29, %v4295_v30 }
  0x57   :  { %1544 = vmatpush.bf16.msra.mxu0 %v4362_v50  ;;  %v6175_v35 = vld [vmem:[#allocation2 + $0x324] sm:$0xf]  ;;  %v4551_v38 = vld [vmem:[#allocation2 + $0x330] sm:$0xf0]  ;;  %v4426_v44 = vor.u32 %v6143_v31, %v4423_v34 }
  0x58   :  { %1557 = vmatpush.bf16.msra.mxu1 %v4490_v51  ;;  %v6207_v39 = vld [vmem:[#allocation2 + $0x424] sm:$0xf]  ;;  %v4679_v40 = vld [vmem:[#allocation2 + $0x430] sm:$0xf0]  ;;  %v4554_v45 = vor.u32 %v6175_v35, %v4551_v38 }
  0x59   :  { %1570 = vmatpush.bf16.msra.mxu2 %v4618_v52  ;;  %v6107_v42 = vld [vmem:[#allocation2 + $0x104] sm:$0xf]  ;;  %v4279_v43 = vld [vmem:[#allocation2 + $0x110] sm:$0xf0]  ;;  %v4682_v49 = vor.u32 %v6207_v39, %v4679_v40  ;;  %v4221_v40 = vld [vmem:[#allocation2 + $0x88] sm:$0xf] }
  0x5a   :  { %1583 = vmatpush.bf16.msra.mxu3 %v4746_v56  ;;  %v6139_v46 = vld [vmem:[#allocation2 + $0x204] sm:$0xf]  ;;  %v4407_v47 = vld [vmem:[#allocation2 + $0x210] sm:$0xf0]  ;;  %v4282_v56 = vor.u32 %v6107_v42, %v4279_v43  ;;  %v4349_v42 = vld [vmem:[#allocation2 + $0x188] sm:$0xf] }
  0x5b   :  { %1545 = vmatpush.bf16.msra.mxu0 %v4346_v62  ;;  %v6171_v48 = vld [vmem:[#allocation2 + $0x304] sm:$0xf]  ;;  %v4535_v50 = vld [vmem:[#allocation2 + $0x310] sm:$0xf0]  ;;  %v4410_v60 = vor.u32 %v6139_v46, %v4407_v47  ;;  %v4397_v62 = vld [vmem:[#allocation2 + $0x1e8] sm:$0xf] }
  0x5c   :  { %1558 = vmatpush.bf16.msra.mxu1 %v4474_v63  ;;  %v6203_v51 = vld [vmem:[#allocation2 + $0x404] sm:$0xf]  ;;  %v4663_v52 = vld [vmem:[#allocation2 + $0x410] sm:$0xf0]  ;;  %v4538_v61 = vor.u32 %v6171_v48, %v4535_v50  ;;  %v6138_v63 = vld [vmem:[#allocation2 + $0x1f4] sm:$0xf0] }
  0x5d   :  { %1571 = vmatpush.bf16.msra.mxu2 %v4602_v0  ;;  %v6263_v53 = vld [vmem:[#allocation2 + $0x5e4] sm:$0xf]  ;;  %v4903_v54 = vld [vmem:[#allocation2 + $0x5f0] sm:$0xf0]  ;;  %v4666_v0 = vor.u32 %v6203_v51, %v4663_v52  ;;  %v4398_v7 = vor.u32 %v6138_v63, %v4397_v62  ;;  %v6126_v43 = vld [vmem:[#allocation2 + $0x194] sm:$0xf0] }
  0x5e   :  { %1584 = vmatpush.bf16.msra.mxu3 %v4730_v4  ;;  %v6295_v55 = vld [vmem:[#allocation2 + $0x6e4] sm:$0xf]  ;;  %v5031_v57 = vld [vmem:[#allocation2 + $0x6f0] sm:$0xf0]  ;;  %v4906_v1 = vor.u32 %v6263_v53, %v4903_v54  ;;  %v4350_v50 = vor.u32 %v6126_v43, %v4349_v42  ;;  %v4205_v52 = vld [vmem:[#allocation2 + $0x68] sm:$0xf] }
  0x5f   :  { %1546 = vmatpush.bf16.msra.mxu0 %v4330_v12  ;;  %v5034_v2 = vor.u32 %v6295_v55, %v5031_v57  ;;  %v6259_v4 = vld [vmem:[#allocation2 + $0x5c4] sm:$0xf]  ;;  %v4887_v5 = vld [vmem:[#allocation2 + $0x5d0] sm:$0xf0]  ;;  %v6102_v12 = vld [vmem:[#allocation2 + $0xd4] sm:$0xf0] }
  0x60   :  { %1559 = vmatpush.bf16.msra.mxu1 %v4458_v13  ;;  %v6291_v6 = vld [vmem:[#allocation2 + $0x6c4] sm:$0xf]  ;;  %v5015_v10 = vld [vmem:[#allocation2 + $0x6d0] sm:$0xf0]  ;;  %v4381_v13 = vld [vmem:[#allocation2 + $0x1c8] sm:$0xf]  ;;  %v4890_v16 = vor.u32 %v6259_v4, %v4887_v5  ;;  %v4254_v18 = vor.u32 %v6102_v12, %v4253_v11 }
  0x61   :  { %1572 = vmatpush.bf16.msra.mxu2 %v4586_v14  ;;  %v6134_v14 = vld [vmem:[#allocation2 + $0x1d4] sm:$0xf0]  ;;  %v5018_v17 = vor.u32 %v6291_v6, %v5015_v10  ;;  %v4871_v20 = vld [vmem:[#allocation2 + $0x5b0] sm:$0xf0]  ;;  %v6287_v21 = vld [vmem:[#allocation2 + $0x6a4] sm:$0xf] }
  0x62   :  { %1585 = vmatpush.bf16.msra.mxu3 %v4714_v19  ;;  %v6255_v19 = vld [vmem:[#allocation2 + $0x5a4] sm:$0xf]  ;;  %v4382_v22 = vor.u32 %v6134_v14, %v4381_v13  ;;  %v4999_v23 = vld [vmem:[#allocation2 + $0x6b0] sm:$0xf0]  ;;  %v6090_v53 = vld [vmem:[#allocation2 + $0x74] sm:$0xf0] }
  0x63   :  { %1547 = vmatpush.bf16.msra.mxu0 %v4314_v26  ;;  %v6098_v26 = vld [vmem:[#allocation2 + $0xb4] sm:$0xf0]  ;;  %v4874_v29 = vor.u32 %v6255_v19, %v4871_v20  ;;  %v5002_v30 = vor.u32 %v6287_v21, %v4999_v23  ;;  %v4855_v34 = vld [vmem:[#allocation2 + $0x590] sm:$0xf0]  ;;  %v6283_v35 = vld [vmem:[#allocation2 + $0x684] sm:$0xf]  ;;  %v4206_v58 = vor.u32 %v6090_v53, %v4205_v52 }
  0x64   :  { %1560 = vmatpush.bf16.msra.mxu1 %v4442_v27  ;;  %v4365_v27 = vld [vmem:[#allocation2 + $0x1a8] sm:$0xf]  ;;  %v4238_v31 = vor.u32 %v6098_v26, %v4237_v24  ;;  %v4983_v39 = vld [vmem:[#allocation2 + $0x690] sm:$0xf0]  ;;  %v6247_v47 = vld [vmem:[#allocation2 + $0x564] sm:$0xf] }
  0x65   :  { %1573 = vmatpush.bf16.msra.mxu2 %v4570_v28  ;;  %v6130_v28 = vld [vmem:[#allocation2 + $0x1b4] sm:$0xf0]  ;;  %v4839_v48 = vld [vmem:[#allocation2 + $0x570] sm:$0xf0]  ;;  %v4333_v54 = vld [vmem:[#allocation2 + $0x168] sm:$0xf] }
  0x66   :  { %1586 = vmatpush.bf16.msra.mxu3 %v4698_v32  ;;  %v6251_v32 = vld [vmem:[#allocation2 + $0x584] sm:$0xf]  ;;  %v4366_v38 = vor.u32 %v6130_v28, %v4365_v27  ;;  %v4967_v51 = vld [vmem:[#allocation2 + $0x670] sm:$0xf0]  ;;  %v6122_v55 = vld [vmem:[#allocation2 + $0x174] sm:$0xf0] }
  0x67   :  { %1548 = vmatpush.bf16.msra.mxu0 %v4298_v41  ;;  %v6094_v41 = vld [vmem:[#allocation2 + $0x94] sm:$0xf0]  ;;  %v6243_v59 = vld [vmem:[#allocation2 + $0x544] sm:$0xf]  ;;  %v4334_v62 = vor.u32 %v6122_v55, %v4333_v54  ;;  %v4951_v63 = vld [vmem:[#allocation2 + $0x650] sm:$0xf0] }
  0x68   :  { %1561 = vmatpush.bf16.msra.mxu1 %v4426_v44  ;;  %v4858_v44 = vor.u32 %v6251_v32, %v4855_v34  ;;  %v4222_v46 = vor.u32 %v6094_v41, %v4221_v40  ;;  %v4807_v10 = vld [vmem:[#allocation2 + $0x530] sm:$0xf0]  ;;  %v6271_v11 = vld [vmem:[#allocation2 + $0x624] sm:$0xf]  ;;  %v4173_v14 = vld [vmem:[#allocation2 + $0x28] sm:$0xf] }
  0x69   :  { %1574 = vmatpush.bf16.msra.mxu2 %v4554_v45  ;;  %v4986_v45 = vor.u32 %v6283_v35, %v4983_v39  ;;  %v4935_v13 = vld [vmem:[#allocation2 + $0x630] sm:$0xf0]  ;;  %v6235_v20 = vld [vmem:[#allocation2 + $0x504] sm:$0xf]  ;;  %v4157_v27 = vld [vmem:[#allocation2 + $0x8] sm:$0xf] }
  0x6a   :  { %1587 = vmatpush.bf16.msra.mxu3 %v4682_v49  ;;  %v6279_v49 = vld [vmem:[#allocation2 + $0x664] sm:$0xf]  ;;  %v4791_v21 = vld [vmem:[#allocation2 + $0x510] sm:$0xf0]  ;;  %v4525_v32 = vld [vmem:[#allocation2 + $0x2e8] sm:$0xf] }
  0x6b   :  { %1549 = vmatpush.bf16.msra.mxu0 %v4282_v56  ;;  %v4842_v56 = vor.u32 %v6247_v47, %v4839_v48  ;;  %v4970_v57 = vor.u32 %v6279_v49, %v4967_v51  ;;  %v6267_v24 = vld [vmem:[#allocation2 + $0x604] sm:$0xf]  ;;  %v4919_v26 = vld [vmem:[#allocation2 + $0x610] sm:$0xf0]  ;;  %v6170_v34 = vld [vmem:[#allocation2 + $0x2f4] sm:$0xf0] }
  0x6c   :  { %1562 = vmatpush.bf16.msra.mxu1 %v4410_v60  ;;  %v4823_v60 = vld [vmem:[#allocation2 + $0x550] sm:$0xf0]  ;;  %v4653_v35 = vld [vmem:[#allocation2 + $0x3e8] sm:$0xf]  ;;  %v6202_v39 = vld [vmem:[#allocation2 + $0x3f4] sm:$0xf0]  ;;  %v4922_v42 = vor.u32 %v6267_v24, %v4919_v26  ;;  %v4526_v47 = vor.u32 %v6170_v34, %v4525_v32 }
  0x6d   :  { %1575 = vmatpush.bf16.msra.mxu2 %v4538_v61  ;;  %v6275_v61 = vld [vmem:[#allocation2 + $0x644] sm:$0xf]  ;;  %v4826_v4 = vor.u32 %v6243_v59, %v4823_v60  ;;  %v4781_v40 = vld [vmem:[#allocation2 + $0x4e8] sm:$0xf]  ;;  %v6234_v41 = vld [vmem:[#allocation2 + $0x4f4] sm:$0xf0]  ;;  %v4654_v48 = vor.u32 %v6202_v39, %v4653_v35 }
  0x6e   :  { %1588 = vmatpush.bf16.msra.mxu3 %v4666_v0  ;;  %1550 = vmatmul.bf16.vlgmr.msra.gmra.mxu0 %v6774_v25  ;;  %v4189_v0 = vld [vmem:[#allocation2 + $0x48] sm:$0xf]  ;;  %v4954_v5 = vor.u32 %v6275_v61, %v4951_v63  ;;  %v4782_v49 = vor.u32 %v6234_v41, %v4781_v40  ;;  %v6166_v51 = vld [vmem:[#allocation2 + $0x2d4] sm:$0xf0] }
  0x6f   :  { %1594 = vmatpush.bf16.msrb.mxu0 %v4906_v1  ;;  %1563 = vmatmul.bf16.vlgmr.msra.gmra.mxu1 %v6759_v8  ;;  %v6086_v1 = vld [vmem:[#allocation2 + $0x54] sm:$0xf0]  ;;  %v4637_v52 = vld [vmem:[#allocation2 + $0x3c8] sm:$0xf] }
  0x70   :  { %1607 = vmatpush.bf16.msrb.mxu1 %v5034_v2  ;;  %1576 = vmatmul.bf16.vlgmr.msra.gmra.mxu2 %v6766_v15  ;;  %v4317_v2 = vld [vmem:[#allocation2 + $0x148] sm:$0xf]  ;;  %v4190_v6 = vor.u32 %v6086_v1, %v4189_v0  ;;  %v6198_v54 = vld [vmem:[#allocation2 + $0x3d4] sm:$0xf0] }
  0x71   :  { %1620 = vmatpush.bf16.msrb.mxu2 %v4270_v3  ;;  %1589 = vmatmul.bf16.vlgmr.msra.gmra.mxu3 %v6788_v36  ;;  %v6118_v3 = vld [vmem:[#allocation2 + $0x154] sm:$0xf0]  ;;  %v4765_v55 = vld [vmem:[#allocation2 + $0x4c8] sm:$0xf]  ;;  %v4638_v60 = vor.u32 %v6198_v54, %v4637_v52 }
  0x72   :  { %1633 = vmatpush.bf16.msrb.mxu3 %v4398_v7  ;;  %v6239_v7 = vld [vmem:[#allocation2 + $0x524] sm:$0xf]  ;;  %v4318_v12 = vor.u32 %v6118_v3, %v4317_v2  ;;  %v6162_v63 = vld [vmem:[#allocation2 + $0x2b4] sm:$0xf0]  ;;  %v4621_v0 = vld [vmem:[#allocation2 + $0x3a8] sm:$0xf] }
  0x73   :  { %1595 = vmatpush.bf16.msrb.mxu0 %v4890_v16  ;;  %v6082_v16 = vld [vmem:[#allocation2 + $0x34] sm:$0xf0]  ;;  %v4810_v19 = vor.u32 %v6239_v7, %v4807_v10  ;;  %v4749_v3 = vld [vmem:[#allocation2 + $0x4a8] sm:$0xf] }
  0x74   :  { %1608 = vmatpush.bf16.msrb.mxu1 %v5018_v17  ;;  %v4301_v17 = vld [vmem:[#allocation2 + $0x128] sm:$0xf]  ;;  %v4174_v23 = vor.u32 %v6082_v16, %v4173_v14  ;;  %v6194_v2 = vld [vmem:[#allocation2 + $0x3b4] sm:$0xf0] }
  0x75   :  { %1621 = vmatpush.bf16.msrb.mxu2 %v4254_v18  ;;  %v6114_v18 = vld [vmem:[#allocation2 + $0x134] sm:$0xf0]  ;;  %v4622_v10 = vor.u32 %v6194_v2, %v4621_v0  ;;  %v4605_v14 = vld [vmem:[#allocation2 + $0x388] sm:$0xf] }
  0x76   :  { %1634 = vmatpush.bf16.msrb.mxu3 %v4382_v22  ;;  %v4938_v22 = vor.u32 %v6271_v11, %v4935_v13  ;;  %v4302_v28 = vor.u32 %v6114_v18, %v4301_v17  ;;  %v6158_v13 = vld [vmem:[#allocation2 + $0x294] sm:$0xf0]  ;;  %v4733_v18 = vld [vmem:[#allocation2 + $0x488] sm:$0xf] }
  0x77   :  { %1596 = vmatpush.bf16.msrb.mxu0 %v4874_v29  ;;  %v6078_v29 = vld [vmem:[#allocation2 + $0x14] sm:$0xf0]  ;;  %v4461_v26 = vld [vmem:[#allocation2 + $0x268] sm:$0xf] }
  0x78   :  { %1609 = vmatpush.bf16.msrb.mxu1 %v5002_v30  ;;  %v4285_v30 = vld [vmem:[#allocation2 + $0x108] sm:$0xf]  ;;  %v4158_v43 = vor.u32 %v6078_v29, %v4157_v27  ;;  %v6190_v17 = vld [vmem:[#allocation2 + $0x394] sm:$0xf0] }
  0x79   :  { %1622 = vmatpush.bf16.msrb.mxu2 %v4238_v31  ;;  %v6110_v31 = vld [vmem:[#allocation2 + $0x114] sm:$0xf0]  ;;  %v4845_v34 = vld [vmem:[#allocation2 + $0x568] sm:$0xf] }
  0x7a   :  { %1635 = vmatpush.bf16.msrb.mxu3 %v4366_v38  ;;  %v4794_v38 = vor.u32 %v6235_v20, %v4791_v21  ;;  %v4861_v20 = vld [vmem:[#allocation2 + $0x588] sm:$0xf]  ;;  %v6254_v21 = vld [vmem:[#allocation2 + $0x594] sm:$0xf0] }
  0x7b   :  { %1597 = vmatpush.bf16.msrb.mxu0 %v4858_v44  ;;  %v4909_v44 = vld [vmem:[#allocation2 + $0x5e8] sm:$0xf]  ;;  %v6154_v27 = vld [vmem:[#allocation2 + $0x274] sm:$0xf0]  ;;  %v4862_v29 = vor.u32 %v6254_v21, %v4861_v20 }
  0x7c   :  { %1610 = vmatpush.bf16.msrb.mxu1 %v4986_v45  ;;  %v6266_v45 = vld [vmem:[#allocation2 + $0x5f4] sm:$0xf0]  ;;  %v4445_v41 = vld [vmem:[#allocation2 + $0x248] sm:$0xf] }
  0x7d   :  { %1623 = vmatpush.bf16.msrb.mxu2 %v4222_v46  ;;  %v4286_v46 = vor.u32 %v6110_v31, %v4285_v30  ;;  %v4910_v53 = vor.u32 %v6266_v45, %v4909_v44  ;;  %v6186_v30 = vld [vmem:[#allocation2 + $0x374] sm:$0xf0]  ;;  %v4717_v31 = vld [vmem:[#allocation2 + $0x468] sm:$0xf] }
  0x7e   :  { %1636 = vmatpush.bf16.msrb.mxu3 %v4350_v50  ;;  %v4509_v50 = vld [vmem:[#allocation2 + $0x2c8] sm:$0xf]  ;;  %v6218_v32 = vld [vmem:[#allocation2 + $0x474] sm:$0xf0] }
  0x7f   :  { %1598 = vmatpush.bf16.msrb.mxu0 %v4842_v56  ;;  %v6230_v56 = vld [vmem:[#allocation2 + $0x4d4] sm:$0xf0]  ;;  %v4510_v59 = vor.u32 %v6166_v51, %v4509_v50  ;;  %v4718_v40 = vor.u32 %v6218_v32, %v4717_v31  ;;  %v6100_v31 = vld [vmem:[#allocation2 + $0xcc] sm:$0xf] }
  0x80   :  { %1611 = vmatpush.bf16.msrb.mxu1 %v4970_v57  ;;  %v4893_v57 = vld [vmem:[#allocation2 + $0x5c8] sm:$0xf]  ;;  %v4766_v61 = vor.u32 %v6230_v56, %v4765_v55  ;;  %v6250_v35 = vld [vmem:[#allocation2 + $0x574] sm:$0xf0] }
  0x81   :  { %1624 = vmatpush.bf16.msrb.mxu2 %v4206_v58  ;;  %v6262_v58 = vld [vmem:[#allocation2 + $0x5d4] sm:$0xf0]  ;;  %v4846_v44 = vor.u32 %v6250_v35, %v4845_v34  ;;  %v4557_v55 = vld [vmem:[#allocation2 + $0x328] sm:$0xf]  ;;  %v4255_v34 = vld [vmem:[#allocation2 + $0xd8] sm:$0xf0] }
  0x82   :  { %1637 = vmatpush.bf16.msrb.mxu3 %v4334_v62  ;;  %v4493_v62 = vld [vmem:[#allocation2 + $0x2a8] sm:$0xf]  ;;  %v4894_v1 = vor.u32 %v6262_v58, %v4893_v57  ;;  %v6182_v45 = vld [vmem:[#allocation2 + $0x354] sm:$0xf0]  ;;  %v6132_v35 = vld [vmem:[#allocation2 + $0x1cc] sm:$0xf] }
  0x83   :  { %1599 = vmatpush.bf16.msrb.mxu0 %v4826_v4  ;;  %v6226_v4 = vld [vmem:[#allocation2 + $0x4b4] sm:$0xf0]  ;;  %v4494_v7 = vor.u32 %v6162_v63, %v4493_v62  ;;  %v4685_v58 = vld [vmem:[#allocation2 + $0x428] sm:$0xf] }
  0x84   :  { %1612 = vmatpush.bf16.msrb.mxu1 %v4954_v5  ;;  %v4877_v5 = vld [vmem:[#allocation2 + $0x5a8] sm:$0xf]  ;;  %v4750_v11 = vor.u32 %v6226_v4, %v4749_v3  ;;  %v6146_v54 = vld [vmem:[#allocation2 + $0x234] sm:$0xf0] }
  0x85   :  { %1625 = vmatpush.bf16.msrb.mxu2 %v4190_v6  ;;  %v6258_v6 = vld [vmem:[#allocation2 + $0x5b4] sm:$0xf0]  ;;  %v4413_v63 = vld [vmem:[#allocation2 + $0x208] sm:$0xf] }
  0x86   :  { %1638 = vmatpush.bf16.msrb.mxu3 %v4318_v12  ;;  %v4477_v12 = vld [vmem:[#allocation2 + $0x288] sm:$0xf]  ;;  %v4878_v16 = vor.u32 %v6258_v6, %v4877_v5  ;;  %v6178_v57 = vld [vmem:[#allocation2 + $0x334] sm:$0xf0] }
  0x87   :  { %1600 = vmatpush.bf16.msrb.mxu0 %v4810_v19  ;;  %v6222_v19 = vld [vmem:[#allocation2 + $0x494] sm:$0xf0]  ;;  %v4541_v3 = vld [vmem:[#allocation2 + $0x308] sm:$0xf] }
  0x88   :  { %1613 = vmatpush.bf16.msrb.mxu1 %v4938_v22  ;;  %v4478_v22 = vor.u32 %v6158_v13, %v4477_v12  ;;  %v4734_v24 = vor.u32 %v6222_v19, %v4733_v18  ;;  %v6142_v0 = vld [vmem:[#allocation2 + $0x214] sm:$0xf0]  ;;  %v4669_v5 = vld [vmem:[#allocation2 + $0x408] sm:$0xf]  ;;  %v6136_v18 = vld [vmem:[#allocation2 + $0x1ec] sm:$0xf] }
  0x89   :  { %1626 = vmatpush.bf16.msrb.mxu2 %v4174_v23  ;;  %v4606_v23 = vor.u32 %v6190_v17, %v4605_v14  ;;  %v6174_v4 = vld [vmem:[#allocation2 + $0x314] sm:$0xf0]  ;;  %v5037_v12 = vld [vmem:[#allocation2 + $0x6e8] sm:$0xf]  ;;  %v6104_v14 = vld [vmem:[#allocation2 + $0xec] sm:$0xf] }
  0x8a   :  { %1639 = vmatpush.bf16.msrb.mxu3 %v4302_v28  ;;  %v4589_v28 = vld [vmem:[#allocation2 + $0x368] sm:$0xf]  ;;  %v6298_v13 = vld [vmem:[#allocation2 + $0x6f4] sm:$0xf0]  ;;  %v4271_v17 = vld [vmem:[#allocation2 + $0xf8] sm:$0xf0]  ;;  %v4542_v20 = vor.u32 %v6174_v4, %v4541_v3 }
  0x8b   :  { %1601 = vmatpush.bf16.msrb.mxu0 %v4794_v38  ;;  %v4462_v38 = vor.u32 %v6154_v27, %v4461_v26  ;;  %v4590_v39 = vor.u32 %v6186_v30, %v4589_v28  ;;  %v4399_v19 = vld [vmem:[#allocation2 + $0x1f8] sm:$0xf0]  ;;  %v5038_v26 = vor.u32 %v6298_v13, %v5037_v12  ;;  %v4274_v27 = vor.u32 %v6104_v14, %v4271_v17  ;;  %v6294_v30 = vld [vmem:[#allocation2 + $0x6d4] sm:$0xf0]  ;;  %v4973_v4 = vld [vmem:[#allocation2 + $0x668] sm:$0xf] }
  0x8c   :  { %1614 = vmatpush.bf16.msrb.mxu1 %v4922_v42  ;;  %v6150_v42 = vld [vmem:[#allocation2 + $0x254] sm:$0xf0]  ;;  %v4402_v28 = vor.u32 %v6136_v18, %v4399_v19  ;;  %v4335_v12 = vld [vmem:[#allocation2 + $0x178] sm:$0xf0]  ;;  %v6152_v13 = vld [vmem:[#allocation2 + $0x26c] sm:$0xf] }
  0x8d   :  { %1627 = vmatpush.bf16.msrb.mxu2 %v4158_v43  ;;  %v4573_v43 = vld [vmem:[#allocation2 + $0x348] sm:$0xf]  ;;  %v4446_v50 = vor.u32 %v6150_v42, %v4445_v41  ;;  %v4258_v42 = vor.u32 %v6100_v31, %v4255_v34  ;;  %v4463_v14 = vld [vmem:[#allocation2 + $0x278] sm:$0xf0] }
  0x8e   :  { %1640 = vmatpush.bf16.msrb.mxu3 %v4286_v46  ;;  %1602 = vmatmul.bf16.vlgmr.msrb.gmra.mxu0 %v6790_v37  ;;  %v4701_v46 = vld [vmem:[#allocation2 + $0x448] sm:$0xf]  ;;  %v4574_v51 = vor.u32 %v6182_v45, %v4573_v43  ;;  %v6290_v45 = vld [vmem:[#allocation2 + $0x6b4] sm:$0xf0] }
  0x8f   :  { %1646 = vmatpush.bf16.msra.mxu0 %v4526_v47  ;;  %1615 = vmatmul.bf16.vlgmr.msrb.gmra.mxu1 %v6786_v33  ;;  %v6214_v47 = vld [vmem:[#allocation2 + $0x454] sm:$0xf0] }
  0x90   :  { %1659 = vmatpush.bf16.msra.mxu1 %v4654_v48  ;;  %1628 = vmatmul.bf16.vlgmr.msrb.gmra.mxu2 %v6761_v9  ;;  %v4829_v48 = vld [vmem:[#allocation2 + $0x548] sm:$0xf]  ;;  %v4702_v52 = vor.u32 %v6214_v47, %v4701_v46  ;;  %v6096_v46 = vld [vmem:[#allocation2 + $0xac] sm:$0xf] }
  0x91   :  { %1672 = vmatpush.bf16.msra.mxu2 %v4782_v49  ;;  %1641 = vmatmul.bf16.vlgmr.msrb.gmra.mxu3 %v6774_v25  ;;  %v6246_v49 = vld [vmem:[#allocation2 + $0x554] sm:$0xf0] }
  0x92   :  { %1685 = vmatpush.bf16.msra.mxu3 %v4910_v53  ;;  %v4429_v53 = vld [vmem:[#allocation2 + $0x228] sm:$0xf]  ;;  %v4830_v56 = vor.u32 %v6246_v49, %v4829_v48  ;;  %v4239_v48 = vld [vmem:[#allocation2 + $0xb8] sm:$0xf0]  ;;  %v6128_v49 = vld [vmem:[#allocation2 + $0x1ac] sm:$0xf] }
  0x93   :  { %1647 = vmatpush.bf16.msra.mxu0 %v4510_v59  ;;  %v6210_v59 = vld [vmem:[#allocation2 + $0x434] sm:$0xf0]  ;;  %v4430_v62 = vor.u32 %v6146_v54, %v4429_v53  ;;  %v4242_v54 = vor.u32 %v6096_v46, %v4239_v48  ;;  %v4431_v46 = vld [vmem:[#allocation2 + $0x238] sm:$0xf0] }
  0x94   :  { %1660 = vmatpush.bf16.msra.mxu1 %v4638_v60  ;;  %v4813_v60 = vld [vmem:[#allocation2 + $0x528] sm:$0xf]  ;;  %v4686_v2 = vor.u32 %v6210_v59, %v4685_v58  ;;  %v6092_v58 = vld [vmem:[#allocation2 + $0x8c] sm:$0xf] }
  0x95   :  { %1673 = vmatpush.bf16.msra.mxu2 %v4766_v61  ;;  %v6242_v61 = vld [vmem:[#allocation2 + $0x534] sm:$0xf0] }
  0x96   :  { %1686 = vmatpush.bf16.msra.mxu3 %v4894_v1  ;;  %v4558_v1 = vor.u32 %v6178_v57, %v4557_v55  ;;  %v4814_v6 = vor.u32 %v6242_v61, %v4813_v60  ;;  %v6286_v57 = vld [vmem:[#allocation2 + $0x694] sm:$0xf0]  ;;  %v4223_v60 = vld [vmem:[#allocation2 + $0x98] sm:$0xf0]  ;;  %v6124_v61 = vld [vmem:[#allocation2 + $0x18c] sm:$0xf] }
  0x97   :  { %1648 = vmatpush.bf16.msra.mxu0 %v4494_v7  ;;  %v6206_v7 = vld [vmem:[#allocation2 + $0x414] sm:$0xf0] }
  0x98   :  { %1661 = vmatpush.bf16.msra.mxu1 %v4622_v10  ;;  %v4797_v10 = vld [vmem:[#allocation2 + $0x508] sm:$0xf]  ;;  %v4670_v21 = vor.u32 %v6206_v7, %v4669_v5  ;;  %v6282_v5 = vld [vmem:[#allocation2 + $0x674] sm:$0xf0] }
  0x99   :  { %1674 = vmatpush.bf16.msra.mxu2 %v4750_v11  ;;  %v6238_v11 = vld [vmem:[#allocation2 + $0x514] sm:$0xf0] }
  0x9a   :  { %1687 = vmatpush.bf16.msra.mxu3 %v4878_v16  ;;  %v4414_v16 = vor.u32 %v6142_v0, %v4413_v63  ;;  %v6156_v63 = vld [vmem:[#allocation2 + $0x28c] sm:$0xf]  ;;  %v4479_v0 = vld [vmem:[#allocation2 + $0x298] sm:$0xf0] }
  0x9b   :  { %1649 = vmatpush.bf16.msra.mxu0 %v4478_v22  ;;  %v6168_v22 = vld [vmem:[#allocation2 + $0x2ec] sm:$0xf]  ;;  %v4482_v7 = vor.u32 %v6156_v63, %v4479_v0 }
  0x9c   :  { %1662 = vmatpush.bf16.msra.mxu1 %v4606_v23  ;;  %v4527_v23 = vld [vmem:[#allocation2 + $0x2f8] sm:$0xf0]  ;;  %v6232_v63 = vld [vmem:[#allocation2 + $0x4ec] sm:$0xf] }
  0x9d   :  { %1675 = vmatpush.bf16.msra.mxu2 %v4734_v24  ;;  %v4798_v24 = vor.u32 %v6238_v11, %v4797_v10  ;;  %v4530_v32 = vor.u32 %v6168_v22, %v4527_v23  ;;  %v4207_v10 = vld [vmem:[#allocation2 + $0x78] sm:$0xf0]  ;;  %v6120_v11 = vld [vmem:[#allocation2 + $0x16c] sm:$0xf]  ;;  %v4466_v23 = vor.u32 %v6152_v13, %v4463_v14 }
  0x9e   :  { %1688 = vmatpush.bf16.msra.mxu3 %v4862_v29  ;;  %v5021_v29 = vld [vmem:[#allocation2 + $0x6c8] sm:$0xf]  ;;  %v4338_v19 = vor.u32 %v6120_v11, %v4335_v12  ;;  %v6084_v22 = vld [vmem:[#allocation2 + $0x4c] sm:$0xf] }
  0x9f   :  { %1650 = vmatpush.bf16.msra.mxu0 %v4462_v38  ;;  %v4383_v38 = vld [vmem:[#allocation2 + $0x1d8] sm:$0xf0]  ;;  %v5022_v41 = vor.u32 %v6294_v30, %v5021_v29 }
  0xa0   :  { %1663 = vmatpush.bf16.msra.mxu1 %v4590_v39  ;;  %v6164_v39 = vld [vmem:[#allocation2 + $0x2cc] sm:$0xf]  ;;  %v4386_v43 = vor.u32 %v6132_v35, %v4383_v38  ;;  %v4447_v29 = vld [vmem:[#allocation2 + $0x258] sm:$0xf0]  ;;  %v4941_v35 = vld [vmem:[#allocation2 + $0x628] sm:$0xf] }
  0xa1   :  { %1676 = vmatpush.bf16.msra.mxu2 %v4718_v40  ;;  %v4511_v40 = vld [vmem:[#allocation2 + $0x2d8] sm:$0xf0]  ;;  %v6274_v38 = vld [vmem:[#allocation2 + $0x634] sm:$0xf0] }
  0xa2   :  { %1689 = vmatpush.bf16.msra.mxu3 %v4846_v44  ;;  %v5005_v44 = vld [vmem:[#allocation2 + $0x6a8] sm:$0xf]  ;;  %v4514_v47 = vor.u32 %v6164_v39, %v4511_v40  ;;  %v6080_v39 = vld [vmem:[#allocation2 + $0x2c] sm:$0xf]  ;;  %v4942_v48 = vor.u32 %v6274_v38, %v4941_v35  ;;  %v4623_v35 = vld [vmem:[#allocation2 + $0x3b8] sm:$0xf0] }
  0xa3   :  { %1651 = vmatpush.bf16.msra.mxu0 %v4446_v50  ;;  %v4367_v50 = vld [vmem:[#allocation2 + $0x1b8] sm:$0xf0]  ;;  %v5006_v53 = vor.u32 %v6290_v45, %v5005_v44  ;;  %v6144_v45 = vld [vmem:[#allocation2 + $0x22c] sm:$0xf] }
  0xa4   :  { %1664 = vmatpush.bf16.msra.mxu1 %v4574_v51  ;;  %v6160_v51 = vld [vmem:[#allocation2 + $0x2ac] sm:$0xf]  ;;  %v4370_v55 = vor.u32 %v6128_v49, %v4367_v50  ;;  %v4925_v49 = vld [vmem:[#allocation2 + $0x608] sm:$0xf]  ;;  %v6270_v50 = vld [vmem:[#allocation2 + $0x614] sm:$0xf0] }
  0xa5   :  { %1677 = vmatpush.bf16.msra.mxu2 %v4702_v52  ;;  %v4495_v52 = vld [vmem:[#allocation2 + $0x2b8] sm:$0xf0]  ;;  %v4926_v0 = vor.u32 %v6270_v50, %v4925_v49  ;;  %v6224_v38 = vld [vmem:[#allocation2 + $0x4ac] sm:$0xf] }
  0xa6   :  { %1690 = vmatpush.bf16.msra.mxu3 %v4830_v56  ;;  %v4989_v56 = vld [vmem:[#allocation2 + $0x688] sm:$0xf]  ;;  %v4498_v59 = vor.u32 %v6160_v51, %v4495_v52  ;;  %v6188_v50 = vld [vmem:[#allocation2 + $0x38c] sm:$0xf] }
  0xa7   :  { %1652 = vmatpush.bf16.msra.mxu0 %v4430_v62  ;;  %v4351_v62 = vld [vmem:[#allocation2 + $0x198] sm:$0xf0] }
  0xa8   :  { %1665 = vmatpush.bf16.msra.mxu1 %v4558_v1  ;;  %v4990_v1 = vor.u32 %v6286_v57, %v4989_v56  ;;  %v4354_v3 = vor.u32 %v6124_v61, %v4351_v62  ;;  %v6108_v56 = vld [vmem:[#allocation2 + $0x10c] sm:$0xf]  ;;  %v4434_v57 = vor.u32 %v6144_v45, %v4431_v46  ;;  %v4655_v62 = vld [vmem:[#allocation2 + $0x3f8] sm:$0xf0] }
  0xa9   :  { %1678 = vmatpush.bf16.msra.mxu2 %v4686_v2  ;;  %v4226_v2 = vor.u32 %v6092_v58, %v4223_v60  ;;  %v4287_v58 = vld [vmem:[#allocation2 + $0x118] sm:$0xf0]  ;;  %v6200_v61 = vld [vmem:[#allocation2 + $0x3ec] sm:$0xf] }
  0xaa   :  { %1691 = vmatpush.bf16.msra.mxu3 %v4814_v6  ;;  %v6088_v6 = vld [vmem:[#allocation2 + $0x6c] sm:$0xf]  ;;  %v4415_v60 = vld [vmem:[#allocation2 + $0x218] sm:$0xf0]  ;;  %v4658_v12 = vor.u32 %v6200_v61, %v4655_v62 }
  0xab   :  { %1653 = vmatpush.bf16.msra.mxu0 %v4414_v16  ;;  %v4974_v16 = vor.u32 %v6282_v5, %v4973_v4  ;;  %v4210_v18 = vor.u32 %v6088_v6, %v4207_v10  ;;  %v4290_v6 = vor.u32 %v6108_v56, %v4287_v58  ;;  %v5039_v10 = vld [vmem:[#allocation2 + $0x6f8] sm:$0xf0]  ;;  %v6284_v56 = vld [vmem:[#allocation2 + $0x68c] sm:$0xf] }
  0xac   :  { %1666 = vmatpush.bf16.msra.mxu1 %v4542_v20  ;;  %v4957_v20 = vld [vmem:[#allocation2 + $0x648] sm:$0xf]  ;;  %v6810_v31 = vpop.f32.mrf.mxu1  ;;  %v5007_v45 = vld [vmem:[#allocation2 + $0x6b8] sm:$0xf0]  ;;  %v6184_v61 = vld [vmem:[#allocation2 + $0x36c] sm:$0xf] }
  0xad   :  { %1679 = vmatpush.bf16.msra.mxu2 %v4670_v21  ;;  %v6278_v21 = vld [vmem:[#allocation2 + $0x654] sm:$0xf0]  ;;  %v4591_v62 = vld [vmem:[#allocation2 + $0x378] sm:$0xf0] }
  0xae   :  { %1692 = vmatpush.bf16.msra.mxu3 %v4798_v24  ;;  %1654 = vmatmul.bf16.vlgmr.msra.gmra.mxu0 %v6759_v8  ;;  %v4191_v24 = vld [vmem:[#allocation2 + $0x58] sm:$0xf0]  ;;  %v4958_v30 = vor.u32 %v6278_v21, %v4957_v20  ;;  %v6228_v20 = vld [vmem:[#allocation2 + $0x4cc] sm:$0xf] }
  0xaf   :  { %1698 = vmatpush.bf16.msrb.mxu0 %v5038_v26  ;;  %1667 = vmatmul.bf16.vlgmr.msra.gmra.mxu1 %v6766_v15  ;;  %v6116_v26 = vld [vmem:[#allocation2 + $0x14c] sm:$0xf] }
  0xb0   :  { %1711 = vmatpush.bf16.msrb.mxu1 %v4274_v27  ;;  %1680 = vmatmul.bf16.vlgmr.msra.gmra.mxu2 %v6788_v36  ;;  %v4319_v27 = vld [vmem:[#allocation2 + $0x158] sm:$0xf0] }
  0xb1   :  { %1724 = vmatpush.bf16.msrb.mxu2 %v4402_v28  ;;  %1693 = vmatmul.bf16.vlgmr.msra.gmra.mxu3 %v6790_v37  ;;  %v6148_v28 = vld [vmem:[#allocation2 + $0x24c] sm:$0xf]  ;;  %v4322_v34 = vor.u32 %v6116_v26, %v4319_v27  ;;  %v4895_v26 = vld [vmem:[#allocation2 + $0x5d8] sm:$0xf0] }
  0xb2   :  { %1737 = vmatpush.bf16.msrb.mxu3 %v4530_v32  ;;  %v4194_v32 = vor.u32 %v6084_v22, %v4191_v24  ;;  %v4450_v40 = vor.u32 %v6148_v28, %v4447_v29  ;;  %v6260_v24 = vld [vmem:[#allocation2 + $0x5cc] sm:$0xf]  ;;  %v5023_v28 = vld [vmem:[#allocation2 + $0x6d8] sm:$0xf0] }
  0xb3   :  { %1699 = vmatpush.bf16.msrb.mxu0 %v5022_v41  ;;  %v4175_v41 = vld [vmem:[#allocation2 + $0x38] sm:$0xf0]  ;;  %v6292_v27 = vld [vmem:[#allocation2 + $0x6cc] sm:$0xf] }
  0xb4   :  { %1712 = vmatpush.bf16.msrb.mxu1 %v4258_v42  ;;  %v6112_v42 = vld [vmem:[#allocation2 + $0x12c] sm:$0xf]  ;;  %v4178_v52 = vor.u32 %v6080_v39, %v4175_v41  ;;  %v1462_v4 = vpop.f32.mrf.mxu1  ;;  %v5026_v39 = vor.u32 %v6292_v27, %v5023_v28 }
  0xb5   :  { %1725 = vmatpush.bf16.msrb.mxu2 %v4386_v43  ;;  %v4303_v43 = vld [vmem:[#allocation2 + $0x138] sm:$0xf0]  ;;  %v6256_v41 = vld [vmem:[#allocation2 + $0x5ac] sm:$0xf] }
  0xb6   :  { %1738 = vmatpush.bf16.msrb.mxu3 %v4514_v47  ;;  %v6808_v17 = vpop.f32.mrf.mxu0  ;;  %v6814_v47 = vpop.f32.mrf.mxu3  ;;  %v6280_v4 = vld [vmem:[#allocation2 + $0x66c] sm:$0xf] }
  0xb7   :  { %1700 = vmatpush.bf16.msrb.mxu0 %v5006_v53  ;;  %v4306_v53 = vor.u32 %v6112_v42, %v4303_v43  ;;  %v4879_v42 = vld [vmem:[#allocation2 + $0x5b8] sm:$0xf0]  ;;  %v6288_v43 = vld [vmem:[#allocation2 + $0x6ac] sm:$0xf] }
  0xb8   :  { %1713 = vmatpush.bf16.msrb.mxu1 %v4242_v54  ;;  %v6076_v54 = vld [vmem:[#allocation2 + $0xc] sm:$0xf]  ;;  %v4882_v49 = vor.u32 %v6256_v41, %v4879_v42  ;;  %v4943_v42 = vld [vmem:[#allocation2 + $0x638] sm:$0xf0] }
  0xb9   :  { %1726 = vmatpush.bf16.msrb.mxu2 %v4370_v55  ;;  %v4159_v55 = vld [vmem:[#allocation2 + $0x18] sm:$0xf0]  ;;  %v6272_v41 = vld [vmem:[#allocation2 + $0x62c] sm:$0xf] }
  0xba   :  { %1739 = vmatpush.bf16.msrb.mxu3 %v4498_v59  ;;  %v6140_v59 = vld [vmem:[#allocation2 + $0x20c] sm:$0xf]  ;;  %v4162_v5 = vor.u32 %v6076_v54, %v4159_v55  ;;  %v4735_v54 = vld [vmem:[#allocation2 + $0x498] sm:$0xf0] }
  0xbb   :  { %1701 = vmatpush.bf16.msrb.mxu0 %v4990_v1  ;;  %v6812_v44 = vpop.f32.mrf.mxu2  ;;  %v4783_v1 = vld [vmem:[#allocation2 + $0x4f8] sm:$0xf0]  ;;  %v4418_v11 = vor.u32 %v6140_v59, %v4415_v60  ;;  %v6252_v55 = vld [vmem:[#allocation2 + $0x58c] sm:$0xf] }
  0xbc   :  { %1714 = vmatpush.bf16.msrb.mxu1 %v4226_v2  ;;  %v6264_v2 = vld [vmem:[#allocation2 + $0x5ec] sm:$0xf]  ;;  %v4786_v14 = vor.u32 %v6232_v63, %v4783_v1  ;;  %v4719_v1 = vld [vmem:[#allocation2 + $0x478] sm:$0xf0] }
  0xbd   :  { %1727 = vmatpush.bf16.msrb.mxu2 %v4354_v3  ;;  %v4911_v3 = vld [vmem:[#allocation2 + $0x5f8] sm:$0xf0]  ;;  %v6216_v63 = vld [vmem:[#allocation2 + $0x46c] sm:$0xf] }
  0xbe   :  { %1740 = vmatpush.bf16.msrb.mxu3 %v4482_v7  ;;  %v1449_v51 = vpop.f32.mrf.mxu0  ;;  %v6296_v7 = vld [vmem:[#allocation2 + $0x6ec] sm:$0xf]  ;;  %v1488_v21 = vpop.f32.mrf.mxu3 }
  0xbf   :  { %1702 = vmatpush.bf16.msrb.mxu0 %v4974_v16  ;;  %v4914_v16 = vor.u32 %v6264_v2, %v4911_v3  ;;  %v5042_v22 = vor.u32 %v6296_v7, %v5039_v10  ;;  %v4607_v51 = vld [vmem:[#allocation2 + $0x398] sm:$0xf0]  ;;  %v6248_v2 = vld [vmem:[#allocation2 + $0x56c] sm:$0xf]  ;;  %v4722_v7 = vor.u32 %v6216_v63, %v4719_v1 }
  0xc0   :  { %1715 = vmatpush.bf16.msrb.mxu1 %v4210_v18  ;;  %v6196_v18 = vld [vmem:[#allocation2 + $0x3cc] sm:$0xf]  ;;  %v4847_v3 = vld [vmem:[#allocation2 + $0x578] sm:$0xf0] }
  0xc1   :  { %1728 = vmatpush.bf16.msrb.mxu2 %v4338_v19  ;;  %v4639_v19 = vld [vmem:[#allocation2 + $0x3d8] sm:$0xf0]  ;;  %v4850_v10 = vor.u32 %v6248_v2, %v4847_v3  ;;  %v6276_v21 = vld [vmem:[#allocation2 + $0x64c] sm:$0xf]  ;;  %v6305_v3 = vld [vmem:[%s7024_s3 + $0x30] sm:$0xff] }
  0xc2   :  { %1741 = vmatpush.bf16.msrb.mxu3 %v4466_v23  ;;  %v4767_v23 = vld [vmem:[#allocation2 + $0x4d8] sm:$0xf0]  ;;  %v4642_v29 = vor.u32 %v6196_v18, %v4639_v19  ;;  %v6244_v19 = vld [vmem:[#allocation2 + $0x54c] sm:$0xf] }
  0xc3   :  { %1703 = vmatpush.bf16.msrb.mxu0 %v4958_v30  ;;  %v1475_v13 = vpop.f32.mrf.mxu2  ;;  %v4770_v30 = vor.u32 %v6228_v20, %v4767_v23  ;;  %v4703_v18 = vld [vmem:[#allocation2 + $0x458] sm:$0xf0] }
  0xc4   :  { %1716 = vmatpush.bf16.msrb.mxu1 %v4194_v32  ;;  %v4898_v32 = vor.u32 %v6260_v24, %v4895_v26  ;;  %v6212_v13 = vld [vmem:[#allocation2 + $0x44c] sm:$0xf]  ;;  %v4831_v20 = vld [vmem:[#allocation2 + $0x558] sm:$0xf0] }
  0xc5   :  { %1729 = vmatpush.bf16.msrb.mxu2 %v4322_v34  ;;  %v6192_v34 = vld [vmem:[#allocation2 + $0x3ac] sm:$0xf]  ;;  %v4706_v28 = vor.u32 %v6212_v13, %v4703_v18  ;;  %v6314_v2 = vld [vmem:[%s7024_s3 + $0x78] sm:$0xff] }
  0xc6   :  { %1742 = vmatpush.bf16.msrb.mxu3 %v4450_v40  ;;  %v4751_v40 = vld [vmem:[#allocation2 + $0x4b8] sm:$0xf0]  ;;  %v4626_v46 = vor.u32 %v6192_v34, %v4623_v35  ;;  %v6208_v34 = vld [vmem:[#allocation2 + $0x42c] sm:$0xf] }
  0xc7   :  { %1704 = vmatpush.bf16.msrb.mxu0 %v4942_v48  ;;  %v4754_v48 = vor.u32 %v6224_v38, %v4751_v40  ;;  %v4687_v38 = vld [vmem:[#allocation2 + $0x438] sm:$0xf0] }
  0xc8   :  { %1717 = vmatpush.bf16.msrb.mxu1 %v4178_v52  ;;  %v6220_v52 = vld [vmem:[#allocation2 + $0x48c] sm:$0xf]  ;;  %v4815_v40 = vld [vmem:[#allocation2 + $0x538] sm:$0xf0] }
  0xc9   :  { %1730 = vmatpush.bf16.msrb.mxu2 %v4306_v53  ;;  %v5010_v53 = vor.u32 %v6288_v43, %v5007_v45  ;;  %v6831_v43 = vld [vmem:[%s7023_s2] sm:$0xf] }
  0xca   :  { %1743 = vmatpush.bf16.msrb.mxu3 %v4434_v57  ;;  %v4991_v57 = vld [vmem:[#allocation2 + $0x698] sm:$0xf0]  ;;  %v311_v13 = vperm.slane %v6831_v43, 1 }
  0xcb   :  { %1705 = vmatpush.bf16.msrb.mxu0 %v4926_v0  ;;  %v6820_v58 = vpop.f32.mrf.mxu0  ;;  %v4994_v0 = vor.u32 %v6284_v56, %v4991_v57  ;;  %v310_v56 = vperm.slane %v6831_v43, 0  ;;  %v6268_v57 = vld [vmem:[#allocation2 + $0x60c] sm:$0xf] }
  0xcc   :  { %1718 = vmatpush.bf16.msrb.mxu1 %v4162_v5  ;;  %v6822_v59 = vpop.f32.mrf.mxu1  ;;  %v4975_v5 = vld [vmem:[#allocation2 + $0x678] sm:$0xf0] }
  0xcd   :  { %1731 = vmatpush.bf16.msrb.mxu2 %v4290_v6  ;;  %v4594_v6 = vor.u32 %v6184_v61, %v4591_v62  ;;  %v1448_v1 = vadd.f32 %v6808_v17, %v310_v56  ;;  %v6313_v17 = vld [vmem:[%s7024_s3 + $0x70] sm:$0xff] }
  0xce   :  { %1744 = vmatpush.bf16.msrb.mxu3 %v4418_v11  ;;  %1706 = vmatmul.bf16.vlgmr.msrb.gmra.mxu0 %v6786_v33  ;;  %v6180_v11 = vld [vmem:[#allocation2 + $0x34c] sm:$0xf]  ;;  %v6317_v56 = vld [vmem:[%s7024_s3 + $0x90] sm:$0xff] }
  0xcf   :  { %1750 = vmatpush.bf16.msra.mxu0 %v4658_v12  ;;  %1719 = vmatmul.bf16.vlgmr.msrb.gmra.mxu1 %v6761_v9  ;;  %v4738_v9 = vor.u32 %v6220_v52, %v4735_v54  ;;  %v4575_v12 = vld [vmem:[#allocation2 + $0x358] sm:$0xf0] }
  0xd0   :  { %1763 = vmatpush.bf16.msra.mxu1 %v4786_v14  ;;  %1732 = vmatmul.bf16.vlgmr.msrb.gmra.mxu2 %v6774_v25  ;;  %v4863_v25 = vld [vmem:[#allocation2 + $0x598] sm:$0xf0]  ;;  %v4578_v24 = vor.u32 %v6180_v11, %v4575_v12 }
  0xd1   :  { %1776 = vmatpush.bf16.msra.mxu2 %v4914_v16  ;;  %1745 = vmatmul.bf16.vlgmr.msrb.gmra.mxu3 %v6759_v8  ;;  %v4610_v8 = vor.u32 %v6188_v50, %v4607_v51  ;;  %v4866_v60 = vor.u32 %v6252_v55, %v4863_v25  ;;  %v4978_v16 = vor.u32 %v6280_v4, %v4975_v5  ;;  %v4543_v50 = vld [vmem:[#allocation2 + $0x318] sm:$0xf0]  ;;  %v6204_v51 = vld [vmem:[#allocation2 + $0x40c] sm:$0xf] }
  0xd2   :  { %1789 = vmatpush.bf16.msra.mxu3 %v5042_v22  ;;  %v4959_v22 = vld [vmem:[#allocation2 + $0x658] sm:$0xf0]  ;;  %v6236_v55 = vld [vmem:[#allocation2 + $0x50c] sm:$0xf]  ;;  %v1461_v4 = vadd.f32 %v6810_v31, %v1448_v1 }
  0xd3   :  { %1751 = vmatpush.bf16.msra.mxu0 %v4642_v29  ;;  %v6824_v14 = vpop.f32.mrf.mxu2  ;;  %v1501_v26 = vpop.f32.mrf.mxu0  ;;  %v4834_v29 = vor.u32 %v6244_v19, %v4831_v20  ;;  %v4962_v35 = vor.u32 %v6276_v21, %v4959_v22  ;;  %v4671_v54 = vld [vmem:[#allocation2 + $0x418] sm:$0xf0]  ;;  %v6304_v5 = vld [vmem:[%s7024_s3 + $0x28] sm:$0xff] }
  0xd4   :  { %1764 = vmatpush.bf16.msra.mxu1 %v4770_v30  ;;  %v6826_v23 = vpop.f32.mrf.mxu3  ;;  %v1514_v27 = vpop.f32.mrf.mxu1  ;;  %v6176_v30 = vld [vmem:[#allocation2 + $0x32c] sm:$0xf]  ;;  %v4799_v25 = vld [vmem:[#allocation2 + $0x518] sm:$0xf0]  ;;  %v4674_v61 = vor.u32 %v6204_v51, %v4671_v54  ;;  %v1474_v31 = vadd.f32 %v6812_v44, %v1461_v4  ;;  %v6319_v51 = vld [vmem:[%s7024_s3 + $0xa0] sm:$0xff] }
  0xd5   :  { %1777 = vmatpush.bf16.msra.mxu2 %v4898_v32  ;;  %v4559_v32 = vld [vmem:[#allocation2 + $0x338] sm:$0xf0]  ;;  %v4802_v62 = vor.u32 %v6236_v55, %v4799_v25  ;;  %v1539_v21 = vadd.f32 %v6826_v23, %v311_v13  ;;  %v6300_v22 = vld [vmem:[%s7024_s3 + $0x8] sm:$0xff] }
  0xd6   :  { %1790 = vmatpush.bf16.msra.mxu3 %v5026_v39  ;;  %v6240_v39 = vld [vmem:[#allocation2 + $0x52c] sm:$0xf]  ;;  %v4562_v45 = vor.u32 %v6176_v30, %v4559_v32  ;;  %v6302_v44 = vld [vmem:[%s7024_s3 + $0x18] sm:$0xff] }
  0xd7   :  { %1752 = vmatpush.bf16.msra.mxu0 %v4626_v46  ;;  %v4690_v46 = vor.u32 %v6208_v34, %v4687_v38  ;;  %v6310_v12 = vld [vmem:[%s7024_s3 + $0x58] sm:$0xff] }
  0xd8   :  { %1765 = vmatpush.bf16.msra.mxu1 %v4754_v48  ;;  %v4818_v48 = vor.u32 %v6240_v39, %v4815_v40  ;;  %v6321_v40 = vld [vmem:[%s7024_s3 + $0xb0] sm:$0xff]  ;;  %v6318_v55 = vld [vmem:[%s7024_s3 + $0x98] sm:$0xff] }
  0xd9   :  { %1778 = vmatpush.bf16.msra.mxu2 %v4882_v49  ;;  %v6172_v49 = vld [vmem:[#allocation2 + $0x30c] sm:$0xf]  ;;  %v6330_v1 = vld [vmem:[%s7024_s3 + $0xf8] sm:$0xff] }
  0xda   :  { %1791 = vmatpush.bf16.msra.mxu3 %v5010_v53  ;;  %v4946_v53 = vor.u32 %v6272_v41, %v4943_v42 }
  0xdb   :  { %1753 = vmatpush.bf16.msra.mxu0 %v4610_v8  ;;  %v1527_v52 = vpop.f32.mrf.mxu2  ;;  %v4927_v8 = vld [vmem:[#allocation2 + $0x618] sm:$0xf0] }
  0xdc   :  { %1766 = vmatpush.bf16.msra.mxu1 %v4738_v9  ;;  %v1540_v9 = vpop.f32.mrf.mxu3  ;;  %v4930_v63 = vor.u32 %v6268_v57, %v4927_v8  ;;  %v6316_v8 = vld [vmem:[%s7024_s3 + $0x88] sm:$0xff] }
  0xdd   :  { %1779 = vmatpush.bf16.msra.mxu2 %v4866_v60  ;;  %v4546_v60 = vor.u32 %v6172_v49, %v4543_v50 }
  0xde   :  { %1792 = vmatpush.bf16.msra.mxu3 %v4994_v0  ;;  %v6306_v0 = vld [vmem:[%s7024_s3 + $0x38] sm:$0xff] }
  0xdf   :  { %1754 = vmatpush.bf16.msra.mxu0 %v4594_v6 }
  0xe0   :  { %1767 = vmatpush.bf16.msra.mxu1 %v4722_v7  ;;  %v6311_v7 = vld [vmem:[%s7024_s3 + $0x60] sm:$0xff] }
  0xe1   :  { %1780 = vmatpush.bf16.msra.mxu2 %v4850_v10 }
  0xe2   :  { %1793 = vmatpush.bf16.msra.mxu3 %v4978_v16  ;;  %v6301_v16 = vld [vmem:[%s7024_s3 + $0x10] sm:$0xff] }
  0xe3   :  { %1755 = vmatpush.bf16.msra.mxu0 %v4578_v24  ;;  %v6322_v24 = vld [vmem:[%s7024_s3 + $0xb8] sm:$0xff] }
  0xe4   :  { %1768 = vmatpush.bf16.msra.mxu1 %v4706_v28 }
  0xe5   :  { %1781 = vmatpush.bf16.msra.mxu2 %v4834_v29  ;;  %v6299_v29 = vld [vmem:[%s7024_s3] sm:$0xff] }
  0xe6   :  { %1794 = vmatpush.bf16.msra.mxu3 %v4962_v35 }
  0xe7   :  { %1756 = vmatpush.bf16.msra.mxu0 %v4562_v45 }
  0xe8   :  { %1769 = vmatpush.bf16.msra.mxu1 %v4690_v46 }
  0xe9   :  { %1782 = vmatpush.bf16.msra.mxu2 %v4818_v48  ;;  %v6320_v48 = vld [vmem:[%s7024_s3 + $0xa8] sm:$0xff] }
  0xea   :  { %1795 = vmatpush.bf16.msra.mxu3 %v4946_v53 }
  0xeb   :  { %1757 = vmatpush.bf16.msra.mxu0 %v4546_v60 }
  0xec   :  { %1770 = vmatpush.bf16.msra.mxu1 %v4674_v61  ;;  %v1564_v6 = vpop.f32.mrf.mxu1  ;;  %v6315_v61 = vld [vmem:[%s7024_s3 + $0x80] sm:$0xff] }
  0xed   :  { %1783 = vmatpush.bf16.msra.mxu2 %v4802_v62  ;;  %v312_v62 = vperm.slane %v6831_v43, 2 }
  0xee   :  { %1796 = vmatpush.bf16.msra.mxu3 %v4930_v63  ;;  %1758 = vmatmul.bf16.vlgmr.msra.gmra.mxu0 %v6766_v15  ;;  %v6312_v15 = vld [vmem:[%s7024_s3 + $0x68] sm:$0xff] }
  0xef   :  { %2070 = vmatpush.bf16.msrb.mxu0 %v6306_v0  ;;  %1771 = vmatmul.bf16.vlgmr.msra.gmra.mxu1 %v6788_v36  ;;  %v6303_v36 = vld [vmem:[%s7024_s3 + $0x20] sm:$0xff] }
  0xf0   :  { %2083 = vmatpush.bf16.msrb.mxu1 %v6314_v2  ;;  %1784 = vmatmul.bf16.vlgmr.msra.gmra.mxu2 %v6790_v37  ;;  %v1551_v37 = vpop.f32.mrf.mxu0 }
  0xf1   :  { %1797 = vmatmul.bf16.vlgmr.msra.gmra.mxu3 %v6786_v33  ;;  %v1487_v33 = vadd.f32 %v6814_v47, %v1474_v31  ;;  %2096 = vmatpush.bf16.msrb.mxu2 %v6322_v24  ;;  %v1552_v23 = vadd.f32 %v1551_v37, %v1539_v21 }
  0xf2   :  { %2109 = vmatpush.bf16.msrb.mxu3 %v6330_v1  ;;  %v6685_v1 = vmov 0  }
  0xf3   :  { %2071 = vmatpush.bf16.msrb.mxu0 %v6305_v3  ;;  %v1500_v10 = vadd.f32 %v6820_v58, %v1487_v33  ;;  %v1577_v11 = vpop.f32.mrf.mxu2  ;;  %v6309_v58 = vld [vmem:[%s7024_s3 + $0x50] sm:$0xff]  ;;  %v1565_v32 = vadd.f32 %v1564_v6, %v1552_v23  ;;  %v6327_v33 = vld [vmem:[%s7024_s3 + $0xe0] sm:$0xff]  ;;  %6565 = vset.pattern.permute.xlu0 %v6685_v1 }
  0xf4   :  { %2084 = vmatpush.bf16.msrb.mxu1 %v6313_v17  ;;  %v1590_v47 = vpop.f32.mrf.mxu3  ;;  %v1566_v20 = vpop.f32.mrf.mxu1  ;;  %v6329_v17 = vld [vmem:[%s7024_s3 + $0xf0] sm:$0xff] }
  0xf5   :  { %v1513_v19 = vadd.f32 %v6822_v59, %v1500_v10  ;;  %v6308_v59 = vld [vmem:[%s7024_s3 + $0x48] sm:$0xff]  ;;  %v1578_v35 = vadd.f32 %v1577_v11, %v1565_v32  ;;  %2097 = vmatpush.bf16.msrb.mxu2 %v6321_v40  ;;  %v5454_v1 = vld [vmem:[#allocation5 + $0x230] sm:$0xf] }
  0xf6   :  { %2110 = vmatpush.bf16.msrb.mxu3 %v6329_v17 }
  0xf7   :  { %2072 = vmatpush.bf16.msrb.mxu0 %v6304_v5  ;;  %v1526_v26 = vadd.f32 %v6824_v14, %v1513_v19  ;;  %v6307_v14 = vld [vmem:[%s7024_s3 + $0x40] sm:$0xff]  ;;  %v1591_v38 = vadd.f32 %v1590_v47, %v1578_v35  ;;  %v6324_v19 = vld [vmem:[%s7024_s3 + $0xc8] sm:$0xff] }
  0xf8   :  { %2085 = vmatpush.bf16.msrb.mxu1 %v6312_v15  ;;  %v1553_v18 = vpop.f32.mrf.mxu0  ;;  %v6328_v15 = vld [vmem:[%s7024_s3 + $0xe8] sm:$0xff] }
  0xf9   :  { %v1802_v30 = vmax.f32 %v1526_v26, 0.0  ;;  %2098 = vmatpush.bf16.msrb.mxu2 %v6320_v48 }
  0xfa   :  { %2111 = vmatpush.bf16.msrb.mxu3 %v6328_v15  ;;  %v6495_v15 = vld [vmem:[#allocation5 + $0x520] sm:$0xf0] }
  0xfb   :  { %2073 = vmatpush.bf16.msrb.mxu0 %v6303_v36  ;;  %v1579_v27 = vpop.f32.mrf.mxu2  ;;  %v1806_v34 = vpack.c.bf16 %v1802_v30, %v1802_v30 }
  0xfc   :  { %2086 = vmatpush.bf16.msrb.mxu1 %v6311_v7  ;;  %v1592_v28 = vpop.f32.mrf.mxu3  ;;  %v313_v27 = vperm.slane %v6831_v43, 3 }
  0xfd   :  { %2099 = vmatpush.bf16.msrb.mxu2 %v6319_v51  ;;  %v6568_v51 = vld [vmem:[%s7025_s4] ss:$0 sm:$0xff]  ;;  %s6683_s4 = smov 126  }
  0xfe   :  { %2112 = vmatpush.bf16.msrb.mxu3 %v6327_v33  ;;  %v6042_v33 = vld [vmem:[#allocation5 + $0x6c8] sm:$0xf] }
  0xff   :  { %2074 = vmatpush.bf16.msrb.mxu0 %v6302_v44  ;;  %v6326_v44 = vld [vmem:[%s7024_s3 + $0xd8] sm:$0xff] }
 0x100   :  { %2087 = vmatpush.bf16.msrb.mxu1 %v6310_v12  ;;  %v6325_v12 = vld [vmem:[%s7024_s3 + $0xd0] sm:$0xff] }
 0x101   :  { %2100 = vmatpush.bf16.msrb.mxu2 %v6318_v55 }
 0x102   :  { %2113 = vmatpush.bf16.msrb.mxu3 %v6326_v44 }
 0x103   :  { %2075 = vmatpush.bf16.msrb.mxu0 %v6301_v16 }
 0x104   :  { %2088 = vmatpush.bf16.msrb.mxu1 %v6309_v58 }
 0x105   :  { %2101 = vmatpush.bf16.msrb.mxu2 %v6317_v56 }
 0x106   :  { %2114 = vmatpush.bf16.msrb.mxu3 %v6325_v12  ;;  %v6432_v12 = vld [vmem:[#allocation5 + $0x328] sm:$0xf0] }
 0x107   :  { %2076 = vmatpush.bf16.msrb.mxu0 %v6300_v22  ;;  %v6323_v22 = vld [vmem:[%s7024_s3 + $0xc0] sm:$0xff] }
 0x108   :  { %2089 = vmatpush.bf16.msrb.mxu1 %v6308_v59 }
 0x109   :  { %2102 = vmatpush.bf16.msrb.mxu2 %v6316_v8 }
 0x10a   :  { %2115 = vmatpush.bf16.msrb.mxu3 %v6324_v19  ;;  %v6014_v19 = vld [vmem:[#allocation5 + $0x690] sm:$0xf] }
 0x10b   :  { %2077 = vmatpush.bf16.msrb.mxu0 %v6299_v29  ;;  %v1603_v39 = vpop.f32.mrf.mxu0 }
 0x10c   :  { %2090 = vmatpush.bf16.msrb.mxu1 %v6307_v14  ;;  %v1604_v41 = vadd.f32 %v1603_v39, %v1591_v38  ;;  %v1616_v42 = vpop.f32.mrf.mxu1 }
 0x10d   :  { %2103 = vmatpush.bf16.msrb.mxu2 %v6315_v61 }
 0x10e   :  { %2078 = vmatmul.bf16.vlgmr.msrb.gmra.mxu0 %v1806_v34  ;;  %v1617_v45 = vadd.f32 %v1616_v42, %v1604_v41  ;;  %2116 = vmatpush.bf16.msrb.mxu3 %v6323_v22  ;;  %v6369_v22 = vld [vmem:[#allocation5 + $0x130] sm:$0xf0] }
 0x110   :  { %v1803_v46 = vmax.f32 %v1617_v45, 0.0 }
 0x112   :  { %v1807_v49 = vpack.c.bf16 %v1803_v46, %v1803_v46 }
 0x113   :  { %v1629_v50 = vpop.f32.mrf.mxu2  ;;  %v1605_v53 = vpop.f32.mrf.mxu0 }
 0x114   :  { %v1642_v52 = vpop.f32.mrf.mxu3  ;;  %2091 = vmatmul.bf16.vlgmr.msrb.gmra.mxu1 %v1807_v49  ;;  %v1618_v54 = vpop.f32.mrf.mxu1  ;;  %v1630_v2 = vadd.f32 %v1629_v50, %v312_v62 }
 0x116   :  { %v1643_v5 = vadd.f32 %v1642_v52, %v1630_v2  ;;  %v5370_v2 = vld [vmem:[#allocation5 + $0x188] sm:$0xf] }
 0x11b   :  { %v1631_v25 = vpop.f32.mrf.mxu2 }
 0x11c   :  { %v1644_v57 = vpop.f32.mrf.mxu3 }
 0x12b   :  { %v1655_v9 = vpop.f32.mrf.mxu0 }
 0x12c   :  { %v1668_v60 = vpop.f32.mrf.mxu1  ;;  %v1656_v37 = vadd.f32 %v1655_v9, %v1643_v5  ;;  %v6439_v5 = vld [vmem:[#allocation5 + $0x360] sm:$0xf0] }
 0x12e   :  { %v1669_v6 = vadd.f32 %v1668_v60, %v1656_v37 }
 0x133   :  { %v1681_v63 = vpop.f32.mrf.mxu2  ;;  %v1657_v3 = vpop.f32.mrf.mxu0 }
 0x134   :  { %v1694_v0 = vpop.f32.mrf.mxu3  ;;  %v1670_v4 = vpop.f32.mrf.mxu1  ;;  %v1682_v7 = vadd.f32 %v1681_v63, %v1669_v6  ;;  %v6383_v3 = vld [vmem:[#allocation5 + $0x1a0] sm:$0xf0] }
 0x135   :  { %v5594_v4 = vld [vmem:[#allocation5 + $0x348] sm:$0xf]  ;;  %v5371_v17 = vor.u32 %v6383_v3, %v5370_v2  ;;  %v6551_v6 = vld [vmem:[#allocation5 + $0x6e0] sm:$0xf0]  ;;  %v6404_v3 = vld [vmem:[#allocation5 + $0x248] sm:$0xf0] }
 0x136   :  { %v1695_v10 = vadd.f32 %v1694_v0, %v1682_v7  ;;  %v6684_v0 = vmov 1   ;;  %v5342_v7 = vld [vmem:[#allocation5 + $0x150] sm:$0xf]  ;;  %v6043_v44 = vor.u32 %v6551_v6, %v6042_v33  ;;  %v5202_v33 = vld [vmem:[#allocation5 + $0x38] sm:$0xf] }
 0x137   :  { %6566 = vset.pattern.permute.xlu1 %v6684_v0  ;;  %3621 = vmatpush.bf16.msra.mxu0 %v5371_v17  ;;  %v6460_v17 = vld [vmem:[#allocation5 + $0x408] sm:$0xf0]  ;;  %v6341_v6 = vld [vmem:[#allocation5 + $0x50] sm:$0xf0] }
 0x138   :  { %3660 = vmatpush.bf16.msra.mxu3 %v6043_v44 }
 0x13b   :  { %v1683_v31 = vpop.f32.mrf.mxu2 }
 0x13c   :  { %v1696_v36 = vpop.f32.mrf.mxu3  ;;  %v5818_v31 = vld [vmem:[#allocation5 + $0x508] sm:$0xf] }
 0x13d   :  { %v5595_v36 = vor.u32 %v6439_v5, %v5594_v4  ;;  %v5819_v37 = vor.u32 %v6495_v15, %v5818_v31  ;;  %v5678_v4 = vld [vmem:[#allocation5 + $0x3f0] sm:$0xf]  ;;  %v6516_v31 = vld [vmem:[#allocation5 + $0x5c8] sm:$0xf0] }
 0x13e   :  { %v5902_v5 = vld [vmem:[#allocation5 + $0x5b0] sm:$0xf] }
 0x13f   :  { %3634 = vmatpush.bf16.msra.mxu1 %v5595_v36  ;;  %3647 = vmatpush.bf16.msra.mxu2 %v5819_v37  ;;  %v5455_v36 = vor.u32 %v6404_v3, %v5454_v1  ;;  %v5679_v37 = vor.u32 %v6460_v17, %v5678_v4  ;;  %v5903_v44 = vor.u32 %v6516_v31, %v5902_v5  ;;  %v5316_v1 = vld [vmem:[#allocation5 + $0x134] sm:$0xf0]  ;;  %v6478_v17 = vld [vmem:[#allocation5 + $0x49c] sm:$0xf] }
 0x140   :  { %v5540_v4 = vld [vmem:[#allocation5 + $0x2f4] sm:$0xf0]  ;;  %v6534_v31 = vld [vmem:[#allocation5 + $0x65c] sm:$0xf] }
 0x141   :  { %v5764_v5 = vld [vmem:[#allocation5 + $0x4b4] sm:$0xf0] }
 0x14b   :  { %v1707_v11 = vpop.f32.mrf.mxu0 }
 0x14c   :  { %v1708_v47 = vadd.f32 %v1707_v11, %v1695_v10  ;;  %v1720_v13 = vpop.f32.mrf.mxu1  ;;  %v6376_v10 = vld [vmem:[#allocation5 + $0x168] sm:$0xf0]  ;;  %v5566_v11 = vld [vmem:[#allocation5 + $0x310] sm:$0xf] }
 0x14d   :  { %v1721_v28 = vadd.f32 %v1720_v13, %v313_v27  ;;  %v5567_v13 = vor.u32 %v6432_v12, %v5566_v11  ;;  %v5762_v27 = vld [vmem:[#allocation5 + $0x498] sm:$0xf]  ;;  %v6453_v12 = vld [vmem:[#allocation5 + $0x3d0] sm:$0xf0] }
 0x14e   :  { %v1804_v16 = vmax.f32 %v1708_v47, 0.0  ;;  %v5343_v47 = vor.u32 %v6376_v10, %v5342_v7  ;;  %v5426_v7 = vld [vmem:[#allocation5 + $0x1f8] sm:$0xf]  ;;  %v6397_v10 = vld [vmem:[#allocation5 + $0x210] sm:$0xf0] }
 0x14f   :  { %3635 = vmatpush.bf16.msra.mxu1 %v5567_v13  ;;  %v5650_v11 = vld [vmem:[#allocation5 + $0x3b8] sm:$0xf]  ;;  %v6509_v13 = vld [vmem:[#allocation5 + $0x590] sm:$0xf0] }
 0x150   :  { %v1808_v18 = vpack.c.bf16 %v1804_v16, %v1804_v16  ;;  %v5790_v16 = vld [vmem:[#allocation5 + $0x4d0] sm:$0xf]  ;;  %3622 = vmatpush.bf16.msra.mxu0 %v5343_v47  ;;  %v5874_v47 = vld [vmem:[#allocation5 + $0x578] sm:$0xf] }
 0x152   :  { %2104 = vmatmul.bf16.vlgmr.msrb.gmra.mxu2 %v1808_v18  ;;  %v6488_v18 = vld [vmem:[#allocation5 + $0x4e8] sm:$0xf0] }
 0x153   :  { %v1733_v20 = vpop.f32.mrf.mxu2  ;;  %v1709_v21 = vpop.f32.mrf.mxu0 }
 0x154   :  { %v1746_v58 = vpop.f32.mrf.mxu3  ;;  %v1722_v24 = vpop.f32.mrf.mxu1  ;;  %v1734_v23 = vadd.f32 %v1733_v20, %v1721_v28  ;;  %v5791_v20 = vor.u32 %v6488_v18, %v5790_v16  ;;  %v5314_v21 = vld [vmem:[#allocation5 + $0x118] sm:$0xf]  ;;  %v5203_v16 = vor.u32 %v6341_v6, %v5202_v33  ;;  %v2123_v18 = vld [vmem:[%s7030_s9] sm:$0xff]  ;;  %v5767_v33 = vor.u32 %v6478_v17, %v5764_v5 }
 0x155   :  { %v5315_v28 = vor.u32 %v6369_v22, %v5314_v21  ;;  %v6334_v21 = vld [vmem:[#allocation5 + $0x18] sm:$0xf0]  ;;  %v5875_v22 = vor.u32 %v6509_v13, %v5874_v47  ;;  %v6359_v6 = vld [vmem:[#allocation5 + $0xe4] sm:$0xf]  ;;  %v5736_v47 = vld [vmem:[#allocation5 + $0x47c] sm:$0xf0] }
 0x156   :  { %v1747_v29 = vadd.f32 %v1746_v58, %v1734_v23  ;;  %v6544_v58 = vld [vmem:[#allocation5 + $0x6a8] sm:$0xf0]  ;;  %v6481_v23 = vld [vmem:[#allocation5 + $0x4b0] sm:$0xf0]  ;;  %3648 = vmatpush.bf16.msra.mxu2 %v5791_v20  ;;  %v5651_v20 = vor.u32 %v6453_v12, %v5650_v11  ;;  %v5512_v11 = vld [vmem:[#allocation5 + $0x2bc] sm:$0xf0] }
 0x157   :  { %v6015_v24 = vor.u32 %v6544_v58, %v6014_v19  ;;  %3623 = vmatpush.bf16.msra.mxu0 %v5315_v28  ;;  %v5427_v19 = vor.u32 %v6397_v10, %v5426_v7  ;;  %v5174_v58 = vld [vmem:[#allocation5] sm:$0xf]  ;;  %v6471_v12 = vld [vmem:[#allocation5 + $0x464] sm:$0xf] }
 0x158   :  { %v5846_v28 = vld [vmem:[#allocation5 + $0x540] sm:$0xf]  ;;  %v6527_v13 = vld [vmem:[#allocation5 + $0x624] sm:$0xf] }
 0x159   :  { %3661 = vmatpush.bf16.msra.mxu3 %v6015_v24  ;;  %v5398_v24 = vld [vmem:[#allocation5 + $0x1c0] sm:$0xf]  ;;  %v6499_v5 = vld [vmem:[#allocation5 + $0x544] sm:$0xf] }
 0x15a   :  { %v5288_v7 = vld [vmem:[#allocation5 + $0xfc] sm:$0xf0] }
 0x15b   :  { %v1735_v26 = vpop.f32.mrf.mxu2 }
 0x15c   :  { %v1748_v59 = vpop.f32.mrf.mxu3  ;;  %v5538_v26 = vld [vmem:[#allocation5 + $0x2d8] sm:$0xf] }
 0x15d   :  { %v6425_v59 = vld [vmem:[#allocation5 + $0x2f0] sm:$0xf0] }
 0x16b   :  { %v1759_v30 = vpop.f32.mrf.mxu0 }
 0x16c   :  { %v1772_v14 = vpop.f32.mrf.mxu1  ;;  %v1760_v32 = vadd.f32 %v1759_v30, %v1747_v29  ;;  %v5986_v29 = vld [vmem:[#allocation5 + $0x658] sm:$0xf]  ;;  %v6537_v30 = vld [vmem:[#allocation5 + $0x670] sm:$0xf0] }
 0x16e   :  { %v1773_v34 = vadd.f32 %v1772_v14, %v1760_v32  ;;  %v5539_v14 = vor.u32 %v6425_v59, %v5538_v26  ;;  %v5763_v32 = vor.u32 %v6481_v23, %v5762_v27  ;;  %v6390_v26 = vld [vmem:[#allocation5 + $0x1d8] sm:$0xf0]  ;;  %v5622_v59 = vld [vmem:[#allocation5 + $0x380] sm:$0xf] }
 0x16f   :  { %v6446_v27 = vld [vmem:[#allocation5 + $0x398] sm:$0xf0] }
 0x170   :  { %3636 = vmatpush.bf16.msra.mxu1 %v5539_v14  ;;  %3649 = vmatpush.bf16.msra.mxu2 %v5763_v32  ;;  %v6502_v23 = vld [vmem:[#allocation5 + $0x558] sm:$0xf0]  ;;  %v6380_v14 = vld [vmem:[#allocation5 + $0x18c] sm:$0xf]  ;;  %v5372_v32 = vld [vmem:[#allocation5 + $0x1a4] sm:$0xf0] }
 0x173   :  { %v1785_v35 = vpop.f32.mrf.mxu2  ;;  %v1761_v40 = vpop.f32.mrf.mxu0 }
 0x174   :  { %v1786_v38 = vadd.f32 %v1785_v35, %v1773_v34  ;;  %v1798_v39 = vpop.f32.mrf.mxu3  ;;  %v1774_v41 = vpop.f32.mrf.mxu1  ;;  %v5286_v34 = vld [vmem:[#allocation5 + $0xe0] sm:$0xf]  ;;  %v6362_v35 = vld [vmem:[#allocation5 + $0xf8] sm:$0xf0] }
 0x175   :  { %v6418_v40 = vld [vmem:[#allocation5 + $0x2b8] sm:$0xf0]  ;;  %v5734_v41 = vld [vmem:[#allocation5 + $0x460] sm:$0xf] }
 0x176   :  { %v1799_v42 = vadd.f32 %v1798_v39, %v1786_v38  ;;  %v5510_v38 = vld [vmem:[#allocation5 + $0x2a0] sm:$0xf]  ;;  %v5987_v39 = vor.u32 %v6537_v30, %v5986_v29  ;;  %v5175_v30 = vor.u32 %v6334_v21, %v5174_v58  ;;  %v6352_v58 = vld [vmem:[#allocation5 + $0xac] sm:$0xf]  ;;  %v5260_v21 = vld [vmem:[#allocation5 + $0xc4] sm:$0xf0] }
 0x178   :  { %v1805_v45 = vmax.f32 %v1799_v42, 0.0  ;;  %v6474_v42 = vld [vmem:[#allocation5 + $0x478] sm:$0xf0]  ;;  %3662 = vmatpush.bf16.msra.mxu3 %v5987_v39  ;;  %v6492_v39 = vld [vmem:[#allocation5 + $0x50c] sm:$0xf] }
 0x17a   :  { %v1809_v46 = vpack.c.bf16 %v1805_v45, %v1805_v45  ;;  %v5958_v45 = vld [vmem:[#allocation5 + $0x620] sm:$0xf] }
 0x17b   :  { %v1787_v48 = vpop.f32.mrf.mxu2 }
 0x17c   :  { %v1800_v49 = vpop.f32.mrf.mxu3  ;;  %2117 = vmatmul.bf16.vlgmr.msrb.gmra.mxu3 %v1809_v46  ;;  %v6530_v46 = vld [vmem:[#allocation5 + $0x638] sm:$0xf0]  ;;  %v5287_v48 = vor.u32 %v6362_v35, %v5286_v34  ;;  %v6436_v34 = vld [vmem:[#allocation5 + $0x34c] sm:$0xf] }
 0x17d   :  { %v5511_v49 = vor.u32 %v6418_v40, %v5510_v38  ;;  %v5596_v38 = vld [vmem:[#allocation5 + $0x364] sm:$0xf0] }
 0x17e   :  { %3624 = vmatpush.bf16.msra.mxu0 %v5287_v48  ;;  %v5820_v40 = vld [vmem:[#allocation5 + $0x524] sm:$0xf0] }
 0x17f   :  { %3637 = vmatpush.bf16.msra.mxu1 %v5511_v49  ;;  %v5847_v49 = vor.u32 %v6502_v23, %v5846_v28  ;;  %v6520_v28 = vld [vmem:[#allocation5 + $0x5ec] sm:$0xf]  ;;  %v5932_v23 = vld [vmem:[#allocation5 + $0x604] sm:$0xf0] }
 0x18b   :  { %v2079_v50 = vpop.f32.mrf.mxu0 }
 0x18c   :  { %v2080_v52 = vadd.f32 %v6568_v51, %v2079_v50  ;;  %v5735_v50 = vor.u32 %v6474_v42, %v5734_v41  ;;  %v6355_v51 = vld [vmem:[#allocation5 + $0xc0] sm:$0xf0]  ;;  %v5399_v41 = vor.u32 %v6390_v26, %v5398_v24  ;;  %v5623_v42 = vor.u32 %v6446_v27, %v5622_v59  ;;  %v5484_v26 = vld [vmem:[#allocation5 + $0x284] sm:$0xf0]  ;;  %v6464_v59 = vld [vmem:[#allocation5 + $0x42c] sm:$0xf] }
 0x18d   :  { %v5708_v27 = vld [vmem:[#allocation5 + $0x444] sm:$0xf0] }
 0x18e   :  { %3650 = vmatpush.bf16.msra.mxu2 %v5735_v50  ;;  %v5375_v50 = vor.u32 %v6380_v14, %v5372_v32  ;;  %v5935_v14 = vor.u32 %v6520_v28, %v5932_v23  ;;  %v6345_v32 = vld [vmem:[#allocation5 + $0x74] sm:$0xf] }
 0x191   :  { %v2092_v53 = vpop.f32.mrf.mxu1 }
 0x192   :  { %v2093_v54 = vadd.f32 %v2092_v53, %v2080_v52  ;;  %v5482_v52 = vld [vmem:[#allocation5 + $0x268] sm:$0xf]  ;;  %v5959_v53 = vor.u32 %v6530_v46, %v5958_v45  ;;  %v6548_v45 = vld [vmem:[#allocation5 + $0x6cc] sm:$0xf] }
 0x193   :  { %v2081_v43 = vpop.f32.mrf.mxu0  ;;  %v6044_v46 = vld [vmem:[#allocation5 + $0x6e4] sm:$0xf0] }
 0x194   :  { %v5258_v43 = vld [vmem:[#allocation5 + $0xa8] sm:$0xf]  ;;  %3663 = vmatpush.bf16.msra.mxu3 %v5959_v53  ;;  %v5344_v53 = vld [vmem:[#allocation5 + $0x16c] sm:$0xf0] }
 0x199   :  { %v2094_v55 = vpop.f32.mrf.mxu1 }
 0x19a   :  { %v5706_v55 = vld [vmem:[#allocation5 + $0x428] sm:$0xf] }
 0x1d5   :  { %v2105_v25 = vpop.f32.mrf.mxu2 }
 0x1d6   :  { %v2106_v57 = vadd.f32 %v2105_v25, %v2093_v54  ;;  %v6411_v54 = vld [vmem:[#allocation5 + $0x280] sm:$0xf0] }
 0x1d7   :  { %v6467_v25 = vld [vmem:[#allocation5 + $0x440] sm:$0xf0] }
 0x1dd   :  { %v2107_v56 = vpop.f32.mrf.mxu2 }
 0x1de   :  { %v5930_v56 = vld [vmem:[#allocation5 + $0x5e8] sm:$0xf] }
 0x1ff   :  { %v2118_v8 = vpop.f32.mrf.mxu3 }
 0x200   :  { %v6948_v9 = vadd.f32 %v2118_v8, %v2106_v57  ;;  %v6523_v57 = vld [vmem:[#allocation5 + $0x600] sm:$0xf0]  ;;  %v5259_v8 = vor.u32 %v6355_v51, %v5258_v43  ;;  %v5599_v43 = vor.u32 %v6436_v34, %v5596_v38  ;;  %v5823_v51 = vor.u32 %v6492_v39, %v5820_v40  ;;  %v5232_v34 = vld [vmem:[#allocation5 + $0x8c] sm:$0xf0] }
 0x201   :  { %v5931_v2 = vor.u32 %v6523_v57, %v5930_v56  ;;  %v6485_v56 = vld [vmem:[#allocation5 + $0x4d4] sm:$0xf]  ;;  %v5792_v57 = vld [vmem:[#allocation5 + $0x4ec] sm:$0xf0]  ;;  %v5235_v39 = vor.u32 %v6345_v32, %v5232_v34 }
 0x202   :  { %2122 = vst [vmem:[%s7032_s11] sm:$0xff] %v6948_v9  ;;  %v2124_v60 = vmul.f32 0.5, %v6948_v9  ;;  %3625 = vmatpush.bf16.msra.mxu0 %v5259_v8  ;;  %v6541_v8 = vld [vmem:[#allocation5 + $0x694] sm:$0xf]  ;;  %v5456_v38 = vld [vmem:[#allocation5 + $0x24c] sm:$0xf0] }
 0x203   :  { %3664 = vmatpush.bf16.msra.mxu3 %v5931_v2  ;;  %v6422_v2 = vld [vmem:[#allocation5 + $0x2dc] sm:$0xf]  ;;  %v5378_v34 = vld [vmem:[#allocation5 + $0x190] sm:$0xf] }
 0x204   :  { %v2125_v61 = vmul.f32 1.442695, %v2124_v60  ;;  %v5483_v60 = vor.u32 %v6411_v54, %v5482_v52  ;;  %v6373_v52 = vld [vmem:[#allocation5 + $0x154] sm:$0xf] }
 0x205   :  { %v6429_v54 = vld [vmem:[#allocation5 + $0x314] sm:$0xf] }
 0x206   :  { %6569 = vpow2.f32 %v2125_v61  ;;  %v5707_v61 = vor.u32 %v6467_v25, %v5706_v55  ;;  %3638 = vmatpush.bf16.msra.mxu1 %v5483_v60  ;;  %v6047_v55 = vor.u32 %v6548_v45, %v6044_v46  ;;  %v5568_v25 = vld [vmem:[#allocation5 + $0x32c] sm:$0xf0]  ;;  %v6513_v45 = vld [vmem:[#allocation5 + $0x5b4] sm:$0xf] }
 0x207   :  { %v2120_v62 = vpop.f32.mrf.mxu3  ;;  %3665 = vmatpush.bf16.msra.mxu3 %v5903_v44  ;;  %v6016_v60 = vld [vmem:[#allocation5 + $0x6ac] sm:$0xf0]  ;;  %v6415_v44 = vld [vmem:[#allocation5 + $0x2a4] sm:$0xf] }
 0x208   :  { %v5230_v62 = vld [vmem:[#allocation5 + $0x70] sm:$0xf]  ;;  %3651 = vmatpush.bf16.msra.mxu2 %v5707_v61  ;;  %v5571_v61 = vor.u32 %v6429_v54, %v5568_v25  ;;  %v6019_v3 = vor.u32 %v6541_v8, %v6016_v60  ;;  %v6450_v54 = vld [vmem:[#allocation5 + $0x3bc] sm:$0xf]  ;;  %v5652_v25 = vld [vmem:[#allocation5 + $0x3d4] sm:$0xf0] }
 0x209   :  { %v5655_v8 = vor.u32 %v6450_v54, %v5652_v25 }
 0x20a   :  { %3639 = vmatpush.bf16.msra.mxu1 %v5455_v36 }
 0x20b   :  { %3666 = vmatpush.bf16.msra.mxu3 %v5875_v22  ;;  %v6408_v22 = vld [vmem:[#allocation5 + $0x26c] sm:$0xf] }
 0x20c   :  { %v6570_v63 = vpop.eup %6569  ;;  %3652 = vmatpush.bf16.msra.mxu2 %v5679_v37  ;;  %v5543_v37 = vor.u32 %v6422_v2, %v5540_v4  ;;  %v6443_v2 = vld [vmem:[#allocation5 + $0x384] sm:$0xf] }
 0x20d   :  { %2128 = vrot.lane.b32.xlu0 %v6570_v63, %s6683_s4  ;;  %v6348_v63 = vld [vmem:[#allocation5 + $0x88] sm:$0xf0] }
 0x20e   :  { %v5231_v15 = vor.u32 %v6348_v63, %v5230_v62  ;;  %3640 = vmatpush.bf16.msra.mxu1 %v5427_v19  ;;  %v5795_v62 = vor.u32 %v6485_v56, %v5792_v57  ;;  %v6366_v63 = vld [vmem:[#allocation5 + $0x11c] sm:$0xf]  ;;  %v5515_v19 = vor.u32 %v6415_v44, %v5512_v11  ;;  %v5876_v57 = vld [vmem:[#allocation5 + $0x594] sm:$0xf0] }
 0x20f   :  { %3667 = vmatpush.bf16.msra.mxu3 %v5847_v49  ;;  %v5319_v36 = vor.u32 %v6366_v63, %v5316_v1  ;;  %v6338_v49 = vld [vmem:[#allocation5 + $0x3c] sm:$0xf]  ;;  %v5400_v1 = vld [vmem:[#allocation5 + $0x1dc] sm:$0xf0] }
 0x210   :  { %3626 = vmatpush.bf16.msra.mxu0 %v5231_v15  ;;  %3653 = vmatpush.bf16.msra.mxu2 %v5651_v20  ;;  %v5988_v15 = vld [vmem:[#allocation5 + $0x674] sm:$0xf0]  ;;  %v5739_v20 = vor.u32 %v6471_v12, %v5736_v47  ;;  %v6506_v56 = vld [vmem:[#allocation5 + $0x57c] sm:$0xf] }
 0x211   :  { %v5991_v10 = vor.u32 %v6534_v31, %v5988_v15  ;;  %v5879_v60 = vor.u32 %v6506_v56, %v5876_v57  ;;  %v5848_v31 = vld [vmem:[#allocation5 + $0x55c] sm:$0xf0] }
 0x212   :  { %3641 = vmatpush.bf16.msra.mxu1 %v5399_v41  ;;  %v6457_v41 = vld [vmem:[#allocation5 + $0x3f4] sm:$0xf]  ;;  %v5851_v15 = vor.u32 %v6499_v5, %v5848_v31 }
 0x213   :  { %3712 = vmatpush.bf16.msrb.mxu3 %v6047_v55 }
 0x214   :  { %3627 = vmatpush.bf16.msra.mxu0 %v5203_v16  ;;  %3654 = vmatpush.bf16.msra.mxu2 %v5623_v42  ;;  %v5960_v16 = vld [vmem:[#allocation5 + $0x63c] sm:$0xf0]  ;;  %v5680_v42 = vld [vmem:[#allocation5 + $0x40c] sm:$0xf0] }
 0x215   :  { %v5963_v24 = vor.u32 %v6527_v13, %v5960_v16  ;;  %v5683_v46 = vor.u32 %v6457_v41, %v5680_v42  ;;  %v6384_v41 = vld [vmem:[#allocation5 + $0x1a8] sm:$0xf0]  ;;  %v5602_v42 = vld [vmem:[#allocation5 + $0x350] sm:$0xf] }
 0x216   :  { %3686 = vmatpush.bf16.msrb.mxu1 %v5599_v43  ;;  %v5379_v54 = vor.u32 %v6384_v41, %v5378_v34  ;;  %v5714_v34 = vld [vmem:[#allocation5 + $0x430] sm:$0xf] }
 0x217   :  { %3713 = vmatpush.bf16.msrb.mxu3 %v6019_v3  ;;  %v5624_v3 = vld [vmem:[#allocation5 + $0x39c] sm:$0xf0] }
 0x218   :  { %3628 = vmatpush.bf16.msra.mxu0 %v5175_v30  ;;  %3699 = vmatpush.bf16.msrb.mxu2 %v5823_v51  ;;  %v5711_v30 = vor.u32 %v6464_v59, %v5708_v27  ;;  %v5627_v17 = vor.u32 %v6443_v2, %v5624_v3  ;;  %v5798_v2 = vld [vmem:[#allocation5 + $0x4d8] sm:$0xf]  ;;  %v6489_v3 = vld [vmem:[#allocation5 + $0x4f0] sm:$0xf0] }
 0x21a   :  { %3687 = vmatpush.bf16.msrb.mxu1 %v5571_v61  ;;  %v5176_v61 = vld [vmem:[#allocation5 + $0x1c] sm:$0xf0] }
 0x21b   :  { %3714 = vmatpush.bf16.msrb.mxu3 %v5991_v10  ;;  %v2175_v10 = vld [vmem:[%s7027_s6] sm:$0xf] }
 0x21c   :  { %3673 = vmatpush.bf16.msrb.mxu0 %v5375_v50  ;;  %3700 = vmatpush.bf16.msrb.mxu2 %v5795_v62  ;;  %v5204_v50 = vld [vmem:[#allocation5 + $0x54] sm:$0xf0]  ;;  %v6387_v62 = vld [vmem:[#allocation5 + $0x1c4] sm:$0xf] }
 0x21d   :  { %v5207_v51 = vor.u32 %v6338_v49, %v5204_v50  ;;  %v5403_v4 = vor.u32 %v6387_v62, %v5400_v1  ;;  %v6050_v49 = vld [vmem:[#allocation5 + $0x6d0] sm:$0xf]  ;;  %v6433_v1 = vld [vmem:[#allocation5 + $0x330] sm:$0xf0] }
 0x21e   :  { %3688 = vmatpush.bf16.msrb.mxu1 %v5543_v37  ;;  %v2133_v37 = vld [vmem:[%s7026_s5] ss:$2 sm:$0xf] }
 0x21f   :  { %3715 = vmatpush.bf16.msrb.mxu3 %v5963_v24  ;;  %v2140_v11 = vperm.slane %v2133_v37, 0  ;;  %v2141_v12 = vperm.slane %v2133_v37, 1  ;;  %v2142_v47 = vperm.slane %v2133_v37, 2  ;;  %v2143_v13 = vperm.slane %v2133_v37, 3 }
 0x220   :  { %3701 = vmatpush.bf16.msrb.mxu2 %v5767_v33  ;;  %v5799_v37 = vor.u32 %v6489_v3, %v5798_v2  ;;  %v5658_v2 = vld [vmem:[#allocation5 + $0x3c0] sm:$0xf]  ;;  %v6454_v3 = vld [vmem:[#allocation5 + $0x3d8] sm:$0xf0] }
 0x222   :  { %3689 = vmatpush.bf16.msrb.mxu1 %v5515_v19  ;;  %v2178_v19 = vperm.slane %v2175_v10, 1 }
 0x223   :  { %3716 = vmatpush.bf16.msrb.mxu3 %v5935_v14 }
 0x224   :  { %3702 = vmatpush.bf16.msrb.mxu2 %v5739_v20  ;;  %v2179_v20 = vperm.slane %v2175_v10, 2 }
 0x228   :  { %3703 = vmatpush.bf16.msrb.mxu2 %v5711_v30 }
 0x22c   :  { %3704 = vmatpush.bf16.msrb.mxu2 %v5683_v46  ;;  %v5826_v46 = vld [vmem:[#allocation5 + $0x510] sm:$0xf] }
 0x230   :  { %3705 = vmatpush.bf16.msrb.mxu2 %v5655_v8 }
 0x234   :  { %3706 = vmatpush.bf16.msrb.mxu2 %v5627_v17  ;;  %v6545_v17 = vld [vmem:[#allocation5 + $0x6b0] sm:$0xf0] }
 0x27f   :  { %v2129_v29 = vpop.permute.xlu0 %2128 }
 0x280   :  { %v2131_v35 = vmul.f32 %v2129_v29, %v2123_v18  ;;  %v5291_v18 = vor.u32 %v6359_v6, %v5288_v7  ;;  %v5487_v29 = vor.u32 %v6408_v22, %v5484_v26 }
 0x282   :  { %v2132_v48 = vadd.f32 %v2131_v35, %v6948_v9  ;;  %v5347_v9 = vor.u32 %v6373_v52, %v5344_v53  ;;  %3690 = vmatpush.bf16.msrb.mxu1 %v5487_v29  ;;  %v6401_v35 = vld [vmem:[#allocation5 + $0x234] sm:$0xf]  ;;  %v6394_v52 = vld [vmem:[#allocation5 + $0x1fc] sm:$0xf]  ;;  %v5428_v53 = vld [vmem:[#allocation5 + $0x214] sm:$0xf0] }
 0x283   :  { %v5459_v40 = vor.u32 %v6401_v35, %v5456_v38  ;;  %v5431_v55 = vor.u32 %v6394_v52, %v5428_v53  ;;  %v6552_v53 = vld [vmem:[#allocation5 + $0x6e8] sm:$0xf0] }
 0x284   :  { %2155 = vperm.xlu1 %6566, %v2132_v48   ;;  %2136 = vperm.xlu0 %6565, %v2132_v48   ;;  %v5904_v48 = vld [vmem:[#allocation5 + $0x5cc] sm:$0xf0]  ;;  %v6051_v62 = vor.u32 %v6552_v53, %v6050_v49  ;;  %v5462_v49 = vld [vmem:[#allocation5 + $0x238] sm:$0xf]  ;;  %v6517_v53 = vld [vmem:[#allocation5 + $0x5d0] sm:$0xf0] }
 0x285   :  { %3674 = vmatpush.bf16.msrb.mxu0 %v5347_v9  ;;  %v5907_v43 = vor.u32 %v6513_v45, %v5904_v48  ;;  %v6331_v9 = vld [vmem:[#allocation5 + $0x4] sm:$0xf]  ;;  %v6440_v45 = vld [vmem:[#allocation5 + $0x368] sm:$0xf0] }
 0x286   :  { %3691 = vmatpush.bf16.msrb.mxu1 %v5459_v40  ;;  %v5179_v63 = vor.u32 %v6331_v9, %v5176_v61  ;;  %v6496_v48 = vld [vmem:[#allocation5 + $0x528] sm:$0xf0]  ;;  %v6377_v9 = vld [vmem:[#allocation5 + $0x170] sm:$0xf0] }
 0x287   :  { %3717 = vmatpush.bf16.msrb.mxu3 %v5907_v43  ;;  %v5827_v61 = vor.u32 %v6496_v48, %v5826_v46 }
 0x289   :  { %3675 = vmatpush.bf16.msrb.mxu0 %v5319_v36  ;;  %v5171_v36 = vld [vmem:[%s7026_s5 + $0x1] ss:$2 sm:$0xf] }
 0x28a   :  { %3692 = vmatpush.bf16.msrb.mxu1 %v5431_v55  ;;  %v2159_v33 = vperm.slane %v5171_v36, 0  ;;  %v2160_v6 = vperm.slane %v5171_v36, 1  ;;  %v2161_v7 = vperm.slane %v5171_v36, 2  ;;  %v2162_v44 = vperm.slane %v5171_v36, 3  ;;  %v6370_v36 = vld [vmem:[#allocation5 + $0x138] sm:$0xf0] }
 0x28b   :  { %3718 = vmatpush.bf16.msrb.mxu3 %v5879_v60  ;;  %v5603_v55 = vor.u32 %v6440_v45, %v5602_v42  ;;  %v5350_v60 = vld [vmem:[#allocation5 + $0x158] sm:$0xf]  ;;  %v6349_v45 = vld [vmem:[#allocation5 + $0x90] sm:$0xf0] }
 0x28c   :  { %6567 = vset.pattern.permute.xlu0 %v6684_v0  ;;  %v5263_v0 = vor.u32 %v6352_v58, %v5260_v21  ;;  %v2180_v58 = vperm.slane %v2175_v10, 3  ;;  %v5351_v5 = vor.u32 %v6377_v9, %v5350_v60  ;;  %v5238_v42 = vld [vmem:[#allocation5 + $0x78] sm:$0xf]  ;;  %v5210_v60 = vld [vmem:[#allocation5 + $0x40] sm:$0xf] }
 0x28d   :  { %3676 = vmatpush.bf16.msrb.mxu0 %v5291_v18  ;;  %v2177_v18 = vperm.slane %v2175_v10, 0  ;;  %v6482_v10 = vld [vmem:[#allocation5 + $0x4b8] sm:$0xf0] }
 0x28e   :  { %3693 = vmatpush.bf16.msrb.mxu1 %v5403_v4  ;;  %v6022_v4 = vld [vmem:[#allocation5 + $0x698] sm:$0xf]  ;;  %v6342_v9 = vld [vmem:[#allocation5 + $0x58] sm:$0xf0] }
 0x28f   :  { %3719 = vmatpush.bf16.msrb.mxu3 %v5851_v15  ;;  %v5322_v15 = vld [vmem:[#allocation5 + $0x120] sm:$0xf] }
 0x291   :  { %3677 = vmatpush.bf16.msrb.mxu0 %v5263_v0 }
 0x295   :  { %3678 = vmatpush.bf16.msrb.mxu0 %v5235_v39 }
 0x299   :  { %3679 = vmatpush.bf16.msrb.mxu0 %v5207_v51 }
 0x29d   :  { %3680 = vmatpush.bf16.msrb.mxu0 %v5179_v63  ;;  %v5574_v63 = vld [vmem:[#allocation5 + $0x318] sm:$0xf] }
 0x29e   :  { %v5575_v31 = vor.u32 %v6433_v1, %v5574_v63  ;;  %v5434_v63 = vld [vmem:[#allocation5 + $0x200] sm:$0xf]  ;;  %v6398_v1 = vld [vmem:[#allocation5 + $0x218] sm:$0xf0] }
 0x2f6   :  { %v2156_v16 = vpop.permute.xlu1 %2155  ;;  %v2137_v21 = vpop.permute.xlu0 %2136 }
 0x2f7   :  { %v2167_v22 = vmul.f32 %v2159_v33, %v2156_v16  ;;  %v2168_v24 = vmul.f32 %v2160_v6, %v2156_v16  ;;  %v2169_v26 = vmul.f32 %v2161_v7, %v2156_v16  ;;  %v2170_v59 = vmul.f32 %v2162_v44, %v2156_v16  ;;  %v5546_v6 = vld [vmem:[#allocation5 + $0x2e0] sm:$0xf]  ;;  %v6426_v7 = vld [vmem:[#allocation5 + $0x2f8] sm:$0xf0]  ;;  %v5294_v16 = vld [vmem:[#allocation5 + $0xe8] sm:$0xf] }
 0x2f8   :  { %v2148_v27 = vmul.f32 %v2140_v11, %v2137_v21  ;;  %v2149_v28 = vmul.f32 %v2141_v12, %v2137_v21  ;;  %v2150_v23 = vmul.f32 %v2142_v47, %v2137_v21  ;;  %v2151_v0 = vmul.f32 %v2143_v13, %v2137_v21  ;;  %v5770_v44 = vld [vmem:[#allocation5 + $0x4a0] sm:$0xf]  ;;  %v6538_v12 = vld [vmem:[#allocation5 + $0x678] sm:$0xf0]  ;;  %v6419_v21 = vld [vmem:[#allocation5 + $0x2c0] sm:$0xf0] }
 0x2f9   :  { %v6023_v33 = vor.u32 %v6545_v17, %v6022_v4  ;;  %v5994_v11 = vld [vmem:[#allocation5 + $0x660] sm:$0xf]  ;;  %v5323_v47 = vor.u32 %v6370_v36, %v5322_v15  ;;  %v5547_v13 = vor.u32 %v6426_v7, %v5546_v6  ;;  %v6510_v17 = vld [vmem:[#allocation5 + $0x598] sm:$0xf0]  ;;  %v5435_v15 = vor.u32 %v6398_v1, %v5434_v63  ;;  %v6335_v36 = vld [vmem:[#allocation5 + $0x20] sm:$0xf0] }
 0x2fa   :  { %v2171_v29 = vadd.f32 %v2167_v22, %v2148_v27  ;;  %v2172_v30 = vadd.f32 %v2168_v24, %v2149_v28  ;;  %v2173_v14 = vadd.f32 %v2169_v26, %v2150_v23  ;;  %v2174_v32 = vadd.f32 %v2170_v59, %v2151_v0  ;;  %v5742_v22 = vld [vmem:[#allocation5 + $0x468] sm:$0xf]  ;;  %v6475_v24 = vld [vmem:[#allocation5 + $0x480] sm:$0xf0]  ;;  %v5266_v23 = vld [vmem:[#allocation5 + $0xb0] sm:$0xf] }
 0x2fb   :  { %v5966_v26 = vld [vmem:[#allocation5 + $0x628] sm:$0xf]  ;;  %v6531_v59 = vld [vmem:[#allocation5 + $0x640] sm:$0xf0]  ;;  %v6356_v0 = vld [vmem:[#allocation5 + $0xc8] sm:$0xf0]  ;;  %v5659_v6 = vor.u32 %v6454_v3, %v5658_v2 }
 0x2fc   :  { %v2185_v35 = vadd.f32 %v2177_v18, %v2171_v29  ;;  %v2186_v38 = vadd.f32 %v2178_v19, %v2172_v30  ;;  %v2187_v39 = vadd.f32 %v2179_v20, %v2173_v14  ;;  %v2188_v40 = vadd.f32 %v2180_v58, %v2174_v32  ;;  %v6363_v18 = vld [vmem:[#allocation5 + $0x100] sm:$0xf0]  ;;  %v5518_v58 = vld [vmem:[#allocation5 + $0x2a8] sm:$0xf]  ;;  %v5490_v14 = vld [vmem:[#allocation5 + $0x270] sm:$0xf] }
 0x2fd   :  { %v5771_v19 = vor.u32 %v6482_v10, %v5770_v44  ;;  %v5995_v20 = vor.u32 %v6538_v12, %v5994_v11  ;;  %v5295_v27 = vor.u32 %v6363_v18, %v5294_v16  ;;  %v5519_v28 = vor.u32 %v6419_v21, %v5518_v58  ;;  %v6412_v32 = vld [vmem:[#allocation5 + $0x288] sm:$0xf0]  ;;  %v5882_v4 = vld [vmem:[#allocation5 + $0x580] sm:$0xf]  ;;  %v5630_v44 = vld [vmem:[#allocation5 + $0x388] sm:$0xf] }
 0x2fe   :  { %v2189_v50 = vmax.f32 %v2185_v35, 0.0  ;;  %v2190_v43 = vmax.f32 %v2186_v38, 0.0  ;;  %v2191_v51 = vmax.f32 %v2187_v39, 0.0  ;;  %v2192_v52 = vmax.f32 %v2188_v40, 0.0  ;;  %v6468_v35 = vld [vmem:[#allocation5 + $0x448] sm:$0xf0] }
 0x2ff   :  { %v5743_v29 = vor.u32 %v6475_v24, %v5742_v22  ;;  %v5967_v30 = vor.u32 %v6531_v59, %v5966_v26  ;;  %v5938_v38 = vld [vmem:[#allocation5 + $0x5f0] sm:$0xf]  ;;  %v6524_v39 = vld [vmem:[#allocation5 + $0x608] sm:$0xf0]  ;;  %v5267_v40 = vor.u32 %v6356_v0, %v5266_v23  ;;  %v5491_v41 = vor.u32 %v6412_v32, %v5490_v14  ;;  %v6447_v10 = vld [vmem:[#allocation5 + $0x3a0] sm:$0xf0] }
 0x300   :  { %v6970_v25 = vpack.c.bf16 %v2189_v50, %v2189_v50  ;;  %v6972_v56 = vpack.c.bf16 %v2190_v43, %v2190_v43  ;;  %v6974_v57 = vpack.c.bf16 %v2191_v51, %v2191_v51  ;;  %v6976_v8 = vpack.c.bf16 %v2192_v52, %v2192_v52  ;;  %v6405_v50 = vld [vmem:[#allocation5 + $0x250] sm:$0xf0]  ;;  %v5686_v43 = vld [vmem:[#allocation5 + $0x3f8] sm:$0xf]  ;;  %v5854_v11 = vld [vmem:[#allocation5 + $0x548] sm:$0xf] }
 0x301   :  { %v5715_v46 = vor.u32 %v6468_v35, %v5714_v34  ;;  %v5939_v48 = vor.u32 %v6524_v39, %v5938_v38  ;;  %v6461_v51 = vld [vmem:[#allocation5 + $0x410] sm:$0xf0]  ;;  %v5910_v52 = vld [vmem:[#allocation5 + $0x5b8] sm:$0xf]  ;;  %v5883_v7 = vor.u32 %v6510_v17, %v5882_v4  ;;  %v6503_v12 = vld [vmem:[#allocation5 + $0x560] sm:$0xf0]  ;;  %v5631_v26 = vor.u32 %v6447_v10, %v5630_v44 }
 0x302   :  { %3629 = vmatmul.bf16.vlgmr.msra.gmra.mxu0 %v6970_v25  ;;  %3642 = vmatmul.bf16.vlgmr.msra.gmra.mxu1 %v6972_v56  ;;  %v6437_v16 = vld [vmem:[#allocation5 + $0x354] sm:$0xf]  ;;  %v5604_v18 = vld [vmem:[#allocation5 + $0x36c] sm:$0xf0]  ;;  %v5855_v59 = vor.u32 %v6503_v12, %v5854_v11  ;;  %v6374_v23 = vld [vmem:[#allocation5 + $0x15c] sm:$0xf] }
 0x303   :  { %3655 = vmatmul.bf16.vlgmr.msra.gmra.mxu2 %v6974_v57  ;;  %3668 = vmatmul.bf16.vlgmr.msra.gmra.mxu3 %v6976_v8  ;;  %v5828_v21 = vld [vmem:[#allocation5 + $0x52c] sm:$0xf0]  ;;  %v6549_v22 = vld [vmem:[#allocation5 + $0x6d4] sm:$0xf]  ;;  %v5352_v0 = vld [vmem:[#allocation5 + $0x174] sm:$0xf0] }
 0x304   :  { %3725 = vmatpush.bf16.msra.mxu0 %v5379_v54  ;;  %3738 = vmatpush.bf16.msra.mxu1 %v5603_v55  ;;  %v5239_v54 = vor.u32 %v6349_v45, %v5238_v42  ;;  %v5463_v55 = vor.u32 %v6405_v50, %v5462_v49  ;;  %v6052_v24 = vld [vmem:[#allocation5 + $0x6ec] sm:$0xf0]  ;;  %v6430_v14 = vld [vmem:[#allocation5 + $0x31c] sm:$0xf]  ;;  %v5576_v32 = vld [vmem:[#allocation5 + $0x334] sm:$0xf0] }
 0x305   :  { %3751 = vmatpush.bf16.msra.mxu2 %v5827_v61  ;;  %3764 = vmatpush.bf16.msra.mxu3 %v6051_v62  ;;  %v5687_v61 = vor.u32 %v6461_v51, %v5686_v43  ;;  %v5911_v62 = vor.u32 %v6517_v53, %v5910_v52  ;;  %v6486_v34 = vld [vmem:[#allocation5 + $0x4dc] sm:$0xf]  ;;  %v5800_v35 = vld [vmem:[#allocation5 + $0x4f4] sm:$0xf0]  ;;  %v6367_v42 = vld [vmem:[#allocation5 + $0x124] sm:$0xf] }
 0x306   :  { %v6542_v38 = vld [vmem:[#allocation5 + $0x69c] sm:$0xf]  ;;  %v6024_v39 = vld [vmem:[#allocation5 + $0x6b4] sm:$0xf0]  ;;  %v5324_v45 = vld [vmem:[#allocation5 + $0x13c] sm:$0xf0] }
 0x307   :  { %v6423_v49 = vld [vmem:[#allocation5 + $0x2e4] sm:$0xf]  ;;  %v5548_v50 = vld [vmem:[#allocation5 + $0x2fc] sm:$0xf0]  ;;  %v6416_v63 = vld [vmem:[#allocation5 + $0x2ac] sm:$0xf] }
 0x308   :  { %3726 = vmatpush.bf16.msra.mxu0 %v5351_v5  ;;  %3739 = vmatpush.bf16.msra.mxu1 %v5575_v31  ;;  %v5182_v5 = vld [vmem:[#allocation5 + $0x8] sm:$0xf]  ;;  %v5211_v31 = vor.u32 %v6342_v9, %v5210_v60  ;;  %v6479_v43 = vld [vmem:[#allocation5 + $0x4a4] sm:$0xf]  ;;  %v5772_v51 = vld [vmem:[#allocation5 + $0x4bc] sm:$0xf0] }
 0x309   :  { %3752 = vmatpush.bf16.msra.mxu2 %v5799_v37  ;;  %3765 = vmatpush.bf16.msra.mxu3 %v6023_v33  ;;  %v5406_v37 = vld [vmem:[#allocation5 + $0x1c8] sm:$0xf]  ;;  %v6391_v33 = vld [vmem:[#allocation5 + $0x1e0] sm:$0xf0]  ;;  %v5996_v53 = vld [vmem:[#allocation5 + $0x67c] sm:$0xf0] }
 0x30a   :  { %v5407_v58 = vor.u32 %v6391_v33, %v5406_v37  ;;  %v6535_v52 = vld [vmem:[#allocation5 + $0x664] sm:$0xf]  ;;  %v6360_v60 = vld [vmem:[#allocation5 + $0xec] sm:$0xf]  ;;  %v5296_v9 = vld [vmem:[#allocation5 + $0x104] sm:$0xf0] }
 0x30b   :  { %v5520_v1 = vld [vmem:[#allocation5 + $0x2c4] sm:$0xf0]  ;;  %v6472_v2 = vld [vmem:[#allocation5 + $0x46c] sm:$0xf]  ;;  %v6465_v44 = vld [vmem:[#allocation5 + $0x434] sm:$0xf] }
 0x30c   :  { %3727 = vmatpush.bf16.msra.mxu0 %v5323_v47  ;;  %3740 = vmatpush.bf16.msra.mxu1 %v5547_v13  ;;  %v6381_v47 = vld [vmem:[#allocation5 + $0x194] sm:$0xf]  ;;  %v5380_v13 = vld [vmem:[#allocation5 + $0x1ac] sm:$0xf0]  ;;  %v5744_v3 = vld [vmem:[#allocation5 + $0x484] sm:$0xf0] }
 0x30d   :  { %3753 = vmatpush.bf16.msra.mxu2 %v5771_v19  ;;  %3766 = vmatpush.bf16.msra.mxu3 %v5995_v20  ;;  %v6493_v19 = vld [vmem:[#allocation5 + $0x514] sm:$0xf]  ;;  %v5183_v20 = vor.u32 %v6335_v36, %v5182_v5  ;;  %v6528_v4 = vld [vmem:[#allocation5 + $0x62c] sm:$0xf]  ;;  %v5968_v17 = vld [vmem:[#allocation5 + $0x644] sm:$0xf0]  ;;  %v5299_v5 = vor.u32 %v6360_v60, %v5296_v9  ;;  %v5747_v37 = vor.u32 %v6472_v2, %v5744_v3 }
 0x30e   :  { %v5268_v36 = vld [vmem:[#allocation5 + $0xcc] sm:$0xf0]  ;;  %v5971_v33 = vor.u32 %v6528_v4, %v5968_v17  ;;  %v6521_v11 = vld [vmem:[#allocation5 + $0x5f4] sm:$0xf]  ;;  %v5610_v60 = vld [vmem:[#allocation5 + $0x358] sm:$0xf] }
 0x30f   :  { %v5716_v10 = vld [vmem:[#allocation5 + $0x44c] sm:$0xf0]  ;;  %v6441_v9 = vld [vmem:[#allocation5 + $0x370] sm:$0xf0]  ;;  %v6058_v2 = vld [vmem:[#allocation5 + $0x6d8] sm:$0xf] }
 0x310   :  { %3728 = vmatpush.bf16.msra.mxu0 %v5295_v27  ;;  %3741 = vmatpush.bf16.msra.mxu1 %v5519_v28  ;;  %v5383_v27 = vor.u32 %v6381_v47, %v5380_v13  ;;  %v5607_v28 = vor.u32 %v6437_v16, %v5604_v18  ;;  %v5940_v12 = vld [vmem:[#allocation5 + $0x60c] sm:$0xf0]  ;;  %v6346_v16 = vld [vmem:[#allocation5 + $0x7c] sm:$0xf]  ;;  %v5240_v18 = vld [vmem:[#allocation5 + $0x94] sm:$0xf0] }
 0x311   :  { %3754 = vmatpush.bf16.msra.mxu2 %v5743_v29  ;;  %3767 = vmatpush.bf16.msra.mxu3 %v5967_v30  ;;  %v5831_v29 = vor.u32 %v6493_v19, %v5828_v21  ;;  %v6055_v30 = vor.u32 %v6549_v22, %v6052_v24  ;;  %v5719_v19 = vor.u32 %v6465_v44, %v5716_v10  ;;  %v5464_v21 = vld [vmem:[#allocation5 + $0x254] sm:$0xf0]  ;;  %v6458_v22 = vld [vmem:[#allocation5 + $0x3fc] sm:$0xf]  ;;  %v6553_v3 = vld [vmem:[#allocation5 + $0x6f0] sm:$0xf0] }
 0x312   :  { %3681 = vmatmul.bf16.vlgmr.msrb.gmra.mxu0 %v6970_v25  ;;  %3694 = vmatmul.bf16.vlgmr.msrb.gmra.mxu1 %v6972_v56  ;;  %v5688_v24 = vld [vmem:[#allocation5 + $0x414] sm:$0xf0]  ;;  %v5806_v44 = vld [vmem:[#allocation5 + $0x4e0] sm:$0xf]  ;;  %v6490_v10 = vld [vmem:[#allocation5 + $0x4f8] sm:$0xf0] }
 0x313   :  { %3707 = vmatmul.bf16.vlgmr.msrb.gmra.mxu2 %v6974_v57  ;;  %3720 = vmatmul.bf16.vlgmr.msrb.gmra.mxu3 %v6976_v8 }
 0x314   :  { %3729 = vmatpush.bf16.msra.mxu0 %v5267_v40  ;;  %3742 = vmatpush.bf16.msra.mxu1 %v5491_v41  ;;  %v5355_v40 = vor.u32 %v6374_v23, %v5352_v0  ;;  %v5579_v41 = vor.u32 %v6430_v14, %v5576_v32  ;;  %v6339_v23 = vld [vmem:[#allocation5 + $0x44] sm:$0xf]  ;;  %v5212_v0 = vld [vmem:[#allocation5 + $0x5c] sm:$0xf0] }
 0x315   :  { %3755 = vmatpush.bf16.msra.mxu2 %v5715_v46  ;;  %3768 = vmatpush.bf16.msra.mxu3 %v5939_v48  ;;  %v5803_v46 = vor.u32 %v6486_v34, %v5800_v35  ;;  %v6027_v48 = vor.u32 %v6542_v38, %v6024_v39  ;;  %v6395_v14 = vld [vmem:[#allocation5 + $0x204] sm:$0xf]  ;;  %v5436_v32 = vld [vmem:[#allocation5 + $0x21c] sm:$0xf0] }
 0x316   :  { %v6451_v34 = vld [vmem:[#allocation5 + $0x3c4] sm:$0xf]  ;;  %v5660_v35 = vld [vmem:[#allocation5 + $0x3dc] sm:$0xf0] }
 0x317   :  { %v6507_v38 = vld [vmem:[#allocation5 + $0x584] sm:$0xf]  ;;  %v5884_v39 = vld [vmem:[#allocation5 + $0x59c] sm:$0xf0] }
 0x318   :  { %3730 = vmatpush.bf16.msra.mxu0 %v5239_v54  ;;  %3743 = vmatpush.bf16.msra.mxu1 %v5463_v55  ;;  %v5327_v54 = vor.u32 %v6367_v42, %v5324_v45  ;;  %v5551_v55 = vor.u32 %v6423_v49, %v5548_v50  ;;  %v5439_v42 = vor.u32 %v6395_v14, %v5436_v32  ;;  %v5184_v45 = vld [vmem:[#allocation5 + $0x24] sm:$0xf0]  ;;  %v5526_v14 = vld [vmem:[#allocation5 + $0x2b0] sm:$0xf]  ;;  %v6420_v32 = vld [vmem:[#allocation5 + $0x2c8] sm:$0xf0] }
 0x319   :  { %3756 = vmatpush.bf16.msra.mxu2 %v5687_v61  ;;  %3769 = vmatpush.bf16.msra.mxu3 %v5911_v62  ;;  %v5775_v61 = vor.u32 %v6479_v43, %v5772_v51  ;;  %v5999_v62 = vor.u32 %v6535_v52, %v5996_v53  ;;  %v5663_v49 = vor.u32 %v6451_v34, %v5660_v35  ;;  %v6444_v43 = vld [vmem:[#allocation5 + $0x38c] sm:$0xf]  ;;  %v5632_v51 = vld [vmem:[#allocation5 + $0x3a4] sm:$0xf0]  ;;  %v5750_v34 = vld [vmem:[#allocation5 + $0x470] sm:$0xf] }
 0x31a   :  { %v5887_v50 = vor.u32 %v6507_v38, %v5884_v39  ;;  %v6500_v52 = vld [vmem:[#allocation5 + $0x54c] sm:$0xf]  ;;  %v5856_v53 = vld [vmem:[#allocation5 + $0x564] sm:$0xf0]  ;;  %v5635_v4 = vor.u32 %v6444_v43, %v5632_v51  ;;  %v5974_v38 = vld [vmem:[#allocation5 + $0x630] sm:$0xf] }
 0x31b   :  { %v5859_v17 = vor.u32 %v6500_v52, %v5856_v53  ;;  %v6476_v35 = vld [vmem:[#allocation5 + $0x488] sm:$0xf0]  ;;  %v5722_v43 = vld [vmem:[#allocation5 + $0x438] sm:$0xf]  ;;  %v6469_v51 = vld [vmem:[#allocation5 + $0x450] sm:$0xf0] }
 0x31c   :  { %3731 = vmatpush.bf16.msra.mxu0 %v5211_v31  ;;  %3744 = vmatpush.bf16.msra.mxu1 %v5435_v15  ;;  %v5523_v31 = vor.u32 %v6416_v63, %v5520_v1  ;;  %v6353_v15 = vld [vmem:[#allocation5 + $0xb4] sm:$0xf]  ;;  %v6532_v39 = vld [vmem:[#allocation5 + $0x648] sm:$0xf0]  ;;  %v5946_v52 = vld [vmem:[#allocation5 + $0x5f8] sm:$0xf] }
 0x31d   :  { %3757 = vmatpush.bf16.msra.mxu2 %v5659_v6  ;;  %3770 = vmatpush.bf16.msra.mxu3 %v5883_v7  ;;  %v6409_v6 = vld [vmem:[#allocation5 + $0x274] sm:$0xf]  ;;  %v5492_v7 = vld [vmem:[#allocation5 + $0x28c] sm:$0xf0]  ;;  %v5271_v47 = vor.u32 %v6353_v15, %v5268_v36  ;;  %v5358_v15 = vld [vmem:[#allocation5 + $0x160] sm:$0xf] }
 0x31e   :  { %v5495_v13 = vor.u32 %v6409_v6, %v5492_v7  ;;  %v6497_v1 = vld [vmem:[#allocation5 + $0x530] sm:$0xf0]  ;;  %v6378_v36 = vld [vmem:[#allocation5 + $0x178] sm:$0xf0]  ;;  %v5582_v6 = vld [vmem:[#allocation5 + $0x320] sm:$0xf] }
 0x31f   :  { %v6434_v7 = vld [vmem:[#allocation5 + $0x338] sm:$0xf0]  ;;  %v6525_v53 = vld [vmem:[#allocation5 + $0x610] sm:$0xf0] }
 0x320   :  { %3732 = vmatpush.bf16.msra.mxu0 %v5183_v20  ;;  %3745 = vmatpush.bf16.msra.mxu1 %v5407_v58  ;;  %v5943_v20 = vor.u32 %v6521_v11, %v5940_v12  ;;  %v6402_v58 = vld [vmem:[#allocation5 + $0x23c] sm:$0xf]  ;;  %v6030_v11 = vld [vmem:[#allocation5 + $0x6a0] sm:$0xf] }
 0x321   :  { %3758 = vmatpush.bf16.msra.mxu2 %v5631_v26  ;;  %3771 = vmatpush.bf16.msra.mxu3 %v5855_v59  ;;  %v6514_v26 = vld [vmem:[#allocation5 + $0x5bc] sm:$0xf]  ;;  %v5912_v59 = vld [vmem:[#allocation5 + $0x5d4] sm:$0xf0] }
 0x322   :  { %v6546_v12 = vld [vmem:[#allocation5 + $0x6b8] sm:$0xf0] }
 0x323   :  { %3733 = vmatmul.bf16.vlgmr.msra.gmra.mxu0 %v6970_v25  ;;  %3746 = vmatmul.bf16.vlgmr.msra.gmra.mxu1 %v6972_v56 }
 0x324   :  { %3777 = vmatpush.bf16.msrb.mxu0 %v5383_v27  ;;  %3790 = vmatpush.bf16.msrb.mxu1 %v5607_v28  ;;  %v5243_v27 = vor.u32 %v6346_v16, %v5240_v18  ;;  %v5467_v28 = vor.u32 %v6402_v58, %v5464_v21  ;;  %v5330_v16 = vld [vmem:[#allocation5 + $0x128] sm:$0xf]  ;;  %v6371_v18 = vld [vmem:[#allocation5 + $0x140] sm:$0xf0] }
 0x325   :  { %3803 = vmatpush.bf16.msrb.mxu2 %v5831_v29  ;;  %3816 = vmatpush.bf16.msrb.mxu3 %v6055_v30  ;;  %v5691_v29 = vor.u32 %v6458_v22, %v5688_v24  ;;  %v5915_v30 = vor.u32 %v6514_v26, %v5912_v59  ;;  %v5554_v58 = vld [vmem:[#allocation5 + $0x2e8] sm:$0xf]  ;;  %v6427_v21 = vld [vmem:[#allocation5 + $0x300] sm:$0xf0] }
 0x326   :  { %3759 = vmatmul.bf16.vlgmr.msra.gmra.mxu2 %v6974_v57  ;;  %3772 = vmatmul.bf16.vlgmr.msra.gmra.mxu3 %v6976_v8  ;;  %v5778_v22 = vld [vmem:[#allocation5 + $0x4a8] sm:$0xf]  ;;  %v6483_v24 = vld [vmem:[#allocation5 + $0x4c0] sm:$0xf0] }
 0x327   :  { %v6002_v26 = vld [vmem:[#allocation5 + $0x668] sm:$0xf]  ;;  %v6539_v59 = vld [vmem:[#allocation5 + $0x680] sm:$0xf0] }
 0x328   :  { %3778 = vmatpush.bf16.msrb.mxu0 %v5355_v40  ;;  %3791 = vmatpush.bf16.msrb.mxu1 %v5579_v41  ;;  %v6332_v40 = vld [vmem:[#allocation5 + $0xc] sm:$0xf]  ;;  %v5215_v41 = vor.u32 %v6339_v23, %v5212_v0  ;;  %v5302_v23 = vld [vmem:[#allocation5 + $0xf0] sm:$0xf] }
 0x329   :  { %3804 = vmatpush.bf16.msrb.mxu2 %v5803_v46  ;;  %3817 = vmatpush.bf16.msrb.mxu3 %v6027_v48  ;;  %v6388_v46 = vld [vmem:[#allocation5 + $0x1cc] sm:$0xf]  ;;  %v5408_v48 = vld [vmem:[#allocation5 + $0x1e4] sm:$0xf0] }
 0x32a   :  { %v5411_v63 = vor.u32 %v6388_v46, %v5408_v48  ;;  %v6364_v0 = vld [vmem:[#allocation5 + $0x108] sm:$0xf0]  ;;  %v5751_v46 = vor.u32 %v6476_v35, %v5750_v34  ;;  %v5975_v48 = vor.u32 %v6532_v39, %v5974_v38  ;;  %v6550_v34 = vld [vmem:[#allocation5 + $0x6dc] sm:$0xf]  ;;  %v6060_v35 = vld [vmem:[#allocation5 + $0x6f4] sm:$0xf0] }
 0x32c   :  { %3779 = vmatpush.bf16.msrb.mxu0 %v5327_v54  ;;  %3792 = vmatpush.bf16.msrb.mxu1 %v5551_v55  ;;  %v5386_v54 = vld [vmem:[#allocation5 + $0x198] sm:$0xf]  ;;  %v6385_v55 = vld [vmem:[#allocation5 + $0x1b0] sm:$0xf0] }
 0x32d   :  { %3805 = vmatpush.bf16.msrb.mxu2 %v5775_v61  ;;  %3818 = vmatpush.bf16.msrb.mxu3 %v5999_v62  ;;  %v5834_v61 = vld [vmem:[#allocation5 + $0x518] sm:$0xf]  ;;  %v5187_v62 = vor.u32 %v6332_v40, %v5184_v45  ;;  %v5303_v40 = vor.u32 %v6364_v0, %v5302_v23  ;;  %v6357_v45 = vld [vmem:[#allocation5 + $0xd0] sm:$0xf0]  ;;  %v6438_v23 = vld [vmem:[#allocation5 + $0x35c] sm:$0xf] }
 0x32e   :  { %v5612_v0 = vld [vmem:[#allocation5 + $0x374] sm:$0xf0] }
 0x330   :  { %3780 = vmatpush.bf16.msrb.mxu0 %v5299_v5  ;;  %3793 = vmatpush.bf16.msrb.mxu1 %v5523_v31  ;;  %v5387_v5 = vor.u32 %v6385_v55, %v5386_v54  ;;  %v5611_v31 = vor.u32 %v6441_v9, %v5610_v60  ;;  %v5246_v60 = vld [vmem:[#allocation5 + $0x80] sm:$0xf]  ;;  %v6350_v9 = vld [vmem:[#allocation5 + $0x98] sm:$0xf0] }
 0x331   :  { %3806 = vmatpush.bf16.msrb.mxu2 %v5747_v37  ;;  %3819 = vmatpush.bf16.msrb.mxu3 %v5971_v33  ;;  %v5835_v37 = vor.u32 %v6497_v1, %v5834_v61  ;;  %v6059_v33 = vor.u32 %v6553_v3, %v6058_v2  ;;  %v5723_v61 = vor.u32 %v6469_v51, %v5722_v43  ;;  %v6406_v1 = vld [vmem:[#allocation5 + $0x258] sm:$0xf0]  ;;  %v5694_v2 = vld [vmem:[#allocation5 + $0x400] sm:$0xf]  ;;  %v6487_v43 = vld [vmem:[#allocation5 + $0x4e4] sm:$0xf] }
 0x332   :  { %v6462_v3 = vld [vmem:[#allocation5 + $0x418] sm:$0xf0]  ;;  %v5808_v51 = vld [vmem:[#allocation5 + $0x4fc] sm:$0xf0] }
 0x334   :  { %3781 = vmatpush.bf16.msrb.mxu0 %v5271_v47  ;;  %3794 = vmatpush.bf16.msrb.mxu1 %v5495_v13  ;;  %v5359_v47 = vor.u32 %v6378_v36, %v5358_v15  ;;  %v5583_v13 = vor.u32 %v6434_v7, %v5582_v6  ;;  %v5218_v15 = vld [vmem:[#allocation5 + $0x48] sm:$0xf]  ;;  %v6343_v36 = vld [vmem:[#allocation5 + $0x60] sm:$0xf0] }
 0x335   :  { %3807 = vmatpush.bf16.msrb.mxu2 %v5719_v19  ;;  %3820 = vmatpush.bf16.msrb.mxu3 %v5943_v20  ;;  %v5807_v19 = vor.u32 %v6490_v10, %v5806_v44  ;;  %v6031_v20 = vor.u32 %v6546_v12, %v6030_v11  ;;  %v5442_v6 = vld [vmem:[#allocation5 + $0x208] sm:$0xf]  ;;  %v6399_v7 = vld [vmem:[#allocation5 + $0x220] sm:$0xf0] }
 0x336   :  { %v5666_v44 = vld [vmem:[#allocation5 + $0x3c8] sm:$0xf]  ;;  %v6455_v10 = vld [vmem:[#allocation5 + $0x3e0] sm:$0xf0] }
 0x337   :  { %v5890_v11 = vld [vmem:[#allocation5 + $0x588] sm:$0xf]  ;;  %v6511_v12 = vld [vmem:[#allocation5 + $0x5a0] sm:$0xf0] }
 0x338   :  { %3782 = vmatpush.bf16.msrb.mxu0 %v5243_v27  ;;  %3795 = vmatpush.bf16.msrb.mxu1 %v5467_v28  ;;  %v5331_v27 = vor.u32 %v6371_v18, %v5330_v16  ;;  %v5555_v28 = vor.u32 %v6427_v21, %v5554_v58  ;;  %v5443_v16 = vor.u32 %v6399_v7, %v5442_v6  ;;  %v6336_v18 = vld [vmem:[#allocation5 + $0x28] sm:$0xf0]  ;;  %v6417_v6 = vld [vmem:[#allocation5 + $0x2b4] sm:$0xf]  ;;  %v5528_v7 = vld [vmem:[#allocation5 + $0x2cc] sm:$0xf0] }
 0x339   :  { %3808 = vmatpush.bf16.msrb.mxu2 %v5691_v29  ;;  %3821 = vmatpush.bf16.msrb.mxu3 %v5915_v30  ;;  %v5779_v29 = vor.u32 %v6483_v24, %v5778_v22  ;;  %v6003_v30 = vor.u32 %v6539_v59, %v6002_v26  ;;  %v5667_v58 = vor.u32 %v6455_v10, %v5666_v44  ;;  %v5638_v22 = vld [vmem:[#allocation5 + $0x390] sm:$0xf]  ;;  %v6448_v24 = vld [vmem:[#allocation5 + $0x3a8] sm:$0xf0]  ;;  %v6473_v44 = vld [vmem:[#allocation5 + $0x474] sm:$0xf] }
 0x33a   :  { %v5891_v21 = vor.u32 %v6511_v12, %v5890_v11  ;;  %v5862_v26 = vld [vmem:[#allocation5 + $0x550] sm:$0xf]  ;;  %v6504_v59 = vld [vmem:[#allocation5 + $0x568] sm:$0xf0]  ;;  %v5639_v38 = vor.u32 %v6448_v24, %v5638_v22  ;;  %v6529_v11 = vld [vmem:[#allocation5 + $0x634] sm:$0xf] }
 0x33b   :  { %v5863_v39 = vor.u32 %v6504_v59, %v5862_v26  ;;  %v5752_v10 = vld [vmem:[#allocation5 + $0x48c] sm:$0xf0]  ;;  %v6466_v22 = vld [vmem:[#allocation5 + $0x43c] sm:$0xf]  ;;  %v5724_v24 = vld [vmem:[#allocation5 + $0x454] sm:$0xf0] }
 0x33c   :  { %3783 = vmatpush.bf16.msrb.mxu0 %v5215_v41  ;;  %3796 = vmatpush.bf16.msrb.mxu1 %v5439_v42  ;;  %v5527_v41 = vor.u32 %v6420_v32, %v5526_v14  ;;  %v5274_v42 = vld [vmem:[#allocation5 + $0xb8] sm:$0xf]  ;;  %v5976_v12 = vld [vmem:[#allocation5 + $0x64c] sm:$0xf0]  ;;  %v6522_v26 = vld [vmem:[#allocation5 + $0x5fc] sm:$0xf] }
 0x33d   :  { %3809 = vmatpush.bf16.msrb.mxu2 %v5663_v49  ;;  %3822 = vmatpush.bf16.msrb.mxu3 %v5887_v50  ;;  %v5498_v49 = vld [vmem:[#allocation5 + $0x278] sm:$0xf]  ;;  %v6413_v50 = vld [vmem:[#allocation5 + $0x290] sm:$0xf0]  ;;  %v5275_v54 = vor.u32 %v6357_v45, %v5274_v42  ;;  %v6375_v42 = vld [vmem:[#allocation5 + $0x164] sm:$0xf] }
 0x33e   :  { %v5499_v55 = vor.u32 %v6413_v50, %v5498_v49  ;;  %v5836_v32 = vld [vmem:[#allocation5 + $0x534] sm:$0xf0]  ;;  %v5360_v45 = vld [vmem:[#allocation5 + $0x17c] sm:$0xf0]  ;;  %v6431_v49 = vld [vmem:[#allocation5 + $0x324] sm:$0xf] }
 0x33f   :  { %v5584_v50 = vld [vmem:[#allocation5 + $0x33c] sm:$0xf0]  ;;  %v5948_v59 = vld [vmem:[#allocation5 + $0x614] sm:$0xf0] }
 0x340   :  { %3784 = vmatpush.bf16.msrb.mxu0 %v5187_v62  ;;  %3797 = vmatpush.bf16.msrb.mxu1 %v5411_v63  ;;  %v5947_v62 = vor.u32 %v6525_v53, %v5946_v52  ;;  %v5470_v63 = vld [vmem:[#allocation5 + $0x240] sm:$0xf]  ;;  %v6543_v52 = vld [vmem:[#allocation5 + $0x6a4] sm:$0xf] }
 0x341   :  { %3810 = vmatpush.bf16.msrb.mxu2 %v5635_v4  ;;  %3823 = vmatpush.bf16.msrb.mxu3 %v5859_v17  ;;  %v5918_v4 = vld [vmem:[#allocation5 + $0x5c0] sm:$0xf]  ;;  %v6518_v17 = vld [vmem:[#allocation5 + $0x5d8] sm:$0xf0] }
 0x342   :  { %v6032_v53 = vld [vmem:[#allocation5 + $0x6bc] sm:$0xf0] }
 0x343   :  { %3785 = vmatmul.bf16.vlgmr.msrb.gmra.mxu0 %v6970_v25  ;;  %3798 = vmatmul.bf16.vlgmr.msrb.gmra.mxu1 %v6972_v56 }
 0x344   :  { %3829 = vmatpush.bf16.msra.mxu0 %v5387_v5  ;;  %3842 = vmatpush.bf16.msra.mxu1 %v5611_v31  ;;  %v5247_v5 = vor.u32 %v6350_v9, %v5246_v60  ;;  %v5471_v31 = vor.u32 %v6406_v1, %v5470_v63  ;;  %v6368_v60 = vld [vmem:[#allocation5 + $0x12c] sm:$0xf]  ;;  %v5332_v9 = vld [vmem:[#allocation5 + $0x144] sm:$0xf0] }
 0x345   :  { %3855 = vmatpush.bf16.msra.mxu2 %v5835_v37  ;;  %3868 = vmatpush.bf16.msra.mxu3 %v6059_v33  ;;  %v5695_v37 = vor.u32 %v6462_v3, %v5694_v2  ;;  %v5919_v33 = vor.u32 %v6518_v17, %v5918_v4  ;;  %v6424_v63 = vld [vmem:[#allocation5 + $0x2ec] sm:$0xf]  ;;  %v5556_v1 = vld [vmem:[#allocation5 + $0x304] sm:$0xf0] }
 0x346   :  { %3811 = vmatmul.bf16.vlgmr.msrb.gmra.mxu2 %v6974_v57  ;;  %3824 = vmatmul.bf16.vlgmr.msrb.gmra.mxu3 %v6976_v8  ;;  %v6480_v2 = vld [vmem:[#allocation5 + $0x4ac] sm:$0xf]  ;;  %v5780_v3 = vld [vmem:[#allocation5 + $0x4c4] sm:$0xf0] }
 0x347   :  { %v6536_v4 = vld [vmem:[#allocation5 + $0x66c] sm:$0xf]  ;;  %v6004_v17 = vld [vmem:[#allocation5 + $0x684] sm:$0xf0] }
 0x348   :  { %3830 = vmatpush.bf16.msra.mxu0 %v5359_v47  ;;  %3843 = vmatpush.bf16.msra.mxu1 %v5583_v13  ;;  %v5190_v47 = vld [vmem:[#allocation5 + $0x10] sm:$0xf]  ;;  %v5219_v13 = vor.u32 %v6343_v36, %v5218_v15  ;;  %v6361_v15 = vld [vmem:[#allocation5 + $0xf4] sm:$0xf] }
 0x349   :  { %3856 = vmatpush.bf16.msra.mxu2 %v5807_v19  ;;  %3869 = vmatpush.bf16.msra.mxu3 %v6031_v20  ;;  %v5414_v19 = vld [vmem:[#allocation5 + $0x1d0] sm:$0xf]  ;;  %v6392_v20 = vld [vmem:[#allocation5 + $0x1e8] sm:$0xf0] }
 0x34a   :  { %v5415_v14 = vor.u32 %v6392_v20, %v5414_v19  ;;  %v5304_v36 = vld [vmem:[#allocation5 + $0x10c] sm:$0xf0]  ;;  %v5755_v19 = vor.u32 %v6473_v44, %v5752_v10  ;;  %v5979_v20 = vor.u32 %v6529_v11, %v5976_v12  ;;  %v6066_v44 = vld [vmem:[#allocation5 + $0x6e0] sm:$0xf]  ;;  %v6554_v10 = vld [vmem:[#allocation5 + $0x6f8] sm:$0xf0] }
 0x34c   :  { %3831 = vmatpush.bf16.msra.mxu0 %v5331_v27  ;;  %3844 = vmatpush.bf16.msra.mxu1 %v5555_v28  ;;  %v6382_v27 = vld [vmem:[#allocation5 + $0x19c] sm:$0xf]  ;;  %v5388_v28 = vld [vmem:[#allocation5 + $0x1b4] sm:$0xf0] }
 0x34d   :  { %3857 = vmatpush.bf16.msra.mxu2 %v5779_v29  ;;  %3870 = vmatpush.bf16.msra.mxu3 %v6003_v30  ;;  %v6494_v29 = vld [vmem:[#allocation5 + $0x51c] sm:$0xf]  ;;  %v5191_v30 = vor.u32 %v6336_v18, %v5190_v47  ;;  %v5307_v47 = vor.u32 %v6361_v15, %v5304_v36  ;;  %v5276_v18 = vld [vmem:[#allocation5 + $0xd4] sm:$0xf0]  ;;  %v5618_v15 = vld [vmem:[#allocation5 + $0x360] sm:$0xf] }
 0x34e   :  { %v6442_v36 = vld [vmem:[#allocation5 + $0x378] sm:$0xf0] }
 0x350   :  { %3832 = vmatpush.bf16.msra.mxu0 %v5303_v40  ;;  %3845 = vmatpush.bf16.msra.mxu1 %v5527_v41  ;;  %v5391_v40 = vor.u32 %v6382_v27, %v5388_v28  ;;  %v5615_v41 = vor.u32 %v6438_v23, %v5612_v0  ;;  %v6347_v23 = vld [vmem:[#allocation5 + $0x84] sm:$0xf]  ;;  %v5248_v0 = vld [vmem:[#allocation5 + $0x9c] sm:$0xf0] }
 0x351   :  { %3858 = vmatpush.bf16.msra.mxu2 %v5751_v46  ;;  %3871 = vmatpush.bf16.msra.mxu3 %v5975_v48  ;;  %v5839_v46 = vor.u32 %v6494_v29, %v5836_v32  ;;  %v6063_v48 = vor.u32 %v6550_v34, %v6060_v35  ;;  %v5727_v29 = vor.u32 %v6466_v22, %v5724_v24  ;;  %v5472_v32 = vld [vmem:[#allocation5 + $0x25c] sm:$0xf0]  ;;  %v6459_v34 = vld [vmem:[#allocation5 + $0x404] sm:$0xf]  ;;  %v5814_v22 = vld [vmem:[#allocation5 + $0x4e8] sm:$0xf] }
 0x352   :  { %v5696_v35 = vld [vmem:[#allocation5 + $0x41c] sm:$0xf0]  ;;  %v6491_v24 = vld [vmem:[#allocation5 + $0x500] sm:$0xf0] }
 0x354   :  { %3833 = vmatpush.bf16.msra.mxu0 %v5275_v54  ;;  %3846 = vmatpush.bf16.msra.mxu1 %v5499_v55  ;;  %v5363_v54 = vor.u32 %v6375_v42, %v5360_v45  ;;  %v5587_v55 = vor.u32 %v6431_v49, %v5584_v50  ;;  %v6340_v42 = vld [vmem:[#allocation5 + $0x4c] sm:$0xf]  ;;  %v5220_v45 = vld [vmem:[#allocation5 + $0x64] sm:$0xf0] }
 0x355   :  { %3859 = vmatpush.bf16.msra.mxu2 %v5723_v61  ;;  %3872 = vmatpush.bf16.msra.mxu3 %v5947_v62  ;;  %v5811_v61 = vor.u32 %v6487_v43, %v5808_v51  ;;  %v6035_v62 = vor.u32 %v6543_v52, %v6032_v53  ;;  %v6396_v49 = vld [vmem:[#allocation5 + $0x20c] sm:$0xf]  ;;  %v5444_v50 = vld [vmem:[#allocation5 + $0x224] sm:$0xf0] }
 0x356   :  { %v6452_v43 = vld [vmem:[#allocation5 + $0x3cc] sm:$0xf]  ;;  %v5668_v51 = vld [vmem:[#allocation5 + $0x3e4] sm:$0xf0] }
 0x357   :  { %v6508_v52 = vld [vmem:[#allocation5 + $0x58c] sm:$0xf]  ;;  %v5892_v53 = vld [vmem:[#allocation5 + $0x5a4] sm:$0xf0] }
 0x358   :  { %3834 = vmatpush.bf16.msra.mxu0 %v5247_v5  ;;  %3847 = vmatpush.bf16.msra.mxu1 %v5471_v31  ;;  %v5335_v5 = vor.u32 %v6368_v60, %v5332_v9  ;;  %v5559_v31 = vor.u32 %v6424_v63, %v5556_v1  ;;  %v5447_v60 = vor.u32 %v6396_v49, %v5444_v50  ;;  %v5192_v9 = vld [vmem:[#allocation5 + $0x2c] sm:$0xf0]  ;;  %v5310_v49 = vld [vmem:[#allocation5 + $0xf8] sm:$0xf]  ;;  %v6365_v50 = vld [vmem:[#allocation5 + $0x110] sm:$0xf0] }
 0x359   :  { %3860 = vmatpush.bf16.msra.mxu2 %v5695_v37  ;;  %3873 = vmatpush.bf16.msra.mxu3 %v5919_v33  ;;  %v5783_v37 = vor.u32 %v6480_v2, %v5780_v3  ;;  %v6007_v33 = vor.u32 %v6536_v4, %v6004_v17  ;;  %v5671_v63 = vor.u32 %v6452_v43, %v5668_v51  ;;  %v6445_v2 = vld [vmem:[#allocation5 + $0x394] sm:$0xf]  ;;  %v5640_v3 = vld [vmem:[#allocation5 + $0x3ac] sm:$0xf0] }
 0x35a   :  { %v5895_v1 = vor.u32 %v6508_v52, %v5892_v53  ;;  %v6501_v4 = vld [vmem:[#allocation5 + $0x554] sm:$0xf]  ;;  %v5864_v17 = vld [vmem:[#allocation5 + $0x56c] sm:$0xf0]  ;;  %v5643_v11 = vor.u32 %v6445_v2, %v5640_v3  ;;  %v5534_v53 = vld [vmem:[#allocation5 + $0x2b8] sm:$0xf] }
 0x35b   :  { %v5867_v12 = vor.u32 %v6501_v4, %v5864_v17  ;;  %v6358_v2 = vld [vmem:[#allocation5 + $0xd8] sm:$0xf0] }
 0x35c   :  { %3835 = vmatpush.bf16.msra.mxu0 %v5219_v13  ;;  %3848 = vmatpush.bf16.msra.mxu1 %v5443_v16  ;;  %v5531_v13 = vor.u32 %v6417_v6, %v5528_v7  ;;  %v6354_v16 = vld [vmem:[#allocation5 + $0xbc] sm:$0xf] }
 0x35d   :  { %3861 = vmatpush.bf16.msra.mxu2 %v5667_v58  ;;  %3874 = vmatpush.bf16.msra.mxu3 %v5891_v21  ;;  %v6410_v58 = vld [vmem:[#allocation5 + $0x27c] sm:$0xf]  ;;  %v5500_v21 = vld [vmem:[#allocation5 + $0x294] sm:$0xf0]  ;;  %v5279_v27 = vor.u32 %v6354_v16, %v5276_v18  ;;  %v5366_v16 = vld [vmem:[#allocation5 + $0x168] sm:$0xf] }
 0x35e   :  { %v5503_v28 = vor.u32 %v6410_v58, %v5500_v21  ;;  %v6498_v7 = vld [vmem:[#allocation5 + $0x538] sm:$0xf0]  ;;  %v6379_v18 = vld [vmem:[#allocation5 + $0x180] sm:$0xf0]  ;;  %v6067_v58 = vor.u32 %v6554_v10, %v6066_v44 }
 0x35f   :  { %v6435_v21 = vld [vmem:[#allocation5 + $0x340] sm:$0xf0] }
 0x360   :  { %3836 = vmatpush.bf16.msra.mxu0 %v5191_v30  ;;  %3849 = vmatpush.bf16.msra.mxu1 %v5415_v14  ;;  %v5951_v30 = vor.u32 %v6522_v26, %v5948_v59  ;;  %v6403_v14 = vld [vmem:[#allocation5 + $0x244] sm:$0xf]  ;;  %v6038_v26 = vld [vmem:[#allocation5 + $0x6a8] sm:$0xf] }
 0x361   :  { %3862 = vmatpush.bf16.msra.mxu2 %v5639_v38  ;;  %3875 = vmatpush.bf16.msra.mxu3 %v5863_v39  ;;  %v6515_v38 = vld [vmem:[#allocation5 + $0x5c4] sm:$0xf]  ;;  %v5920_v39 = vld [vmem:[#allocation5 + $0x5dc] sm:$0xf0] }
 0x362   :  { %v6547_v59 = vld [vmem:[#allocation5 + $0x6c0] sm:$0xf0] }
 0x363   :  { %3837 = vmatmul.bf16.vlgmr.msra.gmra.mxu0 %v6970_v25  ;;  %3850 = vmatmul.bf16.vlgmr.msra.gmra.mxu1 %v6972_v56 }
 0x364   :  { %3881 = vmatpush.bf16.msrb.mxu0 %v5391_v40  ;;  %3894 = vmatpush.bf16.msrb.mxu1 %v5615_v41  ;;  %v5251_v40 = vor.u32 %v6347_v23, %v5248_v0  ;;  %v5475_v41 = vor.u32 %v6403_v14, %v5472_v32  ;;  %v5338_v0 = vld [vmem:[#allocation5 + $0x130] sm:$0xf]  ;;  %v5815_v14 = vor.u32 %v6491_v24, %v5814_v22  ;;  %v5702_v22 = vld [vmem:[#allocation5 + $0x408] sm:$0xf]  ;;  %v6463_v24 = vld [vmem:[#allocation5 + $0x420] sm:$0xf0] }
 0x365   :  { %3907 = vmatpush.bf16.msrb.mxu2 %v5839_v46  ;;  %3920 = vmatpush.bf16.msrb.mxu3 %v6063_v48  ;;  %v5699_v46 = vor.u32 %v6459_v34, %v5696_v35  ;;  %v5923_v48 = vor.u32 %v6515_v38, %v5920_v39  ;;  %v6039_v32 = vor.u32 %v6547_v59, %v6038_v26  ;;  %v6428_v34 = vld [vmem:[#allocation5 + $0x308] sm:$0xf0]  ;;  %v5786_v35 = vld [vmem:[#allocation5 + $0x4b0] sm:$0xf]  ;;  %v5926_v26 = vld [vmem:[#allocation5 + $0x5c8] sm:$0xf] }
 0x366   :  { %3863 = vmatmul.bf16.vlgmr.msra.gmra.mxu2 %v6974_v57  ;;  %3876 = vmatmul.bf16.vlgmr.msra.gmra.mxu3 %v6976_v8  ;;  %v6484_v39 = vld [vmem:[#allocation5 + $0x4c8] sm:$0xf0]  ;;  %v6519_v59 = vld [vmem:[#allocation5 + $0x5e0] sm:$0xf0] }
 0x367   :  { %v5787_v43 = vor.u32 %v6484_v39, %v5786_v35  ;;  %v6400_v35 = vld [vmem:[#allocation5 + $0x228] sm:$0xf0] }
 0x368   :  { %3882 = vmatpush.bf16.msrb.mxu0 %v5363_v54  ;;  %3895 = vmatpush.bf16.msrb.mxu1 %v5587_v55  ;;  %v6333_v54 = vld [vmem:[#allocation5 + $0x14] sm:$0xf]  ;;  %v5223_v55 = vor.u32 %v6340_v42, %v5220_v45 }
 0x369   :  { %3908 = vmatpush.bf16.msrb.mxu2 %v5811_v61  ;;  %3921 = vmatpush.bf16.msrb.mxu3 %v6035_v62  ;;  %v6389_v61 = vld [vmem:[#allocation5 + $0x1d4] sm:$0xf]  ;;  %v5416_v62 = vld [vmem:[#allocation5 + $0x1ec] sm:$0xf0] }
 0x36a   :  { %v5419_v6 = vor.u32 %v6389_v61, %v5416_v62  ;;  %v6533_v61 = vld [vmem:[#allocation5 + $0x650] sm:$0xf0]  ;;  %v5311_v62 = vor.u32 %v6365_v50, %v5310_v49 }
 0x36c   :  { %3883 = vmatpush.bf16.msrb.mxu0 %v5335_v5  ;;  %3896 = vmatpush.bf16.msrb.mxu1 %v5559_v31  ;;  %v5394_v5 = vld [vmem:[#allocation5 + $0x1a0] sm:$0xf]  ;;  %v6386_v31 = vld [vmem:[#allocation5 + $0x1b8] sm:$0xf0] }
 0x36d   :  { %3909 = vmatpush.bf16.msrb.mxu2 %v5783_v37  ;;  %3922 = vmatpush.bf16.msrb.mxu3 %v6007_v33  ;;  %v5842_v37 = vld [vmem:[#allocation5 + $0x520] sm:$0xf]  ;;  %v5195_v33 = vor.u32 %v6333_v54, %v5192_v9  ;;  %v6421_v54 = vld [vmem:[#allocation5 + $0x2d0] sm:$0xf0]  ;;  %v5982_v9 = vld [vmem:[#allocation5 + $0x638] sm:$0xf] }
 0x36e   :  { %v5983_v17 = vor.u32 %v6533_v61, %v5982_v9  ;;  %v6393_v9 = vld [vmem:[#allocation5 + $0x1f0] sm:$0xf0]  ;;  %v5646_v61 = vld [vmem:[#allocation5 + $0x398] sm:$0xf] }
 0x370   :  { %3884 = vmatpush.bf16.msrb.mxu0 %v5307_v47  ;;  %3897 = vmatpush.bf16.msrb.mxu1 %v5531_v13  ;;  %v5395_v47 = vor.u32 %v6386_v31, %v5394_v5  ;;  %v5619_v13 = vor.u32 %v6442_v36, %v5618_v15  ;;  %v5506_v5 = vld [vmem:[#allocation5 + $0x280] sm:$0xf]  ;;  %v6414_v31 = vld [vmem:[#allocation5 + $0x298] sm:$0xf0] }
 0x371   :  { %3910 = vmatpush.bf16.msrb.mxu2 %v5755_v19  ;;  %3923 = vmatpush.bf16.msrb.mxu3 %v5979_v20  ;;  %v5590_v19 = vld [vmem:[#allocation5 + $0x328] sm:$0xf]  ;;  %v5843_v20 = vor.u32 %v6498_v7, %v5842_v37  ;;  %v5730_v15 = vld [vmem:[#allocation5 + $0x440] sm:$0xf]  ;;  %v6526_v7 = vld [vmem:[#allocation5 + $0x618] sm:$0xf0] }
 0x372   :  { %v5591_v23 = vor.u32 %v6435_v21, %v5590_v19  ;;  %v6407_v21 = vld [vmem:[#allocation5 + $0x260] sm:$0xf0] }
 0x374   :  { %3885 = vmatpush.bf16.msrb.mxu0 %v5279_v27  ;;  %3898 = vmatpush.bf16.msrb.mxu1 %v5503_v28  ;;  %v7001_v27 = vld [vmem:[%s7029_s8] sm:$0xff]  ;;  %v5367_v28 = vor.u32 %v6379_v18, %v5366_v16  ;;  %s6686_s8 = smov [#allocation7]  }
 0x375   :  { %3911 = vmatpush.bf16.msrb.mxu2 %v5727_v29  ;;  %3924 = vmatpush.bf16.msrb.mxu3 %v5951_v30  ;;  %v6372_v29 = vld [vmem:[#allocation5 + $0x148] sm:$0xf0]  ;;  %v5562_v30 = vld [vmem:[#allocation5 + $0x2f0] sm:$0xf]  ;;  %v2455_v38 = vperm.slane %v7001_v27, 0  ;;  %v2456_v39 = vperm.slane %v7001_v27, 1 }
 0x376   :  { %v6351_v16 = vld [vmem:[#allocation5 + $0xa0] sm:$0xf0]  ;;  %s4130_s28 = sshll.u32 %s6686_s8, 4  ;;  %s4131_s28 = int_to_ptr.vmem [resolvable:$true] %s4130_s28 }
 0x378   :  { %3886 = vmatpush.bf16.msrb.mxu0 %v5251_v40  ;;  %3899 = vmatpush.bf16.msrb.mxu1 %v5475_v41  ;;  %v6010_v40 = vld [vmem:[#allocation5 + $0x670] sm:$0xf]  ;;  %v6540_v41 = vld [vmem:[#allocation5 + $0x688] sm:$0xf0] }
 0x379   :  { %3912 = vmatpush.bf16.msrb.mxu2 %v5699_v46  ;;  %3925 = vmatpush.bf16.msrb.mxu3 %v5923_v48  ;;  %v5339_v46 = vor.u32 %v6372_v29, %v5338_v0  ;;  %v5563_v48 = vor.u32 %v6428_v34, %v5562_v30  ;;  %v6011_v51 = vor.u32 %v6540_v41, %v6010_v40  ;;  %v5226_v29 = vld [vmem:[#allocation5 + $0x50] sm:$0xf]  ;;  %v6344_v30 = vld [vmem:[#allocation5 + $0x68] sm:$0xf0] }
 0x37a   :  { %v5927_v34 = vor.u32 %v6519_v59, %v5926_v26  ;;  %v5227_v50 = vor.u32 %v6344_v30, %v5226_v29 }
 0x37c   :  { %3887 = vmatpush.bf16.msrb.mxu0 %v5223_v55  ;;  %3900 = vmatpush.bf16.msrb.mxu1 %v5447_v60  ;;  %v5758_v55 = vld [vmem:[#allocation5 + $0x478] sm:$0xf]  ;;  %v6477_v60 = vld [vmem:[#allocation5 + $0x490] sm:$0xf0] }
 0x37d   :  { %3913 = vmatpush.bf16.msrb.mxu2 %v5671_v63  ;;  %3926 = vmatpush.bf16.msrb.mxu3 %v5895_v1  ;;  %v5535_v63 = vor.u32 %v6421_v54, %v5534_v53  ;;  %v5282_v1 = vld [vmem:[#allocation5 + $0xc0] sm:$0xf]  ;;  %v5759_v4 = vor.u32 %v6477_v60, %v5758_v55  ;;  %v5422_v60 = vld [vmem:[#allocation5 + $0x1d8] sm:$0xf] }
 0x37f   :  { %v3630_v42 = vpop.f32.mrf.mxu0  ;;  %v3643_v45 = vpop.f32.mrf.mxu1 }
 0x380   :  { %3888 = vmatpush.bf16.msrb.mxu0 %v5195_v33  ;;  %3901 = vmatpush.bf16.msrb.mxu1 %v5419_v6  ;;  %v3631_v52 = vadd.f32 %v3630_v42, %v2455_v38  ;;  %v6470_v33 = vld [vmem:[#allocation5 + $0x458] sm:$0xf0]  ;;  %v5954_v6 = vld [vmem:[#allocation5 + $0x600] sm:$0xf]  ;;  %v5674_v38 = vld [vmem:[#allocation5 + $0x3d0] sm:$0xf] }
 0x381   :  { %3914 = vmatpush.bf16.msrb.mxu2 %v5643_v11  ;;  %3927 = vmatpush.bf16.msrb.mxu3 %v5867_v12  ;;  %v5283_v12 = vor.u32 %v6358_v2, %v5282_v1  ;;  %v5731_v19 = vor.u32 %v6470_v33, %v5730_v15  ;;  %v6456_v42 = vld [vmem:[#allocation5 + $0x3e8] sm:$0xf0]  ;;  %v6505_v1 = vld [vmem:[#allocation5 + $0x570] sm:$0xf0] }
 0x382   :  { %v3644_v3 = vadd.f32 %v3643_v45, %v3631_v52  ;;  %v5898_v45 = vld [vmem:[#allocation5 + $0x590] sm:$0xf]  ;;  %v6337_v52 = vld [vmem:[#allocation5 + $0x30] sm:$0xf0]  ;;  %v5675_v53 = vor.u32 %v6456_v42, %v5674_v38 }
 0x383   :  { %3889 = vmatmul.bf16.vlgmr.msrb.gmra.mxu0 %v6970_v25  ;;  %3902 = vmatmul.bf16.vlgmr.msrb.gmra.mxu1 %v6972_v56 }
 0x384   :  { %3933 = vmatpush.bf16.msra.mxu0 %v5395_v47  ;;  %3946 = vmatpush.bf16.msra.mxu1 %v5619_v13  ;;  %v5507_v47 = vor.u32 %v6414_v31, %v5506_v5  ;;  %v5254_v13 = vld [vmem:[#allocation5 + $0x88] sm:$0xf] }
 0x385   :  { %3959 = vmatpush.bf16.msra.mxu2 %v5843_v20  ;;  %3972 = vmatpush.bf16.msra.mxu3 %v6067_v58  ;;  %v5955_v20 = vor.u32 %v6526_v7, %v5954_v6  ;;  %v5478_v58 = vld [vmem:[#allocation5 + $0x248] sm:$0xf] }
 0x386   :  { %3915 = vmatmul.bf16.vlgmr.msrb.gmra.mxu2 %v6974_v57  ;;  %3928 = vmatmul.bf16.vlgmr.msrb.gmra.mxu3 %v6976_v8  ;;  %v3656_v36 = vpop.f32.mrf.mxu2  ;;  %v3669_v37 = vpop.f32.mrf.mxu3  ;;  %v5479_v0 = vor.u32 %v6407_v21, %v5478_v58 }
 0x387   :  { %v3657_v44 = vadd.f32 %v3656_v36, %v3644_v3  ;;  %v3632_v10 = vpop.f32.mrf.mxu0  ;;  %v3645_v11 = vpop.f32.mrf.mxu1 }
 0x388   :  { %3934 = vmatpush.bf16.msra.mxu0 %v5367_v28  ;;  %3947 = vmatpush.bf16.msra.mxu1 %v5591_v23  ;;  %v5255_v23 = vor.u32 %v6351_v16, %v5254_v13 }
 0x389   :  { %3960 = vmatpush.bf16.msra.mxu2 %v5815_v14  ;;  %3973 = vmatpush.bf16.msra.mxu3 %v6039_v32  ;;  %v3670_v18 = vadd.f32 %v3669_v37, %v3657_v44  ;;  %v5450_v14 = vld [vmem:[#allocation5 + $0x210] sm:$0xf]  ;;  %v5703_v32 = vor.u32 %v6463_v24, %v5702_v22 }
 0x38b   :  { %v6068_v28 = vmul.f32 -1.442695, %v3670_v18  ;;  %v2457_v18 = vperm.slane %v7001_v27, 2 }
 0x38c   :  { %3935 = vmatpush.bf16.msra.mxu0 %v5339_v46  ;;  %3948 = vmatpush.bf16.msra.mxu1 %v5563_v48  ;;  %v6512_v46 = vld [vmem:[#allocation5 + $0x5a8] sm:$0xf0] }
 0x38d   :  { %3961 = vmatpush.bf16.msra.mxu2 %v5787_v43  ;;  %3974 = vmatpush.bf16.msra.mxu3 %v6011_v51  ;;  %6571 = vpow2.f32 %v6068_v28  ;;  %v5451_v43 = vor.u32 %v6400_v35, %v5450_v14  ;;  %v5198_v51 = vld [vmem:[#allocation5 + $0x18] sm:$0xf]  ;;  %v5899_v54 = vor.u32 %v6512_v46, %v5898_v45 }
 0x38e   :  { %v3658_v40 = vpop.f32.mrf.mxu2  ;;  %v3671_v41 = vpop.f32.mrf.mxu3 }
 0x38f   :  { %v3682_v48 = vpop.f32.mrf.mxu0  ;;  %v3695_v49 = vpop.f32.mrf.mxu1 }
 0x390   :  { %3936 = vmatpush.bf16.msra.mxu0 %v5311_v62  ;;  %3949 = vmatpush.bf16.msra.mxu1 %v5535_v63  ;;  %v3683_v55 = vadd.f32 %v3682_v48, %v2456_v39  ;;  %v6449_v62 = vld [vmem:[#allocation5 + $0x3b0] sm:$0xf0]  ;;  %v5870_v63 = vld [vmem:[#allocation5 + $0x558] sm:$0xf] }
 0x391   :  { %3962 = vmatpush.bf16.msra.mxu2 %v5759_v4  ;;  %3975 = vmatpush.bf16.msra.mxu3 %v5983_v17  ;;  %v5199_v4 = vor.u32 %v6337_v52, %v5198_v51  ;;  %v5423_v17 = vor.u32 %v6393_v9, %v5422_v60  ;;  %v5647_v31 = vor.u32 %v6449_v62, %v5646_v61 }
 0x392   :  { %v3696_v5 = vadd.f32 %v3695_v49, %v3683_v55  ;;  %v5871_v15 = vor.u32 %v6505_v1, %v5870_v63 }
 0x393   :  { %v6572_v2 = vpop.eup %6571 }
 0x394   :  { %3937 = vmatpush.bf16.msra.mxu0 %v5283_v12  ;;  %3950 = vmatpush.bf16.msra.mxu1 %v5507_v47  ;;  %v4006_v3 = vadd.f32 1.0, %v6572_v2 }
 0x395   :  { %3963 = vmatpush.bf16.msra.mxu2 %v5731_v19  ;;  %3976 = vmatpush.bf16.msra.mxu3 %v5955_v20 }
 0x396   :  { %6573 = vrcp.f32 %v4006_v3  ;;  %v3708_v36 = vpop.f32.mrf.mxu2  ;;  %v3721_v37 = vpop.f32.mrf.mxu3  ;;  %v4024_v19 = vand.u32 2147483648, %v4006_v3  ;;  %v4022_v58 = vand.u32 2147483647, %v4006_v3  ;;  %vm4018_vm1 = vweird.f32 %v4006_v3 }
 0x397   :  { %v3709_v33 = vadd.f32 %v3708_v36, %v3696_v5  ;;  %v3684_v6 = vpop.f32.mrf.mxu0  ;;  %v3697_v7 = vpop.f32.mrf.mxu1 }
 0x398   :  { %3938 = vmatpush.bf16.msra.mxu0 %v5255_v23  ;;  %3951 = vmatpush.bf16.msra.mxu1 %v5479_v0  ;;  %vm4023_vm3 = vcmp.eq.f32.partialorder %v4022_v58, 8.507059e+37 }
 0x399   :  { %3964 = vmatpush.bf16.msra.mxu2 %v5703_v32  ;;  %3977 = vmatpush.bf16.msra.mxu3 %v5927_v34  ;;  %v3722_v44 = vadd.f32 %v3721_v37, %v3709_v33 }
 0x39b   :  { %v6069_v10 = vmul.f32 -1.442695, %v3722_v44 }
 0x39c   :  { %3939 = vmatpush.bf16.msra.mxu0 %v5227_v50  ;;  %3952 = vmatpush.bf16.msra.mxu1 %v5451_v43  ;;  %v6574_v11 = vpop.eup %6573 }
 0x39d   :  { %3965 = vmatpush.bf16.msra.mxu2 %v5675_v53  ;;  %3978 = vmatpush.bf16.msra.mxu3 %v5899_v54  ;;  %v4014_v12 = vmul.f32 %v6574_v11, %v4006_v3  ;;  %6575 = vpow2.f32 %v6069_v10  ;;  %vm4019_vm0 = vweird.f32 %v6574_v11  ;;  %v2458_v53 = vperm.slane %v7001_v27, 3 }
 0x39e   :  { %v3710_v47 = vpop.f32.mrf.mxu2  ;;  %v3723_v13 = vpop.f32.mrf.mxu3  ;;  %vm4020_vm2 = vmor %vm4018_vm1, %vm4019_vm0 }
 0x39f   :  { %v4015_v16 = vsub.f32 1.0, %v4014_v12  ;;  %v2459_v13 = vperm.slane %v7001_v27, 4 }
 0x3a0   :  { %3940 = vmatpush.bf16.msra.mxu0 %v5199_v4  ;;  %3953 = vmatpush.bf16.msra.mxu1 %v5423_v17  ;;  %v3734_v21 = vpop.f32.mrf.mxu0 }
 0x3a1   :  { %3966 = vmatpush.bf16.msra.mxu2 %v5647_v31  ;;  %3979 = vmatpush.bf16.msra.mxu3 %v5871_v15  ;;  %v4016_v20 = vmul.f32 %v6574_v11, %v4015_v16  ;;  %v3735_v24 = vadd.f32 %v3734_v21, %v2457_v18 }
 0x3a3   :  { %3941 = vmatmul.bf16.vlgmr.msra.gmra.mxu0 %v6970_v25  ;;  %3954 = vmatmul.bf16.vlgmr.msra.gmra.mxu1 %v6972_v56  ;;  %v3747_v25 = vpop.f32.mrf.mxu1  ;;  %v6576_v22 = vpop.eup %6575  ;;  %v4017_v56 = vadd.f32 %v6574_v11, %v4016_v20 }
 0x3a4   :  { %3967 = vmatmul.bf16.vlgmr.msra.gmra.mxu2 %v6974_v57  ;;  %3980 = vmatmul.bf16.vlgmr.msra.gmra.mxu3 %v6976_v8  ;;  %v4025_v57 = vor.u32 1.1754944e-38, %v4024_v19  ;;  %v4007_v8 = vadd.f32 1.0, %v6576_v22  ;;  %v3748_v28 = vadd.f32 %v3747_v25, %v3735_v24 }
 0x3a5   :  { %v4021_v26 = vsel %vm4020_vm2, %v6574_v11, %v4017_v56 }
 0x3a6   :  { %v4026_v59 = vsel %vm4023_vm3, %v4025_v57, %v4021_v26  ;;  %6577 = vrcp.f32 %v4007_v8  ;;  %v4039_v40 = vand.u32 2147483648, %v4007_v8  ;;  %v4037_v46 = vand.u32 2147483647, %v4007_v8 }
 0x3a7   :  { %4118 = vst [vmem:[#allocation7] sm:$0xff] %v4026_v59  ;;  %vm4033_vm5 = vweird.f32 %v4007_v8 }
 0x3a8   :  { %v3736_v30 = vpop.f32.mrf.mxu0  ;;  %v4040_v49 = vor.u32 1.1754944e-38, %v4039_v40  ;;  %vm4038_vm7 = vcmp.eq.f32.partialorder %v4037_v46, 8.507059e+37  ;;  %v2460_v40 = vperm.slane %v7001_v27, 5 }
 0x3a9   :  { %v3760_v23 = vpop.f32.mrf.mxu2  ;;  %v3773_v0 = vpop.f32.mrf.mxu3 }
 0x3aa   :  { %v3761_v29 = vadd.f32 %v3760_v23, %v3748_v28 }
 0x3ab   :  { %v3749_v14 = vpop.f32.mrf.mxu1 }
 0x3ac   :  { %v3774_v32 = vadd.f32 %v3773_v0, %v3761_v29  ;;  %v6578_v34 = vpop.eup %6577 }
 0x3ad   :  { %v4029_v35 = vmul.f32 %v6578_v34, %v4007_v8  ;;  %vm4034_vm4 = vweird.f32 %v6578_v34 }
 0x3ae   :  { %v6070_v38 = vmul.f32 -1.442695, %v3774_v32  ;;  %vm4035_vm6 = vmor %vm4033_vm5, %vm4034_vm4 }
 0x3af   :  { %v4030_v39 = vsub.f32 1.0, %v4029_v35 }
 0x3b0   :  { %6579 = vpow2.f32 %v6070_v38 }
 0x3b1   :  { %v3762_v41 = vpop.f32.mrf.mxu2  ;;  %v3775_v42 = vpop.f32.mrf.mxu3  ;;  %v4031_v45 = vmul.f32 %v6578_v34, %v4030_v39 }
 0x3b3   :  { %v4032_v48 = vadd.f32 %v6578_v34, %v4031_v45 }
 0x3b5   :  { %v4036_v43 = vsel %vm4035_vm6, %v6578_v34, %v4032_v48 }
 0x3b6   :  { %v6580_v50 = vpop.eup %6579  ;;  %v4041_v51 = vsel %vm4038_vm7, %v4040_v49, %v4036_v43 }
 0x3b7   :  { %v4008_v52 = vadd.f32 1.0, %v6580_v50  ;;  %4119 = vst [vmem:[#allocation7 + $0x8] sm:$0xff] %v4041_v51 }
 0x3b9   :  { %6581 = vrcp.f32 %v4008_v52  ;;  %v4054_v63 = vand.u32 2147483648, %v4008_v52  ;;  %v4052_v2 = vand.u32 2147483647, %v4008_v52  ;;  %vm4048_vm9 = vweird.f32 %v4008_v52 }
 0x3bb   :  { %v4055_v17 = vor.u32 1.1754944e-38, %v4054_v63  ;;  %vm4053_vm11 = vcmp.eq.f32.partialorder %v4052_v2, 8.507059e+37 }
 0x3bf   :  { %v6582_v54 = vpop.eup %6581 }
 0x3c0   :  { %v4044_v55 = vmul.f32 %v6582_v54, %v4008_v52  ;;  %v3786_v60 = vpop.f32.mrf.mxu0  ;;  %v3799_v9 = vpop.f32.mrf.mxu1  ;;  %vm4049_vm8 = vweird.f32 %v6582_v54 }
 0x3c1   :  { %v3787_v62 = vadd.f32 %v3786_v60, %v2458_v53  ;;  %vm4050_vm10 = vmor %vm4048_vm9, %vm4049_vm8 }
 0x3c2   :  { %v4045_v61 = vsub.f32 1.0, %v4044_v55 }
 0x3c3   :  { %v3800_v4 = vadd.f32 %v3799_v9, %v3787_v62 }
 0x3c4   :  { %v4046_v1 = vmul.f32 %v6582_v54, %v4045_v61 }
 0x3c6   :  { %v4047_v3 = vadd.f32 %v6582_v54, %v4046_v1 }
 0x3c8   :  { %v4051_v15 = vsel %vm4050_vm10, %v6582_v54, %v4047_v3  ;;  %v3788_v37 = vpop.f32.mrf.mxu0  ;;  %v3801_v33 = vpop.f32.mrf.mxu1 }
 0x3c9   :  { %v3812_v5 = vpop.f32.mrf.mxu2  ;;  %v3825_v31 = vpop.f32.mrf.mxu3  ;;  %v4056_v6 = vsel %vm4053_vm11, %v4055_v17, %v4051_v15  ;;  %v2461_v15 = vperm.slane %v7001_v27, 6 }
 0x3ca   :  { %v3813_v36 = vadd.f32 %v3812_v5, %v3800_v4  ;;  %4120 = vst [vmem:[#allocation7 + $0x10] sm:$0xff] %v4056_v6 }
 0x3cc   :  { %v3826_v7 = vadd.f32 %v3825_v31, %v3813_v36 }
 0x3ce   :  { %v6071_v44 = vmul.f32 -1.442695, %v3826_v7 }
 0x3d0   :  { %6583 = vpow2.f32 %v6071_v44 }
 0x3d1   :  { %v3814_v10 = vpop.f32.mrf.mxu2  ;;  %v3827_v11 = vpop.f32.mrf.mxu3 }
 0x3d6   :  { %v6584_v12 = vpop.eup %6583 }
 0x3d7   :  { %v4009_v47 = vadd.f32 1.0, %v6584_v12 }
 0x3d9   :  { %6585 = vrcp.f32 %v4009_v47  ;;  %v4069_v25 = vand.u32 2147483648, %v4009_v47  ;;  %v4067_v56 = vand.u32 2147483647, %v4009_v47  ;;  %vm4063_vm13 = vweird.f32 %v4009_v47 }
 0x3db   :  { %v4070_v8 = vor.u32 1.1754944e-38, %v4069_v25  ;;  %vm4068_vm15 = vcmp.eq.f32.partialorder %v4067_v56, 8.507059e+37 }
 0x3df   :  { %v6586_v16 = vpop.eup %6585 }
 0x3e0   :  { %v4059_v18 = vmul.f32 %v6586_v16, %v4009_v47  ;;  %v3838_v19 = vpop.f32.mrf.mxu0  ;;  %v3851_v20 = vpop.f32.mrf.mxu1  ;;  %vm4064_vm12 = vweird.f32 %v6586_v16 }
 0x3e1   :  { %v3839_v21 = vadd.f32 %v3838_v19, %v2459_v13  ;;  %vm4065_vm14 = vmor %vm4063_vm13, %vm4064_vm12 }
 0x3e2   :  { %v4060_v58 = vsub.f32 1.0, %v4059_v18 }
 0x3e3   :  { %v3852_v57 = vadd.f32 %v3851_v20, %v3839_v21 }
 0x3e4   :  { %v4061_v22 = vmul.f32 %v6586_v16, %v4060_v58 }
 0x3e6   :  { %v4062_v24 = vadd.f32 %v6586_v16, %v4061_v22 }
 0x3e8   :  { %v4066_v28 = vsel %vm4065_vm14, %v6586_v16, %v4062_v24  ;;  %v3840_v0 = vpop.f32.mrf.mxu0  ;;  %v3853_v29 = vpop.f32.mrf.mxu1 }
 0x3e9   :  { %v3864_v26 = vpop.f32.mrf.mxu2  ;;  %v3877_v59 = vpop.f32.mrf.mxu3  ;;  %v4071_v30 = vsel %vm4068_vm15, %v4070_v8, %v4066_v28 }
 0x3ea   :  { %v3865_v23 = vadd.f32 %v3864_v26, %v3852_v57  ;;  %4121 = vst [vmem:[#allocation7 + $0x18] sm:$0xff] %v4071_v30 }
 0x3ec   :  { %v3878_v14 = vadd.f32 %v3877_v59, %v3865_v23 }
 0x3ee   :  { %v6072_v32 = vmul.f32 -1.442695, %v3878_v14 }
 0x3f0   :  { %6587 = vpow2.f32 %v6072_v32 }
 0x3f1   :  { %v3866_v34 = vpop.f32.mrf.mxu2  ;;  %v3879_v35 = vpop.f32.mrf.mxu3 }
 0x3f6   :  { %v6588_v38 = vpop.eup %6587 }
 0x3f7   :  { %v4010_v39 = vadd.f32 1.0, %v6588_v38 }
 0x3f9   :  { %6589 = vrcp.f32 %v4010_v39  ;;  %v4084_v50 = vand.u32 2147483648, %v4010_v39  ;;  %v4082_v51 = vand.u32 2147483647, %v4010_v39  ;;  %vm4078_vm1 = vweird.f32 %v4010_v39 }
 0x3fb   :  { %v4085_v54 = vor.u32 1.1754944e-38, %v4084_v50  ;;  %vm4083_vm3 = vcmp.eq.f32.partialorder %v4082_v51, 8.507059e+37 }
 0x3ff   :  { %v6590_v41 = vpop.eup %6589 }
 0x400   :  { %v4074_v42 = vmul.f32 %v6590_v41, %v4010_v39  ;;  %v3890_v45 = vpop.f32.mrf.mxu0  ;;  %v3903_v46 = vpop.f32.mrf.mxu1  ;;  %vm4079_vm0 = vweird.f32 %v6590_v41 }
 0x401   :  { %v3891_v49 = vadd.f32 %v3890_v45, %v2460_v40  ;;  %vm4080_vm2 = vmor %vm4078_vm1, %vm4079_vm0 }
 0x402   :  { %v4075_v48 = vsub.f32 1.0, %v4074_v42 }
 0x403   :  { %v3904_v53 = vadd.f32 %v3903_v46, %v3891_v49 }
 0x404   :  { %v4076_v43 = vmul.f32 %v6590_v41, %v4075_v48 }
 0x406   :  { %v4077_v52 = vadd.f32 %v6590_v41, %v4076_v43 }
 0x408   :  { %v4081_v9 = vsel %vm4080_vm2, %v6590_v41, %v4077_v52  ;;  %v3892_v62 = vpop.f32.mrf.mxu0  ;;  %v3905_v63 = vpop.f32.mrf.mxu1 }
 0x409   :  { %v3916_v55 = vpop.f32.mrf.mxu2  ;;  %v3929_v60 = vpop.f32.mrf.mxu3  ;;  %v4086_v1 = vsel %vm4083_vm3, %v4085_v54, %v4081_v9 }
 0x40a   :  { %v3917_v61 = vadd.f32 %v3916_v55, %v3904_v53  ;;  %4122 = vst [vmem:[#allocation7 + $0x20] sm:$0xff] %v4086_v1 }
 0x40c   :  { %v3930_v2 = vadd.f32 %v3929_v60, %v3917_v61 }
 0x40e   :  { %v6073_v3 = vmul.f32 -1.442695, %v3930_v2 }
 0x410   :  { %6591 = vpow2.f32 %v6073_v3 }
 0x411   :  { %v3918_v4 = vpop.f32.mrf.mxu2  ;;  %v3931_v17 = vpop.f32.mrf.mxu3 }
 0x416   :  { %v6592_v5 = vpop.eup %6591 }
 0x417   :  { %v4011_v31 = vadd.f32 1.0, %v6592_v5 }
 0x419   :  { %6593 = vrcp.f32 %v4011_v31  ;;  %v4099_v10 = vand.u32 2147483648, %v4011_v31  ;;  %v4097_v12 = vand.u32 2147483647, %v4011_v31  ;;  %vm4093_vm5 = vweird.f32 %v4011_v31 }
 0x41b   :  { %v4100_v19 = vor.u32 1.1754944e-38, %v4099_v10  ;;  %vm4098_vm7 = vcmp.eq.f32.partialorder %v4097_v12, 8.507059e+37 }
 0x41f   :  { %v6594_v36 = vpop.eup %6593 }
 0x420   :  { %v3942_v37 = vpop.f32.mrf.mxu0  ;;  %v3955_v33 = vpop.f32.mrf.mxu1  ;;  %v4089_v6 = vmul.f32 %v6594_v36, %v4011_v31  ;;  %vm4094_vm4 = vweird.f32 %v6594_v36 }
 0x421   :  { %v3943_v7 = vadd.f32 %v3942_v37, %v2461_v15  ;;  %vm4095_vm6 = vmor %vm4093_vm5, %vm4094_vm4 }
 0x422   :  { %v4090_v44 = vsub.f32 1.0, %v4089_v6 }
 0x423   :  { %v3956_v47 = vadd.f32 %v3955_v33, %v3943_v7 }
 0x424   :  { %v4091_v11 = vmul.f32 %v6594_v36, %v4090_v44 }
 0x426   :  { %v4092_v13 = vadd.f32 %v6594_v36, %v4091_v11 }
 0x427   :  { %v3968_v16 = vpop.f32.mrf.mxu2  ;;  %v3981_v18 = vpop.f32.mrf.mxu3 }
 0x428   :  { %v3969_v20 = vadd.f32 %v3968_v16, %v3956_v47  ;;  %v3944_v58 = vpop.f32.mrf.mxu0  ;;  %v3957_v27 = vpop.f32.mrf.mxu1  ;;  %v4096_v21 = vsel %vm4095_vm6, %v6594_v36, %v4092_v13 }
 0x429   :  { %v4101_v25 = vsel %vm4098_vm7, %v4100_v19, %v4096_v21 }
 0x42a   :  { %v3982_v22 = vadd.f32 %v3981_v18, %v3969_v20  ;;  %4123 = vst [vmem:[#allocation7 + $0x28] sm:$0xff] %v4101_v25 }
 0x42c   :  { %v6074_v56 = vmul.f32 -1.442695, %v3982_v22 }
 0x42e   :  { %6595 = vpow2.f32 %v6074_v56 }
 0x42f   :  { %v3970_v24 = vpop.f32.mrf.mxu2  ;;  %v3983_v57 = vpop.f32.mrf.mxu3 }
 0x434   :  { %v6596_v8 = vpop.eup %6595 }
 0x435   :  { %v4012_v26 = vadd.f32 1.0, %v6596_v8 }
 0x437   :  { %6597 = vrcp.f32 %v4012_v26  ;;  %v4114_v0 = vand.u32 2147483648, %v4012_v26  ;;  %v4112_v30 = vand.u32 2147483647, %v4012_v26  ;;  %vm4108_vm9 = vweird.f32 %v4012_v26 }
 0x439   :  { %v4115_v32 = vor.u32 1.1754944e-38, %v4114_v0  ;;  %vm4113_vm11 = vcmp.eq.f32.partialorder %v4112_v30, 8.507059e+37 }
 0x43d   :  { %v6598_v59 = vpop.eup %6597 }
 0x43e   :  { %v4104_v28 = vmul.f32 %v6598_v59, %v4012_v26  ;;  %vm4109_vm8 = vweird.f32 %v6598_v59 }
 0x43f   :  { %vm4110_vm10 = vmor %vm4108_vm9, %vm4109_vm8 }
 0x440   :  { %v4105_v23 = vsub.f32 1.0, %v4104_v28 }
 0x442   :  { %v4106_v29 = vmul.f32 %v6598_v59, %v4105_v23 }
 0x444   :  { %v4107_v14 = vadd.f32 %v6598_v59, %v4106_v29 }
 0x446   :  { %v4111_v34 = vsel %vm4110_vm10, %v6598_v59, %v4107_v14 }
 0x447   :  { %v4116_v35 = vsel %vm4113_vm11, %v4115_v32, %v4111_v34 }
 0x448   :  { %4124 = vst [vmem:[#allocation7 + $0x30] sm:$0xff] %v4116_v35 }
 0x449   :  { %4135 = dma.vmem_to_hbm [thread:$0]  %s4131_s28, 896, %s4133_s1, [#allocation4]  }
 0x44a   :  { %6675 = dma.done.wait [#allocation4], 896  }
 0x44b   :  { %6676 = vsyncadd [#allocation4], 4294966400 }
 0x44c   :  { %4144 = vsyncpa [#allocation3], 1 }
 0x44d   :  { %4145 = vsyncpa [#allocation6], 1 }
 0x44e   :  { %4146 = vsyncpa [#allocation4], 1 }

</bundles_post_ra>
